<compile_context>
chip_gen: v7x
topology: tpu7x:2x2x1
jax: 0.10.0
libtpu: 0.0.40
codegen_flags: <defaults>
</compile_context>

<pallas_src>
import functools

import jax
import jax.numpy as jnp
from jax.experimental import pallas as pl
from jax.experimental.pallas import tpu as pltpu


def generate_masks(num):
    """Verbatim port of src/model/bfn.py::generate_masks (pure Python)."""
    masks = []
    for i in range(num):
        now = list(range(2 ** num))
        length = 2 ** (num - i)
        for j in range(2 ** i):
            tmp = now[j * length:j * length + length // 2]
            now[j * length:j * length + length // 2] = \
                now[j * length + length // 2:j * length + length]
            now[j * length + length // 2:j * length + length] = tmp
        masks.append(now)
    return masks


def _make_butterfly_kernel(C, H, W, d, masks, skip_connection):
    """Fused kernel for one image (block = (1, C, H, W)).

    Activations are kept as C per-channel (H, W) f32 tiles: W on lanes, H on
    sublanes, channels/batch on untiled axes (so the channel shuffle is free).
    """
    num_butterflies = len(masks)
    taps = [(i, j) for i in range(3) for j in range(3)]

    def kernel(w_ref, b_ref, x_ref, out_ref):
        # ---- load the image once: list of C tiles (H, W) ----
        x = [x_ref[0, c] for c in range(C)]

        # ---- hoisted edge masks for the 9 dilated taps (in-kernel SAME padding) ----
        row = jax.lax.broadcasted_iota(jnp.int32, (H, W), 0)
        col = jax.lax.broadcasted_iota(jnp.int32, (H, W), 1)
        tap_mask = {}
        for (i, j) in taps:
            di, dj = (i - 1) * d, (j - 1) * d
            m = None
            if di != 0:
                m = (row + di >= 0) & (row + di < H)
            if dj != 0:
                mc = (col + dj >= 0) & (col + dj < W)
                m = mc if m is None else (m & mc)
            tap_mask[(i, j)] = m          # None -> interior tap, no mask needed

        def shifted(t, i, j):
            # t[h, w] -> t[h + di, w + dj], zeros outside the image (zero padding).
            di, dj = (i - 1) * d, (j - 1) * d
            if di != 0:
                t = pltpu.roll(t, shift=(-di) % H, axis=0)   # sublane rotate (XLU)
            if dj != 0:
                t = pltpu.roll(t, shift=(-dj) % W, axis=1)   # lane rotate (XLU)
            m = tap_mask[(i, j)]
            if m is not None:
                t = jnp.where(m, t, 0.0)
            return t

        def w_s(k, c, i, j):   # depthwise weight: SMEM scalar read, static index
            return w_ref[((k * C + c) * 3 + i) * 3 + j]

        def b_s(k, c):         # depthwise bias: SMEM scalar read
            return b_ref[k * C + c]

        last = x
        for s in range(num_butterflies):
            perm = masks[s]                      # static channel permutation
            kA, kB = 2 * s, 2 * s + 1
            accA = [jnp.zeros((H, W), jnp.float32) + b_s(kA, c) for c in range(C)]
            accB = [jnp.zeros((H, W), jnp.float32) + b_s(kB, c) for c in range(C)]
            for (i, j) in taps:
                # one masked shift per (channel, tap), shared by both convs
                sh = [shifted(last[c], i, j) for c in range(C)]
                for c in range(C):
                    accA[c] = accA[c] + sh[c] * w_s(kA, c, i, j)
                    # conv B sees the channel-shuffled input: channel perm[c]
                    accB[c] = accB[c] + sh[perm[c]] * w_s(kB, c, i, j)
            now = []
            for c in range(C):
                y = jax.nn.relu(accA[c]) + jax.nn.relu(accB[c])
                if skip_connection:
                    y = y + last[c]
                now.append(y)
            last = now

        # trailing residual of the module: now + head(x)   (head == Identity here)
        for c in range(C):
            out_ref[0, c] = (last[c] + x[c]).astype(out_ref.dtype)

    return kernel


@functools.partial(jax.jit, static_argnames=("dilation", "skip_connection"))
def butterfly_conv_v1(x, params, *, dilation=1, skip_connection=True):
    """ButterflyConv_v1 forward (in_channels == out_channels). x: (N, C, H, W)."""
    N, C, H, W = x.shape
    dw_w = params["dw_w"].astype(jnp.float32)   # (2*num_butterflies, C, 3, 3)
    dw_b = params["dw_b"].astype(jnp.float32)   # (2*num_butterflies, C)
    num_convs = dw_w.shape[0]
    num_butterflies = num_convs // 2
    if num_butterflies < 1 or C != 2 ** num_butterflies:
        raise ValueError("channel count must equal 2**num_butterflies (>= 2)")

    masks = generate_masks(num_butterflies)
    kernel = _make_butterfly_kernel(C, H, W, int(dilation), masks,
                                    bool(skip_connection))

    w_flat = dw_w.reshape(-1)   # SMEM scalar table: index ((k*C + c)*3 + i)*3 + j
    b_flat = dw_b.reshape(-1)   # SMEM scalar table: index k*C + c

    blk_bytes = C * H * W * 4
    vmem_limit = min(56 * 1024 * 1024,
                     max(16 * 1024 * 1024, 16 * blk_bytes + (2 << 20)))

    return pl.pallas_call(
        kernel,
        out_shape=jax.ShapeDtypeStruct((N, C, H, W), jnp.float32),
        grid_spec=pltpu.PrefetchScalarGridSpec(
            num_scalar_prefetch=0,
            grid=(N,),
            in_specs=[
                pl.BlockSpec(memory_space=pltpu.MemorySpace.SMEM),    # dw weights
                pl.BlockSpec(memory_space=pltpu.MemorySpace.SMEM),    # dw biases
                pl.BlockSpec((1, C, H, W), lambda n: (n, 0, 0, 0)),   # image n
            ],
            out_specs=pl.BlockSpec((1, C, H, W), lambda n: (n, 0, 0, 0)),
        ),
        compiler_params=pltpu.CompilerParams(
            dimension_semantics=("parallel",),      # batch across TCs (v7x)
            vmem_limit_bytes=vmem_limit,
        ),
    )(w_flat, b_flat, x.astype(jnp.float32))


# ---------------- pure-JAX reference (mirrors the PyTorch forward) ----------------

def _depthwise_conv_ref(x, w, b, dilation):
    C = x.shape[1]
    y = jax.lax.conv_general_dilated(
        x, w.reshape(C, 1, 3, 3),
        window_strides=(1, 1),
        padding=((dilation, dilation), (dilation, dilation)),
        rhs_dilation=(dilation, dilation),
        dimension_numbers=("NCHW", "OIHW", "NCHW"),
        feature_group_count=C,
    )
    return y + b.reshape(1, C, 1, 1)


def butterfly_conv_v1_reference(x, params, *, dilation=1, skip_connection=True):
    C = x.shape[1]
    dw_w, dw_b = params["dw_w"], params["dw_b"]
    num_butterflies = dw_w.shape[0] // 2
    masks = generate_masks(num_butterflies)
    last = x
    now = x
    for s in range(num_butterflies):
        perm = jnp.asarray(masks[s], dtype=jnp.int32)
        shuffled = last[:, perm, :, :]
        now = (jax.nn.relu(_depthwise_conv_ref(last, dw_w[2 * s], dw_b[2 * s], dilation))
               + jax.nn.relu(_depthwise_conv_ref(shuffled, dw_w[2 * s + 1],
                                                 dw_b[2 * s + 1], dilation)))
        if skip_connection:
            now = now + last
        last = now
    return now + x


if __name__ == "__main__":
    key = jax.random.PRNGKey(0)
    kx, kw, kb = jax.random.split(key, 3)

    N, C, H, W = 2, 4, 16, 16          # in_channels == out_channels == 4
    dilation = 1
    skip_connection = True
    num_butterflies = 2                # log2(C)
    num_convs = 2 * num_butterflies

    x = jax.random.normal(kx, (N, C, H, W), jnp.float32)
    params = {
        "dw_w": jax.random.normal(kw, (num_convs, C, 3, 3), jnp.float32) * 0.1,
        "dw_b": jax.random.normal(kb, (num_convs, C), jnp.float32) * 0.01,
    }

    y = butterfly_conv_v1(x, params, dilation=dilation,
                          skip_connection=skip_connection)
    jax.block_until_ready(y)

    assert y.shape == (N, C, H, W), y.shape
    assert bool(jnp.all(jnp.isfinite(y)))

    y_ref = butterfly_conv_v1_reference(x, params, dilation=dilation,
                                        skip_connection=skip_connection)
    max_err = float(jnp.max(jnp.abs(y - y_ref)))
    assert max_err < 1e-4, f"mismatch vs reference: {max_err}"

    print("KERNEL_OK")
</pallas_src>

<mosaic_0001>
module attributes {stable_mosaic.version = 11 : i64} {
  func.func @kernel(%arg0: i32, %arg1: memref<144xf32, #tpu.memory_space<smem>>, %arg2: memref<16xf32, #tpu.memory_space<smem>>, %arg3: memref<1x4x16x16xf32, #tpu.memory_space<vmem>>, %arg4: memref<1x4x16x16xf32, #tpu.memory_space<vmem>>) attributes {dimension_semantics = [#tpu.dimension_semantics<parallel>], iteration_bounds = array<i64: 2>, scalar_prefetch = 0 : i64, scratch_operands = 0 : i64, tpu.core_type = #tpu.core_type<tc>, window_params = [{transform_indices = @transform_0, window_bounds = array<i64: 144>}, {transform_indices = @transform_1, window_bounds = array<i64: 16>}, {transform_indices = @transform_2, window_bounds = array<i64: 1, 4, 16, 16>}, {transform_indices = @transform_3, window_bounds = array<i64: 1, 4, 16, 16>}]} {
    %c0 = arith.constant 0 : index
    %c0_0 = arith.constant 0 : index
    %c0_1 = arith.constant 0 : index
    %c0_2 = arith.constant 0 : index
    %0 = vector.load %arg3[%c0, %c0_0, %c0_1, %c0_2] : memref<1x4x16x16xf32, #tpu.memory_space<vmem>>, vector<1x1x16x16xf32>
    %1 = vector.shape_cast %0 : vector<1x1x16x16xf32> to vector<16x16xf32>
    %c0_3 = arith.constant 0 : index
    %c1 = arith.constant 1 : index
    %c0_4 = arith.constant 0 : index
    %c0_5 = arith.constant 0 : index
    %2 = vector.load %arg3[%c0_3, %c1, %c0_4, %c0_5] : memref<1x4x16x16xf32, #tpu.memory_space<vmem>>, vector<1x1x16x16xf32>
    %3 = vector.shape_cast %2 : vector<1x1x16x16xf32> to vector<16x16xf32>
    %c0_6 = arith.constant 0 : index
    %c2 = arith.constant 2 : index
    %c0_7 = arith.constant 0 : index
    %c0_8 = arith.constant 0 : index
    %4 = vector.load %arg3[%c0_6, %c2, %c0_7, %c0_8] : memref<1x4x16x16xf32, #tpu.memory_space<vmem>>, vector<1x1x16x16xf32>
    %5 = vector.shape_cast %4 : vector<1x1x16x16xf32> to vector<16x16xf32>
    %c0_9 = arith.constant 0 : index
    %c3 = arith.constant 3 : index
    %c0_10 = arith.constant 0 : index
    %c0_11 = arith.constant 0 : index
    %6 = vector.load %arg3[%c0_9, %c3, %c0_10, %c0_11] : memref<1x4x16x16xf32, #tpu.memory_space<vmem>>, vector<1x1x16x16xf32>
    %7 = vector.shape_cast %6 : vector<1x1x16x16xf32> to vector<16x16xf32>
    %8 = tpu.iota {dimensions = array<i32: 0>} : vector<16x16xi32>
    %9 = tpu.iota {dimensions = array<i32: 1>} : vector<16x16xi32>
    %c-1_i32 = arith.constant -1 : i32
    %10 = vector.broadcast %c-1_i32 : i32 to vector<16x16xi32>
    %11 = arith.addi %8, %10 : vector<16x16xi32>
    %c0_i32 = arith.constant 0 : i32
    %12 = vector.broadcast %c0_i32 : i32 to vector<16x16xi32>
    %13 = arith.cmpi sge, %11, %12 : vector<16x16xi32>
    %c-1_i32_12 = arith.constant -1 : i32
    %14 = vector.broadcast %c-1_i32_12 : i32 to vector<16x16xi32>
    %15 = arith.addi %8, %14 : vector<16x16xi32>
    %c16_i32 = arith.constant 16 : i32
    %16 = vector.broadcast %c16_i32 : i32 to vector<16x16xi32>
    %17 = arith.cmpi slt, %15, %16 : vector<16x16xi32>
    %18 = arith.andi %13, %17 : vector<16x16xi1>
    %c-1_i32_13 = arith.constant -1 : i32
    %19 = vector.broadcast %c-1_i32_13 : i32 to vector<16x16xi32>
    %20 = arith.addi %9, %19 : vector<16x16xi32>
    %c0_i32_14 = arith.constant 0 : i32
    %21 = vector.broadcast %c0_i32_14 : i32 to vector<16x16xi32>
    %22 = arith.cmpi sge, %20, %21 : vector<16x16xi32>
    %c-1_i32_15 = arith.constant -1 : i32
    %23 = vector.broadcast %c-1_i32_15 : i32 to vector<16x16xi32>
    %24 = arith.addi %9, %23 : vector<16x16xi32>
    %c16_i32_16 = arith.constant 16 : i32
    %25 = vector.broadcast %c16_i32_16 : i32 to vector<16x16xi32>
    %26 = arith.cmpi slt, %24, %25 : vector<16x16xi32>
    %27 = arith.andi %22, %26 : vector<16x16xi1>
    %28 = arith.andi %18, %27 : vector<16x16xi1>
    %c-1_i32_17 = arith.constant -1 : i32
    %29 = vector.broadcast %c-1_i32_17 : i32 to vector<16x16xi32>
    %30 = arith.addi %8, %29 : vector<16x16xi32>
    %c0_i32_18 = arith.constant 0 : i32
    %31 = vector.broadcast %c0_i32_18 : i32 to vector<16x16xi32>
    %32 = arith.cmpi sge, %30, %31 : vector<16x16xi32>
    %c-1_i32_19 = arith.constant -1 : i32
    %33 = vector.broadcast %c-1_i32_19 : i32 to vector<16x16xi32>
    %34 = arith.addi %8, %33 : vector<16x16xi32>
    %c16_i32_20 = arith.constant 16 : i32
    %35 = vector.broadcast %c16_i32_20 : i32 to vector<16x16xi32>
    %36 = arith.cmpi slt, %34, %35 : vector<16x16xi32>
    %37 = arith.andi %32, %36 : vector<16x16xi1>
    %c-1_i32_21 = arith.constant -1 : i32
    %38 = vector.broadcast %c-1_i32_21 : i32 to vector<16x16xi32>
    %39 = arith.addi %8, %38 : vector<16x16xi32>
    %c0_i32_22 = arith.constant 0 : i32
    %40 = vector.broadcast %c0_i32_22 : i32 to vector<16x16xi32>
    %41 = arith.cmpi sge, %39, %40 : vector<16x16xi32>
    %c-1_i32_23 = arith.constant -1 : i32
    %42 = vector.broadcast %c-1_i32_23 : i32 to vector<16x16xi32>
    %43 = arith.addi %8, %42 : vector<16x16xi32>
    %c16_i32_24 = arith.constant 16 : i32
    %44 = vector.broadcast %c16_i32_24 : i32 to vector<16x16xi32>
    %45 = arith.cmpi slt, %43, %44 : vector<16x16xi32>
    %46 = arith.andi %41, %45 : vector<16x16xi1>
    %c1_i32 = arith.constant 1 : i32
    %47 = vector.broadcast %c1_i32 : i32 to vector<16x16xi32>
    %48 = arith.addi %9, %47 : vector<16x16xi32>
    %c0_i32_25 = arith.constant 0 : i32
    %49 = vector.broadcast %c0_i32_25 : i32 to vector<16x16xi32>
    %50 = arith.cmpi sge, %48, %49 : vector<16x16xi32>
    %c1_i32_26 = arith.constant 1 : i32
    %51 = vector.broadcast %c1_i32_26 : i32 to vector<16x16xi32>
    %52 = arith.addi %9, %51 : vector<16x16xi32>
    %c16_i32_27 = arith.constant 16 : i32
    %53 = vector.broadcast %c16_i32_27 : i32 to vector<16x16xi32>
    %54 = arith.cmpi slt, %52, %53 : vector<16x16xi32>
    %55 = arith.andi %50, %54 : vector<16x16xi1>
    %56 = arith.andi %46, %55 : vector<16x16xi1>
    %c-1_i32_28 = arith.constant -1 : i32
    %57 = vector.broadcast %c-1_i32_28 : i32 to vector<16x16xi32>
    %58 = arith.addi %9, %57 : vector<16x16xi32>
    %c0_i32_29 = arith.constant 0 : i32
    %59 = vector.broadcast %c0_i32_29 : i32 to vector<16x16xi32>
    %60 = arith.cmpi sge, %58, %59 : vector<16x16xi32>
    %c-1_i32_30 = arith.constant -1 : i32
    %61 = vector.broadcast %c-1_i32_30 : i32 to vector<16x16xi32>
    %62 = arith.addi %9, %61 : vector<16x16xi32>
    %c16_i32_31 = arith.constant 16 : i32
    %63 = vector.broadcast %c16_i32_31 : i32 to vector<16x16xi32>
    %64 = arith.cmpi slt, %62, %63 : vector<16x16xi32>
    %65 = arith.andi %60, %64 : vector<16x16xi1>
    %c1_i32_32 = arith.constant 1 : i32
    %66 = vector.broadcast %c1_i32_32 : i32 to vector<16x16xi32>
    %67 = arith.addi %9, %66 : vector<16x16xi32>
    %c0_i32_33 = arith.constant 0 : i32
    %68 = vector.broadcast %c0_i32_33 : i32 to vector<16x16xi32>
    %69 = arith.cmpi sge, %67, %68 : vector<16x16xi32>
    %c1_i32_34 = arith.constant 1 : i32
    %70 = vector.broadcast %c1_i32_34 : i32 to vector<16x16xi32>
    %71 = arith.addi %9, %70 : vector<16x16xi32>
    %c16_i32_35 = arith.constant 16 : i32
    %72 = vector.broadcast %c16_i32_35 : i32 to vector<16x16xi32>
    %73 = arith.cmpi slt, %71, %72 : vector<16x16xi32>
    %74 = arith.andi %69, %73 : vector<16x16xi1>
    %c1_i32_36 = arith.constant 1 : i32
    %75 = vector.broadcast %c1_i32_36 : i32 to vector<16x16xi32>
    %76 = arith.addi %8, %75 : vector<16x16xi32>
    %c0_i32_37 = arith.constant 0 : i32
    %77 = vector.broadcast %c0_i32_37 : i32 to vector<16x16xi32>
    %78 = arith.cmpi sge, %76, %77 : vector<16x16xi32>
    %c1_i32_38 = arith.constant 1 : i32
    %79 = vector.broadcast %c1_i32_38 : i32 to vector<16x16xi32>
    %80 = arith.addi %8, %79 : vector<16x16xi32>
    %c16_i32_39 = arith.constant 16 : i32
    %81 = vector.broadcast %c16_i32_39 : i32 to vector<16x16xi32>
    %82 = arith.cmpi slt, %80, %81 : vector<16x16xi32>
    %83 = arith.andi %78, %82 : vector<16x16xi1>
    %c-1_i32_40 = arith.constant -1 : i32
    %84 = vector.broadcast %c-1_i32_40 : i32 to vector<16x16xi32>
    %85 = arith.addi %9, %84 : vector<16x16xi32>
    %c0_i32_41 = arith.constant 0 : i32
    %86 = vector.broadcast %c0_i32_41 : i32 to vector<16x16xi32>
    %87 = arith.cmpi sge, %85, %86 : vector<16x16xi32>
    %c-1_i32_42 = arith.constant -1 : i32
    %88 = vector.broadcast %c-1_i32_42 : i32 to vector<16x16xi32>
    %89 = arith.addi %9, %88 : vector<16x16xi32>
    %c16_i32_43 = arith.constant 16 : i32
    %90 = vector.broadcast %c16_i32_43 : i32 to vector<16x16xi32>
    %91 = arith.cmpi slt, %89, %90 : vector<16x16xi32>
    %92 = arith.andi %87, %91 : vector<16x16xi1>
    %93 = arith.andi %83, %92 : vector<16x16xi1>
    %c1_i32_44 = arith.constant 1 : i32
    %94 = vector.broadcast %c1_i32_44 : i32 to vector<16x16xi32>
    %95 = arith.addi %8, %94 : vector<16x16xi32>
    %c0_i32_45 = arith.constant 0 : i32
    %96 = vector.broadcast %c0_i32_45 : i32 to vector<16x16xi32>
    %97 = arith.cmpi sge, %95, %96 : vector<16x16xi32>
    %c1_i32_46 = arith.constant 1 : i32
    %98 = vector.broadcast %c1_i32_46 : i32 to vector<16x16xi32>
    %99 = arith.addi %8, %98 : vector<16x16xi32>
    %c16_i32_47 = arith.constant 16 : i32
    %100 = vector.broadcast %c16_i32_47 : i32 to vector<16x16xi32>
    %101 = arith.cmpi slt, %99, %100 : vector<16x16xi32>
    %102 = arith.andi %97, %101 : vector<16x16xi1>
    %c1_i32_48 = arith.constant 1 : i32
    %103 = vector.broadcast %c1_i32_48 : i32 to vector<16x16xi32>
    %104 = arith.addi %8, %103 : vector<16x16xi32>
    %c0_i32_49 = arith.constant 0 : i32
    %105 = vector.broadcast %c0_i32_49 : i32 to vector<16x16xi32>
    %106 = arith.cmpi sge, %104, %105 : vector<16x16xi32>
    %c1_i32_50 = arith.constant 1 : i32
    %107 = vector.broadcast %c1_i32_50 : i32 to vector<16x16xi32>
    %108 = arith.addi %8, %107 : vector<16x16xi32>
    %c16_i32_51 = arith.constant 16 : i32
    %109 = vector.broadcast %c16_i32_51 : i32 to vector<16x16xi32>
    %110 = arith.cmpi slt, %108, %109 : vector<16x16xi32>
    %111 = arith.andi %106, %110 : vector<16x16xi1>
    %c1_i32_52 = arith.constant 1 : i32
    %112 = vector.broadcast %c1_i32_52 : i32 to vector<16x16xi32>
    %113 = arith.addi %9, %112 : vector<16x16xi32>
    %c0_i32_53 = arith.constant 0 : i32
    %114 = vector.broadcast %c0_i32_53 : i32 to vector<16x16xi32>
    %115 = arith.cmpi sge, %113, %114 : vector<16x16xi32>
    %c1_i32_54 = arith.constant 1 : i32
    %116 = vector.broadcast %c1_i32_54 : i32 to vector<16x16xi32>
    %117 = arith.addi %9, %116 : vector<16x16xi32>
    %c16_i32_55 = arith.constant 16 : i32
    %118 = vector.broadcast %c16_i32_55 : i32 to vector<16x16xi32>
    %119 = arith.cmpi slt, %117, %118 : vector<16x16xi32>
    %120 = arith.andi %115, %119 : vector<16x16xi1>
    %121 = arith.andi %111, %120 : vector<16x16xi1>
    %cst = arith.constant 0.000000e+00 : f32
    %122 = vector.broadcast %cst : f32 to vector<16x16xf32>
    %c0_56 = arith.constant 0 : index
    %123 = memref.load %arg2[%c0_56] : memref<16xf32, #tpu.memory_space<smem>>
    %124 = vector.broadcast %123 : f32 to vector<16x16xf32>
    %125 = arith.addf %122, %124 : vector<16x16xf32>
    %cst_57 = arith.constant 0.000000e+00 : f32
    %126 = vector.broadcast %cst_57 : f32 to vector<16x16xf32>
    %c1_58 = arith.constant 1 : index
    %127 = memref.load %arg2[%c1_58] : memref<16xf32, #tpu.memory_space<smem>>
    %128 = vector.broadcast %127 : f32 to vector<16x16xf32>
    %129 = arith.addf %126, %128 : vector<16x16xf32>
    %cst_59 = arith.constant 0.000000e+00 : f32
    %130 = vector.broadcast %cst_59 : f32 to vector<16x16xf32>
    %c2_60 = arith.constant 2 : index
    %131 = memref.load %arg2[%c2_60] : memref<16xf32, #tpu.memory_space<smem>>
    %132 = vector.broadcast %131 : f32 to vector<16x16xf32>
    %133 = arith.addf %130, %132 : vector<16x16xf32>
    %cst_61 = arith.constant 0.000000e+00 : f32
    %134 = vector.broadcast %cst_61 : f32 to vector<16x16xf32>
    %c3_62 = arith.constant 3 : index
    %135 = memref.load %arg2[%c3_62] : memref<16xf32, #tpu.memory_space<smem>>
    %136 = vector.broadcast %135 : f32 to vector<16x16xf32>
    %137 = arith.addf %134, %136 : vector<16x16xf32>
    %cst_63 = arith.constant 0.000000e+00 : f32
    %138 = vector.broadcast %cst_63 : f32 to vector<16x16xf32>
    %c4 = arith.constant 4 : index
    %139 = memref.load %arg2[%c4] : memref<16xf32, #tpu.memory_space<smem>>
    %140 = vector.broadcast %139 : f32 to vector<16x16xf32>
    %141 = arith.addf %138, %140 : vector<16x16xf32>
    %cst_64 = arith.constant 0.000000e+00 : f32
    %142 = vector.broadcast %cst_64 : f32 to vector<16x16xf32>
    %c5 = arith.constant 5 : index
    %143 = memref.load %arg2[%c5] : memref<16xf32, #tpu.memory_space<smem>>
    %144 = vector.broadcast %143 : f32 to vector<16x16xf32>
    %145 = arith.addf %142, %144 : vector<16x16xf32>
    %cst_65 = arith.constant 0.000000e+00 : f32
    %146 = vector.broadcast %cst_65 : f32 to vector<16x16xf32>
    %c6 = arith.constant 6 : index
    %147 = memref.load %arg2[%c6] : memref<16xf32, #tpu.memory_space<smem>>
    %148 = vector.broadcast %147 : f32 to vector<16x16xf32>
    %149 = arith.addf %146, %148 : vector<16x16xf32>
    %cst_66 = arith.constant 0.000000e+00 : f32
    %150 = vector.broadcast %cst_66 : f32 to vector<16x16xf32>
    %c7 = arith.constant 7 : index
    %151 = memref.load %arg2[%c7] : memref<16xf32, #tpu.memory_space<smem>>
    %152 = vector.broadcast %151 : f32 to vector<16x16xf32>
    %153 = arith.addf %150, %152 : vector<16x16xf32>
    %c1_i32_67 = arith.constant 1 : i32
    %154 = tpu.dynamic_rotate %1 by %c1_i32_67 dim 0 : vector<16x16xf32>, i32 -> vector<16x16xf32>
    %c1_i32_68 = arith.constant 1 : i32
    %155 = tpu.dynamic_rotate %154 by %c1_i32_68 dim 1 : vector<16x16xf32>, i32 -> vector<16x16xf32>
    %cst_69 = arith.constant 0.000000e+00 : f32
    %156 = vector.broadcast %cst_69 : f32 to vector<16x16xf32>
    %157 = arith.select %28, %155, %156 : vector<16x16xi1>, vector<16x16xf32>
    %c1_i32_70 = arith.constant 1 : i32
    %158 = tpu.dynamic_rotate %3 by %c1_i32_70 dim 0 : vector<16x16xf32>, i32 -> vector<16x16xf32>
    %c1_i32_71 = arith.constant 1 : i32
    %159 = tpu.dynamic_rotate %158 by %c1_i32_71 dim 1 : vector<16x16xf32>, i32 -> vector<16x16xf32>
    %cst_72 = arith.constant 0.000000e+00 : f32
    %160 = vector.broadcast %cst_72 : f32 to vector<16x16xf32>
    %161 = arith.select %28, %159, %160 : vector<16x16xi1>, vector<16x16xf32>
    %c1_i32_73 = arith.constant 1 : i32
    %162 = tpu.dynamic_rotate %5 by %c1_i32_73 dim 0 : vector<16x16xf32>, i32 -> vector<16x16xf32>
    %c1_i32_74 = arith.constant 1 : i32
    %163 = tpu.dynamic_rotate %162 by %c1_i32_74 dim 1 : vector<16x16xf32>, i32 -> vector<16x16xf32>
    %cst_75 = arith.constant 0.000000e+00 : f32
    %164 = vector.broadcast %cst_75 : f32 to vector<16x16xf32>
    %165 = arith.select %28, %163, %164 : vector<16x16xi1>, vector<16x16xf32>
    %c1_i32_76 = arith.constant 1 : i32
    %166 = tpu.dynamic_rotate %7 by %c1_i32_76 dim 0 : vector<16x16xf32>, i32 -> vector<16x16xf32>
    %c1_i32_77 = arith.constant 1 : i32
    %167 = tpu.dynamic_rotate %166 by %c1_i32_77 dim 1 : vector<16x16xf32>, i32 -> vector<16x16xf32>
    %cst_78 = arith.constant 0.000000e+00 : f32
    %168 = vector.broadcast %cst_78 : f32 to vector<16x16xf32>
    %169 = arith.select %28, %167, %168 : vector<16x16xi1>, vector<16x16xf32>
    %c0_79 = arith.constant 0 : index
    %170 = memref.load %arg1[%c0_79] : memref<144xf32, #tpu.memory_space<smem>>
    %171 = vector.broadcast %170 : f32 to vector<16x16xf32>
    %172 = arith.mulf %157, %171 : vector<16x16xf32>
    %173 = arith.addf %125, %172 : vector<16x16xf32>
    %c36 = arith.constant 36 : index
    %174 = memref.load %arg1[%c36] : memref<144xf32, #tpu.memory_space<smem>>
    %175 = vector.broadcast %174 : f32 to vector<16x16xf32>
    %176 = arith.mulf %165, %175 : vector<16x16xf32>
    %177 = arith.addf %141, %176 : vector<16x16xf32>
    %c9 = arith.constant 9 : index
    %178 = memref.load %arg1[%c9] : memref<144xf32, #tpu.memory_space<smem>>
    %179 = vector.broadcast %178 : f32 to vector<16x16xf32>
    %180 = arith.mulf %161, %179 : vector<16x16xf32>
    %181 = arith.addf %129, %180 : vector<16x16xf32>
    %c45 = arith.constant 45 : index
    %182 = memref.load %arg1[%c45] : memref<144xf32, #tpu.memory_space<smem>>
    %183 = vector.broadcast %182 : f32 to vector<16x16xf32>
    %184 = arith.mulf %169, %183 : vector<16x16xf32>
    %185 = arith.addf %145, %184 : vector<16x16xf32>
    %c18 = arith.constant 18 : index
    %186 = memref.load %arg1[%c18] : memref<144xf32, #tpu.memory_space<smem>>
    %187 = vector.broadcast %186 : f32 to vector<16x16xf32>
    %188 = arith.mulf %165, %187 : vector<16x16xf32>
    %189 = arith.addf %133, %188 : vector<16x16xf32>
    %c54 = arith.constant 54 : index
    %190 = memref.load %arg1[%c54] : memref<144xf32, #tpu.memory_space<smem>>
    %191 = vector.broadcast %190 : f32 to vector<16x16xf32>
    %192 = arith.mulf %157, %191 : vector<16x16xf32>
    %193 = arith.addf %149, %192 : vector<16x16xf32>
    %c27 = arith.constant 27 : index
    %194 = memref.load %arg1[%c27] : memref<144xf32, #tpu.memory_space<smem>>
    %195 = vector.broadcast %194 : f32 to vector<16x16xf32>
    %196 = arith.mulf %169, %195 : vector<16x16xf32>
    %197 = arith.addf %137, %196 : vector<16x16xf32>
    %c63 = arith.constant 63 : index
    %198 = memref.load %arg1[%c63] : memref<144xf32, #tpu.memory_space<smem>>
    %199 = vector.broadcast %198 : f32 to vector<16x16xf32>
    %200 = arith.mulf %161, %199 : vector<16x16xf32>
    %201 = arith.addf %153, %200 : vector<16x16xf32>
    %c1_i32_80 = arith.constant 1 : i32
    %202 = tpu.dynamic_rotate %1 by %c1_i32_80 dim 0 : vector<16x16xf32>, i32 -> vector<16x16xf32>
    %cst_81 = arith.constant 0.000000e+00 : f32
    %203 = vector.broadcast %cst_81 : f32 to vector<16x16xf32>
    %204 = arith.select %37, %202, %203 : vector<16x16xi1>, vector<16x16xf32>
    %c1_i32_82 = arith.constant 1 : i32
    %205 = tpu.dynamic_rotate %3 by %c1_i32_82 dim 0 : vector<16x16xf32>, i32 -> vector<16x16xf32>
    %cst_83 = arith.constant 0.000000e+00 : f32
    %206 = vector.broadcast %cst_83 : f32 to vector<16x16xf32>
    %207 = arith.select %37, %205, %206 : vector<16x16xi1>, vector<16x16xf32>
    %c1_i32_84 = arith.constant 1 : i32
    %208 = tpu.dynamic_rotate %5 by %c1_i32_84 dim 0 : vector<16x16xf32>, i32 -> vector<16x16xf32>
    %cst_85 = arith.constant 0.000000e+00 : f32
    %209 = vector.broadcast %cst_85 : f32 to vector<16x16xf32>
    %210 = arith.select %37, %208, %209 : vector<16x16xi1>, vector<16x16xf32>
    %c1_i32_86 = arith.constant 1 : i32
    %211 = tpu.dynamic_rotate %7 by %c1_i32_86 dim 0 : vector<16x16xf32>, i32 -> vector<16x16xf32>
    %cst_87 = arith.constant 0.000000e+00 : f32
    %212 = vector.broadcast %cst_87 : f32 to vector<16x16xf32>
    %213 = arith.select %37, %211, %212 : vector<16x16xi1>, vector<16x16xf32>
    %c1_88 = arith.constant 1 : index
    %214 = memref.load %arg1[%c1_88] : memref<144xf32, #tpu.memory_space<smem>>
    %215 = vector.broadcast %214 : f32 to vector<16x16xf32>
    %216 = arith.mulf %204, %215 : vector<16x16xf32>
    %217 = arith.addf %173, %216 : vector<16x16xf32>
    %c37 = arith.constant 37 : index
    %218 = memref.load %arg1[%c37] : memref<144xf32, #tpu.memory_space<smem>>
    %219 = vector.broadcast %218 : f32 to vector<16x16xf32>
    %220 = arith.mulf %210, %219 : vector<16x16xf32>
    %221 = arith.addf %177, %220 : vector<16x16xf32>
    %c10 = arith.constant 10 : index
    %222 = memref.load %arg1[%c10] : memref<144xf32, #tpu.memory_space<smem>>
    %223 = vector.broadcast %222 : f32 to vector<16x16xf32>
    %224 = arith.mulf %207, %223 : vector<16x16xf32>
    %225 = arith.addf %181, %224 : vector<16x16xf32>
    %c46 = arith.constant 46 : index
    %226 = memref.load %arg1[%c46] : memref<144xf32, #tpu.memory_space<smem>>
    %227 = vector.broadcast %226 : f32 to vector<16x16xf32>
    %228 = arith.mulf %213, %227 : vector<16x16xf32>
    %229 = arith.addf %185, %228 : vector<16x16xf32>
    %c19 = arith.constant 19 : index
    %230 = memref.load %arg1[%c19] : memref<144xf32, #tpu.memory_space<smem>>
    %231 = vector.broadcast %230 : f32 to vector<16x16xf32>
    %232 = arith.mulf %210, %231 : vector<16x16xf32>
    %233 = arith.addf %189, %232 : vector<16x16xf32>
    %c55 = arith.constant 55 : index
    %234 = memref.load %arg1[%c55] : memref<144xf32, #tpu.memory_space<smem>>
    %235 = vector.broadcast %234 : f32 to vector<16x16xf32>
    %236 = arith.mulf %204, %235 : vector<16x16xf32>
    %237 = arith.addf %193, %236 : vector<16x16xf32>
    %c28 = arith.constant 28 : index
    %238 = memref.load %arg1[%c28] : memref<144xf32, #tpu.memory_space<smem>>
    %239 = vector.broadcast %238 : f32 to vector<16x16xf32>
    %240 = arith.mulf %213, %239 : vector<16x16xf32>
    %241 = arith.addf %197, %240 : vector<16x16xf32>
    %c64 = arith.constant 64 : index
    %242 = memref.load %arg1[%c64] : memref<144xf32, #tpu.memory_space<smem>>
    %243 = vector.broadcast %242 : f32 to vector<16x16xf32>
    %244 = arith.mulf %207, %243 : vector<16x16xf32>
    %245 = arith.addf %201, %244 : vector<16x16xf32>
    %c1_i32_89 = arith.constant 1 : i32
    %246 = tpu.dynamic_rotate %1 by %c1_i32_89 dim 0 : vector<16x16xf32>, i32 -> vector<16x16xf32>
    %c15_i32 = arith.constant 15 : i32
    %247 = tpu.dynamic_rotate %246 by %c15_i32 dim 1 : vector<16x16xf32>, i32 -> vector<16x16xf32>
    %cst_90 = arith.constant 0.000000e+00 : f32
    %248 = vector.broadcast %cst_90 : f32 to vector<16x16xf32>
    %249 = arith.select %56, %247, %248 : vector<16x16xi1>, vector<16x16xf32>
    %c1_i32_91 = arith.constant 1 : i32
    %250 = tpu.dynamic_rotate %3 by %c1_i32_91 dim 0 : vector<16x16xf32>, i32 -> vector<16x16xf32>
    %c15_i32_92 = arith.constant 15 : i32
    %251 = tpu.dynamic_rotate %250 by %c15_i32_92 dim 1 : vector<16x16xf32>, i32 -> vector<16x16xf32>
    %cst_93 = arith.constant 0.000000e+00 : f32
    %252 = vector.broadcast %cst_93 : f32 to vector<16x16xf32>
    %253 = arith.select %56, %251, %252 : vector<16x16xi1>, vector<16x16xf32>
    %c1_i32_94 = arith.constant 1 : i32
    %254 = tpu.dynamic_rotate %5 by %c1_i32_94 dim 0 : vector<16x16xf32>, i32 -> vector<16x16xf32>
    %c15_i32_95 = arith.constant 15 : i32
    %255 = tpu.dynamic_rotate %254 by %c15_i32_95 dim 1 : vector<16x16xf32>, i32 -> vector<16x16xf32>
    %cst_96 = arith.constant 0.000000e+00 : f32
    %256 = vector.broadcast %cst_96 : f32 to vector<16x16xf32>
    %257 = arith.select %56, %255, %256 : vector<16x16xi1>, vector<16x16xf32>
    %c1_i32_97 = arith.constant 1 : i32
    %258 = tpu.dynamic_rotate %7 by %c1_i32_97 dim 0 : vector<16x16xf32>, i32 -> vector<16x16xf32>
    %c15_i32_98 = arith.constant 15 : i32
    %259 = tpu.dynamic_rotate %258 by %c15_i32_98 dim 1 : vector<16x16xf32>, i32 -> vector<16x16xf32>
    %cst_99 = arith.constant 0.000000e+00 : f32
    %260 = vector.broadcast %cst_99 : f32 to vector<16x16xf32>
    %261 = arith.select %56, %259, %260 : vector<16x16xi1>, vector<16x16xf32>
    %c2_100 = arith.constant 2 : index
    %262 = memref.load %arg1[%c2_100] : memref<144xf32, #tpu.memory_space<smem>>
    %263 = vector.broadcast %262 : f32 to vector<16x16xf32>
    %264 = arith.mulf %249, %263 : vector<16x16xf32>
    %265 = arith.addf %217, %264 : vector<16x16xf32>
    %c38 = arith.constant 38 : index
    %266 = memref.load %arg1[%c38] : memref<144xf32, #tpu.memory_space<smem>>
    %267 = vector.broadcast %266 : f32 to vector<16x16xf32>
    %268 = arith.mulf %257, %267 : vector<16x16xf32>
    %269 = arith.addf %221, %268 : vector<16x16xf32>
    %c11 = arith.constant 11 : index
    %270 = memref.load %arg1[%c11] : memref<144xf32, #tpu.memory_space<smem>>
    %271 = vector.broadcast %270 : f32 to vector<16x16xf32>
    %272 = arith.mulf %253, %271 : vector<16x16xf32>
    %273 = arith.addf %225, %272 : vector<16x16xf32>
    %c47 = arith.constant 47 : index
    %274 = memref.load %arg1[%c47] : memref<144xf32, #tpu.memory_space<smem>>
    %275 = vector.broadcast %274 : f32 to vector<16x16xf32>
    %276 = arith.mulf %261, %275 : vector<16x16xf32>
    %277 = arith.addf %229, %276 : vector<16x16xf32>
    %c20 = arith.constant 20 : index
    %278 = memref.load %arg1[%c20] : memref<144xf32, #tpu.memory_space<smem>>
    %279 = vector.broadcast %278 : f32 to vector<16x16xf32>
    %280 = arith.mulf %257, %279 : vector<16x16xf32>
    %281 = arith.addf %233, %280 : vector<16x16xf32>
    %c56 = arith.constant 56 : index
    %282 = memref.load %arg1[%c56] : memref<144xf32, #tpu.memory_space<smem>>
    %283 = vector.broadcast %282 : f32 to vector<16x16xf32>
    %284 = arith.mulf %249, %283 : vector<16x16xf32>
    %285 = arith.addf %237, %284 : vector<16x16xf32>
    %c29 = arith.constant 29 : index
    %286 = memref.load %arg1[%c29] : memref<144xf32, #tpu.memory_space<smem>>
    %287 = vector.broadcast %286 : f32 to vector<16x16xf32>
    %288 = arith.mulf %261, %287 : vector<16x16xf32>
    %289 = arith.addf %241, %288 : vector<16x16xf32>
    %c65 = arith.constant 65 : index
    %290 = memref.load %arg1[%c65] : memref<144xf32, #tpu.memory_space<smem>>
    %291 = vector.broadcast %290 : f32 to vector<16x16xf32>
    %292 = arith.mulf %253, %291 : vector<16x16xf32>
    %293 = arith.addf %245, %292 : vector<16x16xf32>
    %c1_i32_101 = arith.constant 1 : i32
    %294 = tpu.dynamic_rotate %1 by %c1_i32_101 dim 1 : vector<16x16xf32>, i32 -> vector<16x16xf32>
    %cst_102 = arith.constant 0.000000e+00 : f32
    %295 = vector.broadcast %cst_102 : f32 to vector<16x16xf32>
    %296 = arith.select %65, %294, %295 : vector<16x16xi1>, vector<16x16xf32>
    %c1_i32_103 = arith.constant 1 : i32
    %297 = tpu.dynamic_rotate %3 by %c1_i32_103 dim 1 : vector<16x16xf32>, i32 -> vector<16x16xf32>
    %cst_104 = arith.constant 0.000000e+00 : f32
    %298 = vector.broadcast %cst_104 : f32 to vector<16x16xf32>
    %299 = arith.select %65, %297, %298 : vector<16x16xi1>, vector<16x16xf32>
    %c1_i32_105 = arith.constant 1 : i32
    %300 = tpu.dynamic_rotate %5 by %c1_i32_105 dim 1 : vector<16x16xf32>, i32 -> vector<16x16xf32>
    %cst_106 = arith.constant 0.000000e+00 : f32
    %301 = vector.broadcast %cst_106 : f32 to vector<16x16xf32>
    %302 = arith.select %65, %300, %301 : vector<16x16xi1>, vector<16x16xf32>
    %c1_i32_107 = arith.constant 1 : i32
    %303 = tpu.dynamic_rotate %7 by %c1_i32_107 dim 1 : vector<16x16xf32>, i32 -> vector<16x16xf32>
    %cst_108 = arith.constant 0.000000e+00 : f32
    %304 = vector.broadcast %cst_108 : f32 to vector<16x16xf32>
    %305 = arith.select %65, %303, %304 : vector<16x16xi1>, vector<16x16xf32>
    %c3_109 = arith.constant 3 : index
    %306 = memref.load %arg1[%c3_109] : memref<144xf32, #tpu.memory_space<smem>>
    %307 = vector.broadcast %306 : f32 to vector<16x16xf32>
    %308 = arith.mulf %296, %307 : vector<16x16xf32>
    %309 = arith.addf %265, %308 : vector<16x16xf32>
    %c39 = arith.constant 39 : index
    %310 = memref.load %arg1[%c39] : memref<144xf32, #tpu.memory_space<smem>>
    %311 = vector.broadcast %310 : f32 to vector<16x16xf32>
    %312 = arith.mulf %302, %311 : vector<16x16xf32>
    %313 = arith.addf %269, %312 : vector<16x16xf32>
    %c12 = arith.constant 12 : index
    %314 = memref.load %arg1[%c12] : memref<144xf32, #tpu.memory_space<smem>>
    %315 = vector.broadcast %314 : f32 to vector<16x16xf32>
    %316 = arith.mulf %299, %315 : vector<16x16xf32>
    %317 = arith.addf %273, %316 : vector<16x16xf32>
    %c48 = arith.constant 48 : index
    %318 = memref.load %arg1[%c48] : memref<144xf32, #tpu.memory_space<smem>>
    %319 = vector.broadcast %318 : f32 to vector<16x16xf32>
    %320 = arith.mulf %305, %319 : vector<16x16xf32>
    %321 = arith.addf %277, %320 : vector<16x16xf32>
    %c21 = arith.constant 21 : index
    %322 = memref.load %arg1[%c21] : memref<144xf32, #tpu.memory_space<smem>>
    %323 = vector.broadcast %322 : f32 to vector<16x16xf32>
    %324 = arith.mulf %302, %323 : vector<16x16xf32>
    %325 = arith.addf %281, %324 : vector<16x16xf32>
    %c57 = arith.constant 57 : index
    %326 = memref.load %arg1[%c57] : memref<144xf32, #tpu.memory_space<smem>>
    %327 = vector.broadcast %326 : f32 to vector<16x16xf32>
    %328 = arith.mulf %296, %327 : vector<16x16xf32>
    %329 = arith.addf %285, %328 : vector<16x16xf32>
    %c30 = arith.constant 30 : index
    %330 = memref.load %arg1[%c30] : memref<144xf32, #tpu.memory_space<smem>>
    %331 = vector.broadcast %330 : f32 to vector<16x16xf32>
    %332 = arith.mulf %305, %331 : vector<16x16xf32>
    %333 = arith.addf %289, %332 : vector<16x16xf32>
    %c66 = arith.constant 66 : index
    %334 = memref.load %arg1[%c66] : memref<144xf32, #tpu.memory_space<smem>>
    %335 = vector.broadcast %334 : f32 to vector<16x16xf32>
    %336 = arith.mulf %299, %335 : vector<16x16xf32>
    %337 = arith.addf %293, %336 : vector<16x16xf32>
    %c4_110 = arith.constant 4 : index
    %338 = memref.load %arg1[%c4_110] : memref<144xf32, #tpu.memory_space<smem>>
    %339 = vector.broadcast %338 : f32 to vector<16x16xf32>
    %340 = arith.mulf %1, %339 : vector<16x16xf32>
    %341 = arith.addf %309, %340 : vector<16x16xf32>
    %c40 = arith.constant 40 : index
    %342 = memref.load %arg1[%c40] : memref<144xf32, #tpu.memory_space<smem>>
    %343 = vector.broadcast %342 : f32 to vector<16x16xf32>
    %344 = arith.mulf %5, %343 : vector<16x16xf32>
    %345 = arith.addf %313, %344 : vector<16x16xf32>
    %c13 = arith.constant 13 : index
    %346 = memref.load %arg1[%c13] : memref<144xf32, #tpu.memory_space<smem>>
    %347 = vector.broadcast %346 : f32 to vector<16x16xf32>
    %348 = arith.mulf %3, %347 : vector<16x16xf32>
    %349 = arith.addf %317, %348 : vector<16x16xf32>
    %c49 = arith.constant 49 : index
    %350 = memref.load %arg1[%c49] : memref<144xf32, #tpu.memory_space<smem>>
    %351 = vector.broadcast %350 : f32 to vector<16x16xf32>
    %352 = arith.mulf %7, %351 : vector<16x16xf32>
    %353 = arith.addf %321, %352 : vector<16x16xf32>
    %c22 = arith.constant 22 : index
    %354 = memref.load %arg1[%c22] : memref<144xf32, #tpu.memory_space<smem>>
    %355 = vector.broadcast %354 : f32 to vector<16x16xf32>
    %356 = arith.mulf %5, %355 : vector<16x16xf32>
    %357 = arith.addf %325, %356 : vector<16x16xf32>
    %c58 = arith.constant 58 : index
    %358 = memref.load %arg1[%c58] : memref<144xf32, #tpu.memory_space<smem>>
    %359 = vector.broadcast %358 : f32 to vector<16x16xf32>
    %360 = arith.mulf %1, %359 : vector<16x16xf32>
    %361 = arith.addf %329, %360 : vector<16x16xf32>
    %c31 = arith.constant 31 : index
    %362 = memref.load %arg1[%c31] : memref<144xf32, #tpu.memory_space<smem>>
    %363 = vector.broadcast %362 : f32 to vector<16x16xf32>
    %364 = arith.mulf %7, %363 : vector<16x16xf32>
    %365 = arith.addf %333, %364 : vector<16x16xf32>
    %c67 = arith.constant 67 : index
    %366 = memref.load %arg1[%c67] : memref<144xf32, #tpu.memory_space<smem>>
    %367 = vector.broadcast %366 : f32 to vector<16x16xf32>
    %368 = arith.mulf %3, %367 : vector<16x16xf32>
    %369 = arith.addf %337, %368 : vector<16x16xf32>
    %c15_i32_111 = arith.constant 15 : i32
    %370 = tpu.dynamic_rotate %1 by %c15_i32_111 dim 1 : vector<16x16xf32>, i32 -> vector<16x16xf32>
    %cst_112 = arith.constant 0.000000e+00 : f32
    %371 = vector.broadcast %cst_112 : f32 to vector<16x16xf32>
    %372 = arith.select %74, %370, %371 : vector<16x16xi1>, vector<16x16xf32>
    %c15_i32_113 = arith.constant 15 : i32
    %373 = tpu.dynamic_rotate %3 by %c15_i32_113 dim 1 : vector<16x16xf32>, i32 -> vector<16x16xf32>
    %cst_114 = arith.constant 0.000000e+00 : f32
    %374 = vector.broadcast %cst_114 : f32 to vector<16x16xf32>
    %375 = arith.select %74, %373, %374 : vector<16x16xi1>, vector<16x16xf32>
    %c15_i32_115 = arith.constant 15 : i32
    %376 = tpu.dynamic_rotate %5 by %c15_i32_115 dim 1 : vector<16x16xf32>, i32 -> vector<16x16xf32>
    %cst_116 = arith.constant 0.000000e+00 : f32
    %377 = vector.broadcast %cst_116 : f32 to vector<16x16xf32>
    %378 = arith.select %74, %376, %377 : vector<16x16xi1>, vector<16x16xf32>
    %c15_i32_117 = arith.constant 15 : i32
    %379 = tpu.dynamic_rotate %7 by %c15_i32_117 dim 1 : vector<16x16xf32>, i32 -> vector<16x16xf32>
    %cst_118 = arith.constant 0.000000e+00 : f32
    %380 = vector.broadcast %cst_118 : f32 to vector<16x16xf32>
    %381 = arith.select %74, %379, %380 : vector<16x16xi1>, vector<16x16xf32>
    %c5_119 = arith.constant 5 : index
    %382 = memref.load %arg1[%c5_119] : memref<144xf32, #tpu.memory_space<smem>>
    %383 = vector.broadcast %382 : f32 to vector<16x16xf32>
    %384 = arith.mulf %372, %383 : vector<16x16xf32>
    %385 = arith.addf %341, %384 : vector<16x16xf32>
    %c41 = arith.constant 41 : index
    %386 = memref.load %arg1[%c41] : memref<144xf32, #tpu.memory_space<smem>>
    %387 = vector.broadcast %386 : f32 to vector<16x16xf32>
    %388 = arith.mulf %378, %387 : vector<16x16xf32>
    %389 = arith.addf %345, %388 : vector<16x16xf32>
    %c14 = arith.constant 14 : index
    %390 = memref.load %arg1[%c14] : memref<144xf32, #tpu.memory_space<smem>>
    %391 = vector.broadcast %390 : f32 to vector<16x16xf32>
    %392 = arith.mulf %375, %391 : vector<16x16xf32>
    %393 = arith.addf %349, %392 : vector<16x16xf32>
    %c50 = arith.constant 50 : index
    %394 = memref.load %arg1[%c50] : memref<144xf32, #tpu.memory_space<smem>>
    %395 = vector.broadcast %394 : f32 to vector<16x16xf32>
    %396 = arith.mulf %381, %395 : vector<16x16xf32>
    %397 = arith.addf %353, %396 : vector<16x16xf32>
    %c23 = arith.constant 23 : index
    %398 = memref.load %arg1[%c23] : memref<144xf32, #tpu.memory_space<smem>>
    %399 = vector.broadcast %398 : f32 to vector<16x16xf32>
    %400 = arith.mulf %378, %399 : vector<16x16xf32>
    %401 = arith.addf %357, %400 : vector<16x16xf32>
    %c59 = arith.constant 59 : index
    %402 = memref.load %arg1[%c59] : memref<144xf32, #tpu.memory_space<smem>>
    %403 = vector.broadcast %402 : f32 to vector<16x16xf32>
    %404 = arith.mulf %372, %403 : vector<16x16xf32>
    %405 = arith.addf %361, %404 : vector<16x16xf32>
    %c32 = arith.constant 32 : index
    %406 = memref.load %arg1[%c32] : memref<144xf32, #tpu.memory_space<smem>>
    %407 = vector.broadcast %406 : f32 to vector<16x16xf32>
    %408 = arith.mulf %381, %407 : vector<16x16xf32>
    %409 = arith.addf %365, %408 : vector<16x16xf32>
    %c68 = arith.constant 68 : index
    %410 = memref.load %arg1[%c68] : memref<144xf32, #tpu.memory_space<smem>>
    %411 = vector.broadcast %410 : f32 to vector<16x16xf32>
    %412 = arith.mulf %375, %411 : vector<16x16xf32>
    %413 = arith.addf %369, %412 : vector<16x16xf32>
    %c15_i32_120 = arith.constant 15 : i32
    %414 = tpu.dynamic_rotate %1 by %c15_i32_120 dim 0 : vector<16x16xf32>, i32 -> vector<16x16xf32>
    %c1_i32_121 = arith.constant 1 : i32
    %415 = tpu.dynamic_rotate %414 by %c1_i32_121 dim 1 : vector<16x16xf32>, i32 -> vector<16x16xf32>
    %cst_122 = arith.constant 0.000000e+00 : f32
    %416 = vector.broadcast %cst_122 : f32 to vector<16x16xf32>
    %417 = arith.select %93, %415, %416 : vector<16x16xi1>, vector<16x16xf32>
    %c15_i32_123 = arith.constant 15 : i32
    %418 = tpu.dynamic_rotate %3 by %c15_i32_123 dim 0 : vector<16x16xf32>, i32 -> vector<16x16xf32>
    %c1_i32_124 = arith.constant 1 : i32
    %419 = tpu.dynamic_rotate %418 by %c1_i32_124 dim 1 : vector<16x16xf32>, i32 -> vector<16x16xf32>
    %cst_125 = arith.constant 0.000000e+00 : f32
    %420 = vector.broadcast %cst_125 : f32 to vector<16x16xf32>
    %421 = arith.select %93, %419, %420 : vector<16x16xi1>, vector<16x16xf32>
    %c15_i32_126 = arith.constant 15 : i32
    %422 = tpu.dynamic_rotate %5 by %c15_i32_126 dim 0 : vector<16x16xf32>, i32 -> vector<16x16xf32>
    %c1_i32_127 = arith.constant 1 : i32
    %423 = tpu.dynamic_rotate %422 by %c1_i32_127 dim 1 : vector<16x16xf32>, i32 -> vector<16x16xf32>
    %cst_128 = arith.constant 0.000000e+00 : f32
    %424 = vector.broadcast %cst_128 : f32 to vector<16x16xf32>
    %425 = arith.select %93, %423, %424 : vector<16x16xi1>, vector<16x16xf32>
    %c15_i32_129 = arith.constant 15 : i32
    %426 = tpu.dynamic_rotate %7 by %c15_i32_129 dim 0 : vector<16x16xf32>, i32 -> vector<16x16xf32>
    %c1_i32_130 = arith.constant 1 : i32
    %427 = tpu.dynamic_rotate %426 by %c1_i32_130 dim 1 : vector<16x16xf32>, i32 -> vector<16x16xf32>
    %cst_131 = arith.constant 0.000000e+00 : f32
    %428 = vector.broadcast %cst_131 : f32 to vector<16x16xf32>
    %429 = arith.select %93, %427, %428 : vector<16x16xi1>, vector<16x16xf32>
    %c6_132 = arith.constant 6 : index
    %430 = memref.load %arg1[%c6_132] : memref<144xf32, #tpu.memory_space<smem>>
    %431 = vector.broadcast %430 : f32 to vector<16x16xf32>
    %432 = arith.mulf %417, %431 : vector<16x16xf32>
    %433 = arith.addf %385, %432 : vector<16x16xf32>
    %c42 = arith.constant 42 : index
    %434 = memref.load %arg1[%c42] : memref<144xf32, #tpu.memory_space<smem>>
    %435 = vector.broadcast %434 : f32 to vector<16x16xf32>
    %436 = arith.mulf %425, %435 : vector<16x16xf32>
    %437 = arith.addf %389, %436 : vector<16x16xf32>
    %c15 = arith.constant 15 : index
    %438 = memref.load %arg1[%c15] : memref<144xf32, #tpu.memory_space<smem>>
    %439 = vector.broadcast %438 : f32 to vector<16x16xf32>
    %440 = arith.mulf %421, %439 : vector<16x16xf32>
    %441 = arith.addf %393, %440 : vector<16x16xf32>
    %c51 = arith.constant 51 : index
    %442 = memref.load %arg1[%c51] : memref<144xf32, #tpu.memory_space<smem>>
    %443 = vector.broadcast %442 : f32 to vector<16x16xf32>
    %444 = arith.mulf %429, %443 : vector<16x16xf32>
    %445 = arith.addf %397, %444 : vector<16x16xf32>
    %c24 = arith.constant 24 : index
    %446 = memref.load %arg1[%c24] : memref<144xf32, #tpu.memory_space<smem>>
    %447 = vector.broadcast %446 : f32 to vector<16x16xf32>
    %448 = arith.mulf %425, %447 : vector<16x16xf32>
    %449 = arith.addf %401, %448 : vector<16x16xf32>
    %c60 = arith.constant 60 : index
    %450 = memref.load %arg1[%c60] : memref<144xf32, #tpu.memory_space<smem>>
    %451 = vector.broadcast %450 : f32 to vector<16x16xf32>
    %452 = arith.mulf %417, %451 : vector<16x16xf32>
    %453 = arith.addf %405, %452 : vector<16x16xf32>
    %c33 = arith.constant 33 : index
    %454 = memref.load %arg1[%c33] : memref<144xf32, #tpu.memory_space<smem>>
    %455 = vector.broadcast %454 : f32 to vector<16x16xf32>
    %456 = arith.mulf %429, %455 : vector<16x16xf32>
    %457 = arith.addf %409, %456 : vector<16x16xf32>
    %c69 = arith.constant 69 : index
    %458 = memref.load %arg1[%c69] : memref<144xf32, #tpu.memory_space<smem>>
    %459 = vector.broadcast %458 : f32 to vector<16x16xf32>
    %460 = arith.mulf %421, %459 : vector<16x16xf32>
    %461 = arith.addf %413, %460 : vector<16x16xf32>
    %c15_i32_133 = arith.constant 15 : i32
    %462 = tpu.dynamic_rotate %1 by %c15_i32_133 dim 0 : vector<16x16xf32>, i32 -> vector<16x16xf32>
    %cst_134 = arith.constant 0.000000e+00 : f32
    %463 = vector.broadcast %cst_134 : f32 to vector<16x16xf32>
    %464 = arith.select %102, %462, %463 : vector<16x16xi1>, vector<16x16xf32>
    %c15_i32_135 = arith.constant 15 : i32
    %465 = tpu.dynamic_rotate %3 by %c15_i32_135 dim 0 : vector<16x16xf32>, i32 -> vector<16x16xf32>
    %cst_136 = arith.constant 0.000000e+00 : f32
    %466 = vector.broadcast %cst_136 : f32 to vector<16x16xf32>
    %467 = arith.select %102, %465, %466 : vector<16x16xi1>, vector<16x16xf32>
    %c15_i32_137 = arith.constant 15 : i32
    %468 = tpu.dynamic_rotate %5 by %c15_i32_137 dim 0 : vector<16x16xf32>, i32 -> vector<16x16xf32>
    %cst_138 = arith.constant 0.000000e+00 : f32
    %469 = vector.broadcast %cst_138 : f32 to vector<16x16xf32>
    %470 = arith.select %102, %468, %469 : vector<16x16xi1>, vector<16x16xf32>
    %c15_i32_139 = arith.constant 15 : i32
    %471 = tpu.dynamic_rotate %7 by %c15_i32_139 dim 0 : vector<16x16xf32>, i32 -> vector<16x16xf32>
    %cst_140 = arith.constant 0.000000e+00 : f32
    %472 = vector.broadcast %cst_140 : f32 to vector<16x16xf32>
    %473 = arith.select %102, %471, %472 : vector<16x16xi1>, vector<16x16xf32>
    %c7_141 = arith.constant 7 : index
    %474 = memref.load %arg1[%c7_141] : memref<144xf32, #tpu.memory_space<smem>>
    %475 = vector.broadcast %474 : f32 to vector<16x16xf32>
    %476 = arith.mulf %464, %475 : vector<16x16xf32>
    %477 = arith.addf %433, %476 : vector<16x16xf32>
    %c43 = arith.constant 43 : index
    %478 = memref.load %arg1[%c43] : memref<144xf32, #tpu.memory_space<smem>>
    %479 = vector.broadcast %478 : f32 to vector<16x16xf32>
    %480 = arith.mulf %470, %479 : vector<16x16xf32>
    %481 = arith.addf %437, %480 : vector<16x16xf32>
    %c16 = arith.constant 16 : index
    %482 = memref.load %arg1[%c16] : memref<144xf32, #tpu.memory_space<smem>>
    %483 = vector.broadcast %482 : f32 to vector<16x16xf32>
    %484 = arith.mulf %467, %483 : vector<16x16xf32>
    %485 = arith.addf %441, %484 : vector<16x16xf32>
    %c52 = arith.constant 52 : index
    %486 = memref.load %arg1[%c52] : memref<144xf32, #tpu.memory_space<smem>>
    %487 = vector.broadcast %486 : f32 to vector<16x16xf32>
    %488 = arith.mulf %473, %487 : vector<16x16xf32>
    %489 = arith.addf %445, %488 : vector<16x16xf32>
    %c25 = arith.constant 25 : index
    %490 = memref.load %arg1[%c25] : memref<144xf32, #tpu.memory_space<smem>>
    %491 = vector.broadcast %490 : f32 to vector<16x16xf32>
    %492 = arith.mulf %470, %491 : vector<16x16xf32>
    %493 = arith.addf %449, %492 : vector<16x16xf32>
    %c61 = arith.constant 61 : index
    %494 = memref.load %arg1[%c61] : memref<144xf32, #tpu.memory_space<smem>>
    %495 = vector.broadcast %494 : f32 to vector<16x16xf32>
    %496 = arith.mulf %464, %495 : vector<16x16xf32>
    %497 = arith.addf %453, %496 : vector<16x16xf32>
    %c34 = arith.constant 34 : index
    %498 = memref.load %arg1[%c34] : memref<144xf32, #tpu.memory_space<smem>>
    %499 = vector.broadcast %498 : f32 to vector<16x16xf32>
    %500 = arith.mulf %473, %499 : vector<16x16xf32>
    %501 = arith.addf %457, %500 : vector<16x16xf32>
    %c70 = arith.constant 70 : index
    %502 = memref.load %arg1[%c70] : memref<144xf32, #tpu.memory_space<smem>>
    %503 = vector.broadcast %502 : f32 to vector<16x16xf32>
    %504 = arith.mulf %467, %503 : vector<16x16xf32>
    %505 = arith.addf %461, %504 : vector<16x16xf32>
    %c15_i32_142 = arith.constant 15 : i32
    %506 = tpu.dynamic_rotate %1 by %c15_i32_142 dim 0 : vector<16x16xf32>, i32 -> vector<16x16xf32>
    %c15_i32_143 = arith.constant 15 : i32
    %507 = tpu.dynamic_rotate %506 by %c15_i32_143 dim 1 : vector<16x16xf32>, i32 -> vector<16x16xf32>
    %cst_144 = arith.constant 0.000000e+00 : f32
    %508 = vector.broadcast %cst_144 : f32 to vector<16x16xf32>
    %509 = arith.select %121, %507, %508 : vector<16x16xi1>, vector<16x16xf32>
    %c15_i32_145 = arith.constant 15 : i32
    %510 = tpu.dynamic_rotate %3 by %c15_i32_145 dim 0 : vector<16x16xf32>, i32 -> vector<16x16xf32>
    %c15_i32_146 = arith.constant 15 : i32
    %511 = tpu.dynamic_rotate %510 by %c15_i32_146 dim 1 : vector<16x16xf32>, i32 -> vector<16x16xf32>
    %cst_147 = arith.constant 0.000000e+00 : f32
    %512 = vector.broadcast %cst_147 : f32 to vector<16x16xf32>
    %513 = arith.select %121, %511, %512 : vector<16x16xi1>, vector<16x16xf32>
    %c15_i32_148 = arith.constant 15 : i32
    %514 = tpu.dynamic_rotate %5 by %c15_i32_148 dim 0 : vector<16x16xf32>, i32 -> vector<16x16xf32>
    %c15_i32_149 = arith.constant 15 : i32
    %515 = tpu.dynamic_rotate %514 by %c15_i32_149 dim 1 : vector<16x16xf32>, i32 -> vector<16x16xf32>
    %cst_150 = arith.constant 0.000000e+00 : f32
    %516 = vector.broadcast %cst_150 : f32 to vector<16x16xf32>
    %517 = arith.select %121, %515, %516 : vector<16x16xi1>, vector<16x16xf32>
    %c15_i32_151 = arith.constant 15 : i32
    %518 = tpu.dynamic_rotate %7 by %c15_i32_151 dim 0 : vector<16x16xf32>, i32 -> vector<16x16xf32>
    %c15_i32_152 = arith.constant 15 : i32
    %519 = tpu.dynamic_rotate %518 by %c15_i32_152 dim 1 : vector<16x16xf32>, i32 -> vector<16x16xf32>
    %cst_153 = arith.constant 0.000000e+00 : f32
    %520 = vector.broadcast %cst_153 : f32 to vector<16x16xf32>
    %521 = arith.select %121, %519, %520 : vector<16x16xi1>, vector<16x16xf32>
    %c8 = arith.constant 8 : index
    %522 = memref.load %arg1[%c8] : memref<144xf32, #tpu.memory_space<smem>>
    %523 = vector.broadcast %522 : f32 to vector<16x16xf32>
    %524 = arith.mulf %509, %523 : vector<16x16xf32>
    %525 = arith.addf %477, %524 : vector<16x16xf32>
    %c44 = arith.constant 44 : index
    %526 = memref.load %arg1[%c44] : memref<144xf32, #tpu.memory_space<smem>>
    %527 = vector.broadcast %526 : f32 to vector<16x16xf32>
    %528 = arith.mulf %517, %527 : vector<16x16xf32>
    %529 = arith.addf %481, %528 : vector<16x16xf32>
    %c17 = arith.constant 17 : index
    %530 = memref.load %arg1[%c17] : memref<144xf32, #tpu.memory_space<smem>>
    %531 = vector.broadcast %530 : f32 to vector<16x16xf32>
    %532 = arith.mulf %513, %531 : vector<16x16xf32>
    %533 = arith.addf %485, %532 : vector<16x16xf32>
    %c53 = arith.constant 53 : index
    %534 = memref.load %arg1[%c53] : memref<144xf32, #tpu.memory_space<smem>>
    %535 = vector.broadcast %534 : f32 to vector<16x16xf32>
    %536 = arith.mulf %521, %535 : vector<16x16xf32>
    %537 = arith.addf %489, %536 : vector<16x16xf32>
    %c26 = arith.constant 26 : index
    %538 = memref.load %arg1[%c26] : memref<144xf32, #tpu.memory_space<smem>>
    %539 = vector.broadcast %538 : f32 to vector<16x16xf32>
    %540 = arith.mulf %517, %539 : vector<16x16xf32>
    %541 = arith.addf %493, %540 : vector<16x16xf32>
    %c62 = arith.constant 62 : index
    %542 = memref.load %arg1[%c62] : memref<144xf32, #tpu.memory_space<smem>>
    %543 = vector.broadcast %542 : f32 to vector<16x16xf32>
    %544 = arith.mulf %509, %543 : vector<16x16xf32>
    %545 = arith.addf %497, %544 : vector<16x16xf32>
    %c35 = arith.constant 35 : index
    %546 = memref.load %arg1[%c35] : memref<144xf32, #tpu.memory_space<smem>>
    %547 = vector.broadcast %546 : f32 to vector<16x16xf32>
    %548 = arith.mulf %521, %547 : vector<16x16xf32>
    %549 = arith.addf %501, %548 : vector<16x16xf32>
    %c71 = arith.constant 71 : index
    %550 = memref.load %arg1[%c71] : memref<144xf32, #tpu.memory_space<smem>>
    %551 = vector.broadcast %550 : f32 to vector<16x16xf32>
    %552 = arith.mulf %513, %551 : vector<16x16xf32>
    %553 = arith.addf %505, %552 : vector<16x16xf32>
    %cst_154 = arith.constant 0.000000e+00 : f32
    %554 = vector.broadcast %cst_154 : f32 to vector<16x16xf32>
    %555 = arith.maximumf %525, %554 : vector<16x16xf32>
    %cst_155 = arith.constant 0.000000e+00 : f32
    %556 = vector.broadcast %cst_155 : f32 to vector<16x16xf32>
    %557 = arith.maximumf %529, %556 : vector<16x16xf32>
    %558 = arith.addf %555, %557 : vector<16x16xf32>
    %559 = arith.addf %558, %1 : vector<16x16xf32>
    %cst_156 = arith.constant 0.000000e+00 : f32
    %560 = vector.broadcast %cst_156 : f32 to vector<16x16xf32>
    %561 = arith.maximumf %533, %560 : vector<16x16xf32>
    %cst_157 = arith.constant 0.000000e+00 : f32
    %562 = vector.broadcast %cst_157 : f32 to vector<16x16xf32>
    %563 = arith.maximumf %537, %562 : vector<16x16xf32>
    %564 = arith.addf %561, %563 : vector<16x16xf32>
    %565 = arith.addf %564, %3 : vector<16x16xf32>
    %cst_158 = arith.constant 0.000000e+00 : f32
    %566 = vector.broadcast %cst_158 : f32 to vector<16x16xf32>
    %567 = arith.maximumf %541, %566 : vector<16x16xf32>
    %cst_159 = arith.constant 0.000000e+00 : f32
    %568 = vector.broadcast %cst_159 : f32 to vector<16x16xf32>
    %569 = arith.maximumf %545, %568 : vector<16x16xf32>
    %570 = arith.addf %567, %569 : vector<16x16xf32>
    %571 = arith.addf %570, %5 : vector<16x16xf32>
    %cst_160 = arith.constant 0.000000e+00 : f32
    %572 = vector.broadcast %cst_160 : f32 to vector<16x16xf32>
    %573 = arith.maximumf %549, %572 : vector<16x16xf32>
    %cst_161 = arith.constant 0.000000e+00 : f32
    %574 = vector.broadcast %cst_161 : f32 to vector<16x16xf32>
    %575 = arith.maximumf %553, %574 : vector<16x16xf32>
    %576 = arith.addf %573, %575 : vector<16x16xf32>
    %577 = arith.addf %576, %7 : vector<16x16xf32>
    %cst_162 = arith.constant 0.000000e+00 : f32
    %578 = vector.broadcast %cst_162 : f32 to vector<16x16xf32>
    %c8_163 = arith.constant 8 : index
    %579 = memref.load %arg2[%c8_163] : memref<16xf32, #tpu.memory_space<smem>>
    %580 = vector.broadcast %579 : f32 to vector<16x16xf32>
    %581 = arith.addf %578, %580 : vector<16x16xf32>
    %cst_164 = arith.constant 0.000000e+00 : f32
    %582 = vector.broadcast %cst_164 : f32 to vector<16x16xf32>
    %c9_165 = arith.constant 9 : index
    %583 = memref.load %arg2[%c9_165] : memref<16xf32, #tpu.memory_space<smem>>
    %584 = vector.broadcast %583 : f32 to vector<16x16xf32>
    %585 = arith.addf %582, %584 : vector<16x16xf32>
    %cst_166 = arith.constant 0.000000e+00 : f32
    %586 = vector.broadcast %cst_166 : f32 to vector<16x16xf32>
    %c10_167 = arith.constant 10 : index
    %587 = memref.load %arg2[%c10_167] : memref<16xf32, #tpu.memory_space<smem>>
    %588 = vector.broadcast %587 : f32 to vector<16x16xf32>
    %589 = arith.addf %586, %588 : vector<16x16xf32>
    %cst_168 = arith.constant 0.000000e+00 : f32
    %590 = vector.broadcast %cst_168 : f32 to vector<16x16xf32>
    %c11_169 = arith.constant 11 : index
    %591 = memref.load %arg2[%c11_169] : memref<16xf32, #tpu.memory_space<smem>>
    %592 = vector.broadcast %591 : f32 to vector<16x16xf32>
    %593 = arith.addf %590, %592 : vector<16x16xf32>
    %cst_170 = arith.constant 0.000000e+00 : f32
    %594 = vector.broadcast %cst_170 : f32 to vector<16x16xf32>
    %c12_171 = arith.constant 12 : index
    %595 = memref.load %arg2[%c12_171] : memref<16xf32, #tpu.memory_space<smem>>
    %596 = vector.broadcast %595 : f32 to vector<16x16xf32>
    %597 = arith.addf %594, %596 : vector<16x16xf32>
    %cst_172 = arith.constant 0.000000e+00 : f32
    %598 = vector.broadcast %cst_172 : f32 to vector<16x16xf32>
    %c13_173 = arith.constant 13 : index
    %599 = memref.load %arg2[%c13_173] : memref<16xf32, #tpu.memory_space<smem>>
    %600 = vector.broadcast %599 : f32 to vector<16x16xf32>
    %601 = arith.addf %598, %600 : vector<16x16xf32>
    %cst_174 = arith.constant 0.000000e+00 : f32
    %602 = vector.broadcast %cst_174 : f32 to vector<16x16xf32>
    %c14_175 = arith.constant 14 : index
    %603 = memref.load %arg2[%c14_175] : memref<16xf32, #tpu.memory_space<smem>>
    %604 = vector.broadcast %603 : f32 to vector<16x16xf32>
    %605 = arith.addf %602, %604 : vector<16x16xf32>
    %cst_176 = arith.constant 0.000000e+00 : f32
    %606 = vector.broadcast %cst_176 : f32 to vector<16x16xf32>
    %c15_177 = arith.constant 15 : index
    %607 = memref.load %arg2[%c15_177] : memref<16xf32, #tpu.memory_space<smem>>
    %608 = vector.broadcast %607 : f32 to vector<16x16xf32>
    %609 = arith.addf %606, %608 : vector<16x16xf32>
    %c1_i32_178 = arith.constant 1 : i32
    %610 = tpu.dynamic_rotate %559 by %c1_i32_178 dim 0 : vector<16x16xf32>, i32 -> vector<16x16xf32>
    %c1_i32_179 = arith.constant 1 : i32
    %611 = tpu.dynamic_rotate %610 by %c1_i32_179 dim 1 : vector<16x16xf32>, i32 -> vector<16x16xf32>
    %cst_180 = arith.constant 0.000000e+00 : f32
    %612 = vector.broadcast %cst_180 : f32 to vector<16x16xf32>
    %613 = arith.select %28, %611, %612 : vector<16x16xi1>, vector<16x16xf32>
    %c1_i32_181 = arith.constant 1 : i32
    %614 = tpu.dynamic_rotate %565 by %c1_i32_181 dim 0 : vector<16x16xf32>, i32 -> vector<16x16xf32>
    %c1_i32_182 = arith.constant 1 : i32
    %615 = tpu.dynamic_rotate %614 by %c1_i32_182 dim 1 : vector<16x16xf32>, i32 -> vector<16x16xf32>
    %cst_183 = arith.constant 0.000000e+00 : f32
    %616 = vector.broadcast %cst_183 : f32 to vector<16x16xf32>
    %617 = arith.select %28, %615, %616 : vector<16x16xi1>, vector<16x16xf32>
    %c1_i32_184 = arith.constant 1 : i32
    %618 = tpu.dynamic_rotate %571 by %c1_i32_184 dim 0 : vector<16x16xf32>, i32 -> vector<16x16xf32>
    %c1_i32_185 = arith.constant 1 : i32
    %619 = tpu.dynamic_rotate %618 by %c1_i32_185 dim 1 : vector<16x16xf32>, i32 -> vector<16x16xf32>
    %cst_186 = arith.constant 0.000000e+00 : f32
    %620 = vector.broadcast %cst_186 : f32 to vector<16x16xf32>
    %621 = arith.select %28, %619, %620 : vector<16x16xi1>, vector<16x16xf32>
    %c1_i32_187 = arith.constant 1 : i32
    %622 = tpu.dynamic_rotate %577 by %c1_i32_187 dim 0 : vector<16x16xf32>, i32 -> vector<16x16xf32>
    %c1_i32_188 = arith.constant 1 : i32
    %623 = tpu.dynamic_rotate %622 by %c1_i32_188 dim 1 : vector<16x16xf32>, i32 -> vector<16x16xf32>
    %cst_189 = arith.constant 0.000000e+00 : f32
    %624 = vector.broadcast %cst_189 : f32 to vector<16x16xf32>
    %625 = arith.select %28, %623, %624 : vector<16x16xi1>, vector<16x16xf32>
    %c72 = arith.constant 72 : index
    %626 = memref.load %arg1[%c72] : memref<144xf32, #tpu.memory_space<smem>>
    %627 = vector.broadcast %626 : f32 to vector<16x16xf32>
    %628 = arith.mulf %613, %627 : vector<16x16xf32>
    %629 = arith.addf %581, %628 : vector<16x16xf32>
    %c108 = arith.constant 108 : index
    %630 = memref.load %arg1[%c108] : memref<144xf32, #tpu.memory_space<smem>>
    %631 = vector.broadcast %630 : f32 to vector<16x16xf32>
    %632 = arith.mulf %617, %631 : vector<16x16xf32>
    %633 = arith.addf %597, %632 : vector<16x16xf32>
    %c81 = arith.constant 81 : index
    %634 = memref.load %arg1[%c81] : memref<144xf32, #tpu.memory_space<smem>>
    %635 = vector.broadcast %634 : f32 to vector<16x16xf32>
    %636 = arith.mulf %617, %635 : vector<16x16xf32>
    %637 = arith.addf %585, %636 : vector<16x16xf32>
    %c117 = arith.constant 117 : index
    %638 = memref.load %arg1[%c117] : memref<144xf32, #tpu.memory_space<smem>>
    %639 = vector.broadcast %638 : f32 to vector<16x16xf32>
    %640 = arith.mulf %613, %639 : vector<16x16xf32>
    %641 = arith.addf %601, %640 : vector<16x16xf32>
    %c90 = arith.constant 90 : index
    %642 = memref.load %arg1[%c90] : memref<144xf32, #tpu.memory_space<smem>>
    %643 = vector.broadcast %642 : f32 to vector<16x16xf32>
    %644 = arith.mulf %621, %643 : vector<16x16xf32>
    %645 = arith.addf %589, %644 : vector<16x16xf32>
    %c126 = arith.constant 126 : index
    %646 = memref.load %arg1[%c126] : memref<144xf32, #tpu.memory_space<smem>>
    %647 = vector.broadcast %646 : f32 to vector<16x16xf32>
    %648 = arith.mulf %625, %647 : vector<16x16xf32>
    %649 = arith.addf %605, %648 : vector<16x16xf32>
    %c99 = arith.constant 99 : index
    %650 = memref.load %arg1[%c99] : memref<144xf32, #tpu.memory_space<smem>>
    %651 = vector.broadcast %650 : f32 to vector<16x16xf32>
    %652 = arith.mulf %625, %651 : vector<16x16xf32>
    %653 = arith.addf %593, %652 : vector<16x16xf32>
    %c135 = arith.constant 135 : index
    %654 = memref.load %arg1[%c135] : memref<144xf32, #tpu.memory_space<smem>>
    %655 = vector.broadcast %654 : f32 to vector<16x16xf32>
    %656 = arith.mulf %621, %655 : vector<16x16xf32>
    %657 = arith.addf %609, %656 : vector<16x16xf32>
    %c1_i32_190 = arith.constant 1 : i32
    %658 = tpu.dynamic_rotate %559 by %c1_i32_190 dim 0 : vector<16x16xf32>, i32 -> vector<16x16xf32>
    %cst_191 = arith.constant 0.000000e+00 : f32
    %659 = vector.broadcast %cst_191 : f32 to vector<16x16xf32>
    %660 = arith.select %37, %658, %659 : vector<16x16xi1>, vector<16x16xf32>
    %c1_i32_192 = arith.constant 1 : i32
    %661 = tpu.dynamic_rotate %565 by %c1_i32_192 dim 0 : vector<16x16xf32>, i32 -> vector<16x16xf32>
    %cst_193 = arith.constant 0.000000e+00 : f32
    %662 = vector.broadcast %cst_193 : f32 to vector<16x16xf32>
    %663 = arith.select %37, %661, %662 : vector<16x16xi1>, vector<16x16xf32>
    %c1_i32_194 = arith.constant 1 : i32
    %664 = tpu.dynamic_rotate %571 by %c1_i32_194 dim 0 : vector<16x16xf32>, i32 -> vector<16x16xf32>
    %cst_195 = arith.constant 0.000000e+00 : f32
    %665 = vector.broadcast %cst_195 : f32 to vector<16x16xf32>
    %666 = arith.select %37, %664, %665 : vector<16x16xi1>, vector<16x16xf32>
    %c1_i32_196 = arith.constant 1 : i32
    %667 = tpu.dynamic_rotate %577 by %c1_i32_196 dim 0 : vector<16x16xf32>, i32 -> vector<16x16xf32>
    %cst_197 = arith.constant 0.000000e+00 : f32
    %668 = vector.broadcast %cst_197 : f32 to vector<16x16xf32>
    %669 = arith.select %37, %667, %668 : vector<16x16xi1>, vector<16x16xf32>
    %c73 = arith.constant 73 : index
    %670 = memref.load %arg1[%c73] : memref<144xf32, #tpu.memory_space<smem>>
    %671 = vector.broadcast %670 : f32 to vector<16x16xf32>
    %672 = arith.mulf %660, %671 : vector<16x16xf32>
    %673 = arith.addf %629, %672 : vector<16x16xf32>
    %c109 = arith.constant 109 : index
    %674 = memref.load %arg1[%c109] : memref<144xf32, #tpu.memory_space<smem>>
    %675 = vector.broadcast %674 : f32 to vector<16x16xf32>
    %676 = arith.mulf %663, %675 : vector<16x16xf32>
    %677 = arith.addf %633, %676 : vector<16x16xf32>
    %c82 = arith.constant 82 : index
    %678 = memref.load %arg1[%c82] : memref<144xf32, #tpu.memory_space<smem>>
    %679 = vector.broadcast %678 : f32 to vector<16x16xf32>
    %680 = arith.mulf %663, %679 : vector<16x16xf32>
    %681 = arith.addf %637, %680 : vector<16x16xf32>
    %c118 = arith.constant 118 : index
    %682 = memref.load %arg1[%c118] : memref<144xf32, #tpu.memory_space<smem>>
    %683 = vector.broadcast %682 : f32 to vector<16x16xf32>
    %684 = arith.mulf %660, %683 : vector<16x16xf32>
    %685 = arith.addf %641, %684 : vector<16x16xf32>
    %c91 = arith.constant 91 : index
    %686 = memref.load %arg1[%c91] : memref<144xf32, #tpu.memory_space<smem>>
    %687 = vector.broadcast %686 : f32 to vector<16x16xf32>
    %688 = arith.mulf %666, %687 : vector<16x16xf32>
    %689 = arith.addf %645, %688 : vector<16x16xf32>
    %c127 = arith.constant 127 : index
    %690 = memref.load %arg1[%c127] : memref<144xf32, #tpu.memory_space<smem>>
    %691 = vector.broadcast %690 : f32 to vector<16x16xf32>
    %692 = arith.mulf %669, %691 : vector<16x16xf32>
    %693 = arith.addf %649, %692 : vector<16x16xf32>
    %c100 = arith.constant 100 : index
    %694 = memref.load %arg1[%c100] : memref<144xf32, #tpu.memory_space<smem>>
    %695 = vector.broadcast %694 : f32 to vector<16x16xf32>
    %696 = arith.mulf %669, %695 : vector<16x16xf32>
    %697 = arith.addf %653, %696 : vector<16x16xf32>
    %c136 = arith.constant 136 : index
    %698 = memref.load %arg1[%c136] : memref<144xf32, #tpu.memory_space<smem>>
    %699 = vector.broadcast %698 : f32 to vector<16x16xf32>
    %700 = arith.mulf %666, %699 : vector<16x16xf32>
    %701 = arith.addf %657, %700 : vector<16x16xf32>
    %c1_i32_198 = arith.constant 1 : i32
    %702 = tpu.dynamic_rotate %559 by %c1_i32_198 dim 0 : vector<16x16xf32>, i32 -> vector<16x16xf32>
    %c15_i32_199 = arith.constant 15 : i32
    %703 = tpu.dynamic_rotate %702 by %c15_i32_199 dim 1 : vector<16x16xf32>, i32 -> vector<16x16xf32>
    %cst_200 = arith.constant 0.000000e+00 : f32
    %704 = vector.broadcast %cst_200 : f32 to vector<16x16xf32>
    %705 = arith.select %56, %703, %704 : vector<16x16xi1>, vector<16x16xf32>
    %c1_i32_201 = arith.constant 1 : i32
    %706 = tpu.dynamic_rotate %565 by %c1_i32_201 dim 0 : vector<16x16xf32>, i32 -> vector<16x16xf32>
    %c15_i32_202 = arith.constant 15 : i32
    %707 = tpu.dynamic_rotate %706 by %c15_i32_202 dim 1 : vector<16x16xf32>, i32 -> vector<16x16xf32>
    %cst_203 = arith.constant 0.000000e+00 : f32
    %708 = vector.broadcast %cst_203 : f32 to vector<16x16xf32>
    %709 = arith.select %56, %707, %708 : vector<16x16xi1>, vector<16x16xf32>
    %c1_i32_204 = arith.constant 1 : i32
    %710 = tpu.dynamic_rotate %571 by %c1_i32_204 dim 0 : vector<16x16xf32>, i32 -> vector<16x16xf32>
    %c15_i32_205 = arith.constant 15 : i32
    %711 = tpu.dynamic_rotate %710 by %c15_i32_205 dim 1 : vector<16x16xf32>, i32 -> vector<16x16xf32>
    %cst_206 = arith.constant 0.000000e+00 : f32
    %712 = vector.broadcast %cst_206 : f32 to vector<16x16xf32>
    %713 = arith.select %56, %711, %712 : vector<16x16xi1>, vector<16x16xf32>
    %c1_i32_207 = arith.constant 1 : i32
    %714 = tpu.dynamic_rotate %577 by %c1_i32_207 dim 0 : vector<16x16xf32>, i32 -> vector<16x16xf32>
    %c15_i32_208 = arith.constant 15 : i32
    %715 = tpu.dynamic_rotate %714 by %c15_i32_208 dim 1 : vector<16x16xf32>, i32 -> vector<16x16xf32>
    %cst_209 = arith.constant 0.000000e+00 : f32
    %716 = vector.broadcast %cst_209 : f32 to vector<16x16xf32>
    %717 = arith.select %56, %715, %716 : vector<16x16xi1>, vector<16x16xf32>
    %c74 = arith.constant 74 : index
    %718 = memref.load %arg1[%c74] : memref<144xf32, #tpu.memory_space<smem>>
    %719 = vector.broadcast %718 : f32 to vector<16x16xf32>
    %720 = arith.mulf %705, %719 : vector<16x16xf32>
    %721 = arith.addf %673, %720 : vector<16x16xf32>
    %c110 = arith.constant 110 : index
    %722 = memref.load %arg1[%c110] : memref<144xf32, #tpu.memory_space<smem>>
    %723 = vector.broadcast %722 : f32 to vector<16x16xf32>
    %724 = arith.mulf %709, %723 : vector<16x16xf32>
    %725 = arith.addf %677, %724 : vector<16x16xf32>
    %c83 = arith.constant 83 : index
    %726 = memref.load %arg1[%c83] : memref<144xf32, #tpu.memory_space<smem>>
    %727 = vector.broadcast %726 : f32 to vector<16x16xf32>
    %728 = arith.mulf %709, %727 : vector<16x16xf32>
    %729 = arith.addf %681, %728 : vector<16x16xf32>
    %c119 = arith.constant 119 : index
    %730 = memref.load %arg1[%c119] : memref<144xf32, #tpu.memory_space<smem>>
    %731 = vector.broadcast %730 : f32 to vector<16x16xf32>
    %732 = arith.mulf %705, %731 : vector<16x16xf32>
    %733 = arith.addf %685, %732 : vector<16x16xf32>
    %c92 = arith.constant 92 : index
    %734 = memref.load %arg1[%c92] : memref<144xf32, #tpu.memory_space<smem>>
    %735 = vector.broadcast %734 : f32 to vector<16x16xf32>
    %736 = arith.mulf %713, %735 : vector<16x16xf32>
    %737 = arith.addf %689, %736 : vector<16x16xf32>
    %c128 = arith.constant 128 : index
    %738 = memref.load %arg1[%c128] : memref<144xf32, #tpu.memory_space<smem>>
    %739 = vector.broadcast %738 : f32 to vector<16x16xf32>
    %740 = arith.mulf %717, %739 : vector<16x16xf32>
    %741 = arith.addf %693, %740 : vector<16x16xf32>
    %c101 = arith.constant 101 : index
    %742 = memref.load %arg1[%c101] : memref<144xf32, #tpu.memory_space<smem>>
    %743 = vector.broadcast %742 : f32 to vector<16x16xf32>
    %744 = arith.mulf %717, %743 : vector<16x16xf32>
    %745 = arith.addf %697, %744 : vector<16x16xf32>
    %c137 = arith.constant 137 : index
    %746 = memref.load %arg1[%c137] : memref<144xf32, #tpu.memory_space<smem>>
    %747 = vector.broadcast %746 : f32 to vector<16x16xf32>
    %748 = arith.mulf %713, %747 : vector<16x16xf32>
    %749 = arith.addf %701, %748 : vector<16x16xf32>
    %c1_i32_210 = arith.constant 1 : i32
    %750 = tpu.dynamic_rotate %559 by %c1_i32_210 dim 1 : vector<16x16xf32>, i32 -> vector<16x16xf32>
    %cst_211 = arith.constant 0.000000e+00 : f32
    %751 = vector.broadcast %cst_211 : f32 to vector<16x16xf32>
    %752 = arith.select %65, %750, %751 : vector<16x16xi1>, vector<16x16xf32>
    %c1_i32_212 = arith.constant 1 : i32
    %753 = tpu.dynamic_rotate %565 by %c1_i32_212 dim 1 : vector<16x16xf32>, i32 -> vector<16x16xf32>
    %cst_213 = arith.constant 0.000000e+00 : f32
    %754 = vector.broadcast %cst_213 : f32 to vector<16x16xf32>
    %755 = arith.select %65, %753, %754 : vector<16x16xi1>, vector<16x16xf32>
    %c1_i32_214 = arith.constant 1 : i32
    %756 = tpu.dynamic_rotate %571 by %c1_i32_214 dim 1 : vector<16x16xf32>, i32 -> vector<16x16xf32>
    %cst_215 = arith.constant 0.000000e+00 : f32
    %757 = vector.broadcast %cst_215 : f32 to vector<16x16xf32>
    %758 = arith.select %65, %756, %757 : vector<16x16xi1>, vector<16x16xf32>
    %c1_i32_216 = arith.constant 1 : i32
    %759 = tpu.dynamic_rotate %577 by %c1_i32_216 dim 1 : vector<16x16xf32>, i32 -> vector<16x16xf32>
    %cst_217 = arith.constant 0.000000e+00 : f32
    %760 = vector.broadcast %cst_217 : f32 to vector<16x16xf32>
    %761 = arith.select %65, %759, %760 : vector<16x16xi1>, vector<16x16xf32>
    %c75 = arith.constant 75 : index
    %762 = memref.load %arg1[%c75] : memref<144xf32, #tpu.memory_space<smem>>
    %763 = vector.broadcast %762 : f32 to vector<16x16xf32>
    %764 = arith.mulf %752, %763 : vector<16x16xf32>
    %765 = arith.addf %721, %764 : vector<16x16xf32>
    %c111 = arith.constant 111 : index
    %766 = memref.load %arg1[%c111] : memref<144xf32, #tpu.memory_space<smem>>
    %767 = vector.broadcast %766 : f32 to vector<16x16xf32>
    %768 = arith.mulf %755, %767 : vector<16x16xf32>
    %769 = arith.addf %725, %768 : vector<16x16xf32>
    %c84 = arith.constant 84 : index
    %770 = memref.load %arg1[%c84] : memref<144xf32, #tpu.memory_space<smem>>
    %771 = vector.broadcast %770 : f32 to vector<16x16xf32>
    %772 = arith.mulf %755, %771 : vector<16x16xf32>
    %773 = arith.addf %729, %772 : vector<16x16xf32>
    %c120 = arith.constant 120 : index
    %774 = memref.load %arg1[%c120] : memref<144xf32, #tpu.memory_space<smem>>
    %775 = vector.broadcast %774 : f32 to vector<16x16xf32>
    %776 = arith.mulf %752, %775 : vector<16x16xf32>
    %777 = arith.addf %733, %776 : vector<16x16xf32>
    %c93 = arith.constant 93 : index
    %778 = memref.load %arg1[%c93] : memref<144xf32, #tpu.memory_space<smem>>
    %779 = vector.broadcast %778 : f32 to vector<16x16xf32>
    %780 = arith.mulf %758, %779 : vector<16x16xf32>
    %781 = arith.addf %737, %780 : vector<16x16xf32>
    %c129 = arith.constant 129 : index
    %782 = memref.load %arg1[%c129] : memref<144xf32, #tpu.memory_space<smem>>
    %783 = vector.broadcast %782 : f32 to vector<16x16xf32>
    %784 = arith.mulf %761, %783 : vector<16x16xf32>
    %785 = arith.addf %741, %784 : vector<16x16xf32>
    %c102 = arith.constant 102 : index
    %786 = memref.load %arg1[%c102] : memref<144xf32, #tpu.memory_space<smem>>
    %787 = vector.broadcast %786 : f32 to vector<16x16xf32>
    %788 = arith.mulf %761, %787 : vector<16x16xf32>
    %789 = arith.addf %745, %788 : vector<16x16xf32>
    %c138 = arith.constant 138 : index
    %790 = memref.load %arg1[%c138] : memref<144xf32, #tpu.memory_space<smem>>
    %791 = vector.broadcast %790 : f32 to vector<16x16xf32>
    %792 = arith.mulf %758, %791 : vector<16x16xf32>
    %793 = arith.addf %749, %792 : vector<16x16xf32>
    %c76 = arith.constant 76 : index
    %794 = memref.load %arg1[%c76] : memref<144xf32, #tpu.memory_space<smem>>
    %795 = vector.broadcast %794 : f32 to vector<16x16xf32>
    %796 = arith.mulf %559, %795 : vector<16x16xf32>
    %797 = arith.addf %765, %796 : vector<16x16xf32>
    %c112 = arith.constant 112 : index
    %798 = memref.load %arg1[%c112] : memref<144xf32, #tpu.memory_space<smem>>
    %799 = vector.broadcast %798 : f32 to vector<16x16xf32>
    %800 = arith.mulf %565, %799 : vector<16x16xf32>
    %801 = arith.addf %769, %800 : vector<16x16xf32>
    %c85 = arith.constant 85 : index
    %802 = memref.load %arg1[%c85] : memref<144xf32, #tpu.memory_space<smem>>
    %803 = vector.broadcast %802 : f32 to vector<16x16xf32>
    %804 = arith.mulf %565, %803 : vector<16x16xf32>
    %805 = arith.addf %773, %804 : vector<16x16xf32>
    %c121 = arith.constant 121 : index
    %806 = memref.load %arg1[%c121] : memref<144xf32, #tpu.memory_space<smem>>
    %807 = vector.broadcast %806 : f32 to vector<16x16xf32>
    %808 = arith.mulf %559, %807 : vector<16x16xf32>
    %809 = arith.addf %777, %808 : vector<16x16xf32>
    %c94 = arith.constant 94 : index
    %810 = memref.load %arg1[%c94] : memref<144xf32, #tpu.memory_space<smem>>
    %811 = vector.broadcast %810 : f32 to vector<16x16xf32>
    %812 = arith.mulf %571, %811 : vector<16x16xf32>
    %813 = arith.addf %781, %812 : vector<16x16xf32>
    %c130 = arith.constant 130 : index
    %814 = memref.load %arg1[%c130] : memref<144xf32, #tpu.memory_space<smem>>
    %815 = vector.broadcast %814 : f32 to vector<16x16xf32>
    %816 = arith.mulf %577, %815 : vector<16x16xf32>
    %817 = arith.addf %785, %816 : vector<16x16xf32>
    %c103 = arith.constant 103 : index
    %818 = memref.load %arg1[%c103] : memref<144xf32, #tpu.memory_space<smem>>
    %819 = vector.broadcast %818 : f32 to vector<16x16xf32>
    %820 = arith.mulf %577, %819 : vector<16x16xf32>
    %821 = arith.addf %789, %820 : vector<16x16xf32>
    %c139 = arith.constant 139 : index
    %822 = memref.load %arg1[%c139] : memref<144xf32, #tpu.memory_space<smem>>
    %823 = vector.broadcast %822 : f32 to vector<16x16xf32>
    %824 = arith.mulf %571, %823 : vector<16x16xf32>
    %825 = arith.addf %793, %824 : vector<16x16xf32>
    %c15_i32_218 = arith.constant 15 : i32
    %826 = tpu.dynamic_rotate %559 by %c15_i32_218 dim 1 : vector<16x16xf32>, i32 -> vector<16x16xf32>
    %cst_219 = arith.constant 0.000000e+00 : f32
    %827 = vector.broadcast %cst_219 : f32 to vector<16x16xf32>
    %828 = arith.select %74, %826, %827 : vector<16x16xi1>, vector<16x16xf32>
    %c15_i32_220 = arith.constant 15 : i32
    %829 = tpu.dynamic_rotate %565 by %c15_i32_220 dim 1 : vector<16x16xf32>, i32 -> vector<16x16xf32>
    %cst_221 = arith.constant 0.000000e+00 : f32
    %830 = vector.broadcast %cst_221 : f32 to vector<16x16xf32>
    %831 = arith.select %74, %829, %830 : vector<16x16xi1>, vector<16x16xf32>
    %c15_i32_222 = arith.constant 15 : i32
    %832 = tpu.dynamic_rotate %571 by %c15_i32_222 dim 1 : vector<16x16xf32>, i32 -> vector<16x16xf32>
    %cst_223 = arith.constant 0.000000e+00 : f32
    %833 = vector.broadcast %cst_223 : f32 to vector<16x16xf32>
    %834 = arith.select %74, %832, %833 : vector<16x16xi1>, vector<16x16xf32>
    %c15_i32_224 = arith.constant 15 : i32
    %835 = tpu.dynamic_rotate %577 by %c15_i32_224 dim 1 : vector<16x16xf32>, i32 -> vector<16x16xf32>
    %cst_225 = arith.constant 0.000000e+00 : f32
    %836 = vector.broadcast %cst_225 : f32 to vector<16x16xf32>
    %837 = arith.select %74, %835, %836 : vector<16x16xi1>, vector<16x16xf32>
    %c77 = arith.constant 77 : index
    %838 = memref.load %arg1[%c77] : memref<144xf32, #tpu.memory_space<smem>>
    %839 = vector.broadcast %838 : f32 to vector<16x16xf32>
    %840 = arith.mulf %828, %839 : vector<16x16xf32>
    %841 = arith.addf %797, %840 : vector<16x16xf32>
    %c113 = arith.constant 113 : index
    %842 = memref.load %arg1[%c113] : memref<144xf32, #tpu.memory_space<smem>>
    %843 = vector.broadcast %842 : f32 to vector<16x16xf32>
    %844 = arith.mulf %831, %843 : vector<16x16xf32>
    %845 = arith.addf %801, %844 : vector<16x16xf32>
    %c86 = arith.constant 86 : index
    %846 = memref.load %arg1[%c86] : memref<144xf32, #tpu.memory_space<smem>>
    %847 = vector.broadcast %846 : f32 to vector<16x16xf32>
    %848 = arith.mulf %831, %847 : vector<16x16xf32>
    %849 = arith.addf %805, %848 : vector<16x16xf32>
    %c122 = arith.constant 122 : index
    %850 = memref.load %arg1[%c122] : memref<144xf32, #tpu.memory_space<smem>>
    %851 = vector.broadcast %850 : f32 to vector<16x16xf32>
    %852 = arith.mulf %828, %851 : vector<16x16xf32>
    %853 = arith.addf %809, %852 : vector<16x16xf32>
    %c95 = arith.constant 95 : index
    %854 = memref.load %arg1[%c95] : memref<144xf32, #tpu.memory_space<smem>>
    %855 = vector.broadcast %854 : f32 to vector<16x16xf32>
    %856 = arith.mulf %834, %855 : vector<16x16xf32>
    %857 = arith.addf %813, %856 : vector<16x16xf32>
    %c131 = arith.constant 131 : index
    %858 = memref.load %arg1[%c131] : memref<144xf32, #tpu.memory_space<smem>>
    %859 = vector.broadcast %858 : f32 to vector<16x16xf32>
    %860 = arith.mulf %837, %859 : vector<16x16xf32>
    %861 = arith.addf %817, %860 : vector<16x16xf32>
    %c104 = arith.constant 104 : index
    %862 = memref.load %arg1[%c104] : memref<144xf32, #tpu.memory_space<smem>>
    %863 = vector.broadcast %862 : f32 to vector<16x16xf32>
    %864 = arith.mulf %837, %863 : vector<16x16xf32>
    %865 = arith.addf %821, %864 : vector<16x16xf32>
    %c140 = arith.constant 140 : index
    %866 = memref.load %arg1[%c140] : memref<144xf32, #tpu.memory_space<smem>>
    %867 = vector.broadcast %866 : f32 to vector<16x16xf32>
    %868 = arith.mulf %834, %867 : vector<16x16xf32>
    %869 = arith.addf %825, %868 : vector<16x16xf32>
    %c15_i32_226 = arith.constant 15 : i32
    %870 = tpu.dynamic_rotate %559 by %c15_i32_226 dim 0 : vector<16x16xf32>, i32 -> vector<16x16xf32>
    %c1_i32_227 = arith.constant 1 : i32
    %871 = tpu.dynamic_rotate %870 by %c1_i32_227 dim 1 : vector<16x16xf32>, i32 -> vector<16x16xf32>
    %cst_228 = arith.constant 0.000000e+00 : f32
    %872 = vector.broadcast %cst_228 : f32 to vector<16x16xf32>
    %873 = arith.select %93, %871, %872 : vector<16x16xi1>, vector<16x16xf32>
    %c15_i32_229 = arith.constant 15 : i32
    %874 = tpu.dynamic_rotate %565 by %c15_i32_229 dim 0 : vector<16x16xf32>, i32 -> vector<16x16xf32>
    %c1_i32_230 = arith.constant 1 : i32
    %875 = tpu.dynamic_rotate %874 by %c1_i32_230 dim 1 : vector<16x16xf32>, i32 -> vector<16x16xf32>
    %cst_231 = arith.constant 0.000000e+00 : f32
    %876 = vector.broadcast %cst_231 : f32 to vector<16x16xf32>
    %877 = arith.select %93, %875, %876 : vector<16x16xi1>, vector<16x16xf32>
    %c15_i32_232 = arith.constant 15 : i32
    %878 = tpu.dynamic_rotate %571 by %c15_i32_232 dim 0 : vector<16x16xf32>, i32 -> vector<16x16xf32>
    %c1_i32_233 = arith.constant 1 : i32
    %879 = tpu.dynamic_rotate %878 by %c1_i32_233 dim 1 : vector<16x16xf32>, i32 -> vector<16x16xf32>
    %cst_234 = arith.constant 0.000000e+00 : f32
    %880 = vector.broadcast %cst_234 : f32 to vector<16x16xf32>
    %881 = arith.select %93, %879, %880 : vector<16x16xi1>, vector<16x16xf32>
    %c15_i32_235 = arith.constant 15 : i32
    %882 = tpu.dynamic_rotate %577 by %c15_i32_235 dim 0 : vector<16x16xf32>, i32 -> vector<16x16xf32>
    %c1_i32_236 = arith.constant 1 : i32
    %883 = tpu.dynamic_rotate %882 by %c1_i32_236 dim 1 : vector<16x16xf32>, i32 -> vector<16x16xf32>
    %cst_237 = arith.constant 0.000000e+00 : f32
    %884 = vector.broadcast %cst_237 : f32 to vector<16x16xf32>
    %885 = arith.select %93, %883, %884 : vector<16x16xi1>, vector<16x16xf32>
    %c78 = arith.constant 78 : index
    %886 = memref.load %arg1[%c78] : memref<144xf32, #tpu.memory_space<smem>>
    %887 = vector.broadcast %886 : f32 to vector<16x16xf32>
    %888 = arith.mulf %873, %887 : vector<16x16xf32>
    %889 = arith.addf %841, %888 : vector<16x16xf32>
    %c114 = arith.constant 114 : index
    %890 = memref.load %arg1[%c114] : memref<144xf32, #tpu.memory_space<smem>>
    %891 = vector.broadcast %890 : f32 to vector<16x16xf32>
    %892 = arith.mulf %877, %891 : vector<16x16xf32>
    %893 = arith.addf %845, %892 : vector<16x16xf32>
    %c87 = arith.constant 87 : index
    %894 = memref.load %arg1[%c87] : memref<144xf32, #tpu.memory_space<smem>>
    %895 = vector.broadcast %894 : f32 to vector<16x16xf32>
    %896 = arith.mulf %877, %895 : vector<16x16xf32>
    %897 = arith.addf %849, %896 : vector<16x16xf32>
    %c123 = arith.constant 123 : index
    %898 = memref.load %arg1[%c123] : memref<144xf32, #tpu.memory_space<smem>>
    %899 = vector.broadcast %898 : f32 to vector<16x16xf32>
    %900 = arith.mulf %873, %899 : vector<16x16xf32>
    %901 = arith.addf %853, %900 : vector<16x16xf32>
    %c96 = arith.constant 96 : index
    %902 = memref.load %arg1[%c96] : memref<144xf32, #tpu.memory_space<smem>>
    %903 = vector.broadcast %902 : f32 to vector<16x16xf32>
    %904 = arith.mulf %881, %903 : vector<16x16xf32>
    %905 = arith.addf %857, %904 : vector<16x16xf32>
    %c132 = arith.constant 132 : index
    %906 = memref.load %arg1[%c132] : memref<144xf32, #tpu.memory_space<smem>>
    %907 = vector.broadcast %906 : f32 to vector<16x16xf32>
    %908 = arith.mulf %885, %907 : vector<16x16xf32>
    %909 = arith.addf %861, %908 : vector<16x16xf32>
    %c105 = arith.constant 105 : index
    %910 = memref.load %arg1[%c105] : memref<144xf32, #tpu.memory_space<smem>>
    %911 = vector.broadcast %910 : f32 to vector<16x16xf32>
    %912 = arith.mulf %885, %911 : vector<16x16xf32>
    %913 = arith.addf %865, %912 : vector<16x16xf32>
    %c141 = arith.constant 141 : index
    %914 = memref.load %arg1[%c141] : memref<144xf32, #tpu.memory_space<smem>>
    %915 = vector.broadcast %914 : f32 to vector<16x16xf32>
    %916 = arith.mulf %881, %915 : vector<16x16xf32>
    %917 = arith.addf %869, %916 : vector<16x16xf32>
    %c15_i32_238 = arith.constant 15 : i32
    %918 = tpu.dynamic_rotate %559 by %c15_i32_238 dim 0 : vector<16x16xf32>, i32 -> vector<16x16xf32>
    %cst_239 = arith.constant 0.000000e+00 : f32
    %919 = vector.broadcast %cst_239 : f32 to vector<16x16xf32>
    %920 = arith.select %102, %918, %919 : vector<16x16xi1>, vector<16x16xf32>
    %c15_i32_240 = arith.constant 15 : i32
    %921 = tpu.dynamic_rotate %565 by %c15_i32_240 dim 0 : vector<16x16xf32>, i32 -> vector<16x16xf32>
    %cst_241 = arith.constant 0.000000e+00 : f32
    %922 = vector.broadcast %cst_241 : f32 to vector<16x16xf32>
    %923 = arith.select %102, %921, %922 : vector<16x16xi1>, vector<16x16xf32>
    %c15_i32_242 = arith.constant 15 : i32
    %924 = tpu.dynamic_rotate %571 by %c15_i32_242 dim 0 : vector<16x16xf32>, i32 -> vector<16x16xf32>
    %cst_243 = arith.constant 0.000000e+00 : f32
    %925 = vector.broadcast %cst_243 : f32 to vector<16x16xf32>
    %926 = arith.select %102, %924, %925 : vector<16x16xi1>, vector<16x16xf32>
    %c15_i32_244 = arith.constant 15 : i32
    %927 = tpu.dynamic_rotate %577 by %c15_i32_244 dim 0 : vector<16x16xf32>, i32 -> vector<16x16xf32>
    %cst_245 = arith.constant 0.000000e+00 : f32
    %928 = vector.broadcast %cst_245 : f32 to vector<16x16xf32>
    %929 = arith.select %102, %927, %928 : vector<16x16xi1>, vector<16x16xf32>
    %c79 = arith.constant 79 : index
    %930 = memref.load %arg1[%c79] : memref<144xf32, #tpu.memory_space<smem>>
    %931 = vector.broadcast %930 : f32 to vector<16x16xf32>
    %932 = arith.mulf %920, %931 : vector<16x16xf32>
    %933 = arith.addf %889, %932 : vector<16x16xf32>
    %c115 = arith.constant 115 : index
    %934 = memref.load %arg1[%c115] : memref<144xf32, #tpu.memory_space<smem>>
    %935 = vector.broadcast %934 : f32 to vector<16x16xf32>
    %936 = arith.mulf %923, %935 : vector<16x16xf32>
    %937 = arith.addf %893, %936 : vector<16x16xf32>
    %c88 = arith.constant 88 : index
    %938 = memref.load %arg1[%c88] : memref<144xf32, #tpu.memory_space<smem>>
    %939 = vector.broadcast %938 : f32 to vector<16x16xf32>
    %940 = arith.mulf %923, %939 : vector<16x16xf32>
    %941 = arith.addf %897, %940 : vector<16x16xf32>
    %c124 = arith.constant 124 : index
    %942 = memref.load %arg1[%c124] : memref<144xf32, #tpu.memory_space<smem>>
    %943 = vector.broadcast %942 : f32 to vector<16x16xf32>
    %944 = arith.mulf %920, %943 : vector<16x16xf32>
    %945 = arith.addf %901, %944 : vector<16x16xf32>
    %c97 = arith.constant 97 : index
    %946 = memref.load %arg1[%c97] : memref<144xf32, #tpu.memory_space<smem>>
    %947 = vector.broadcast %946 : f32 to vector<16x16xf32>
    %948 = arith.mulf %926, %947 : vector<16x16xf32>
    %949 = arith.addf %905, %948 : vector<16x16xf32>
    %c133 = arith.constant 133 : index
    %950 = memref.load %arg1[%c133] : memref<144xf32, #tpu.memory_space<smem>>
    %951 = vector.broadcast %950 : f32 to vector<16x16xf32>
    %952 = arith.mulf %929, %951 : vector<16x16xf32>
    %953 = arith.addf %909, %952 : vector<16x16xf32>
    %c106 = arith.constant 106 : index
    %954 = memref.load %arg1[%c106] : memref<144xf32, #tpu.memory_space<smem>>
    %955 = vector.broadcast %954 : f32 to vector<16x16xf32>
    %956 = arith.mulf %929, %955 : vector<16x16xf32>
    %957 = arith.addf %913, %956 : vector<16x16xf32>
    %c142 = arith.constant 142 : index
    %958 = memref.load %arg1[%c142] : memref<144xf32, #tpu.memory_space<smem>>
    %959 = vector.broadcast %958 : f32 to vector<16x16xf32>
    %960 = arith.mulf %926, %959 : vector<16x16xf32>
    %961 = arith.addf %917, %960 : vector<16x16xf32>
    %c15_i32_246 = arith.constant 15 : i32
    %962 = tpu.dynamic_rotate %559 by %c15_i32_246 dim 0 : vector<16x16xf32>, i32 -> vector<16x16xf32>
    %c15_i32_247 = arith.constant 15 : i32
    %963 = tpu.dynamic_rotate %962 by %c15_i32_247 dim 1 : vector<16x16xf32>, i32 -> vector<16x16xf32>
    %cst_248 = arith.constant 0.000000e+00 : f32
    %964 = vector.broadcast %cst_248 : f32 to vector<16x16xf32>
    %965 = arith.select %121, %963, %964 : vector<16x16xi1>, vector<16x16xf32>
    %c15_i32_249 = arith.constant 15 : i32
    %966 = tpu.dynamic_rotate %565 by %c15_i32_249 dim 0 : vector<16x16xf32>, i32 -> vector<16x16xf32>
    %c15_i32_250 = arith.constant 15 : i32
    %967 = tpu.dynamic_rotate %966 by %c15_i32_250 dim 1 : vector<16x16xf32>, i32 -> vector<16x16xf32>
    %cst_251 = arith.constant 0.000000e+00 : f32
    %968 = vector.broadcast %cst_251 : f32 to vector<16x16xf32>
    %969 = arith.select %121, %967, %968 : vector<16x16xi1>, vector<16x16xf32>
    %c15_i32_252 = arith.constant 15 : i32
    %970 = tpu.dynamic_rotate %571 by %c15_i32_252 dim 0 : vector<16x16xf32>, i32 -> vector<16x16xf32>
    %c15_i32_253 = arith.constant 15 : i32
    %971 = tpu.dynamic_rotate %970 by %c15_i32_253 dim 1 : vector<16x16xf32>, i32 -> vector<16x16xf32>
    %cst_254 = arith.constant 0.000000e+00 : f32
    %972 = vector.broadcast %cst_254 : f32 to vector<16x16xf32>
    %973 = arith.select %121, %971, %972 : vector<16x16xi1>, vector<16x16xf32>
    %c15_i32_255 = arith.constant 15 : i32
    %974 = tpu.dynamic_rotate %577 by %c15_i32_255 dim 0 : vector<16x16xf32>, i32 -> vector<16x16xf32>
    %c15_i32_256 = arith.constant 15 : i32
    %975 = tpu.dynamic_rotate %974 by %c15_i32_256 dim 1 : vector<16x16xf32>, i32 -> vector<16x16xf32>
    %cst_257 = arith.constant 0.000000e+00 : f32
    %976 = vector.broadcast %cst_257 : f32 to vector<16x16xf32>
    %977 = arith.select %121, %975, %976 : vector<16x16xi1>, vector<16x16xf32>
    %c80 = arith.constant 80 : index
    %978 = memref.load %arg1[%c80] : memref<144xf32, #tpu.memory_space<smem>>
    %979 = vector.broadcast %978 : f32 to vector<16x16xf32>
    %980 = arith.mulf %965, %979 : vector<16x16xf32>
    %981 = arith.addf %933, %980 : vector<16x16xf32>
    %c116 = arith.constant 116 : index
    %982 = memref.load %arg1[%c116] : memref<144xf32, #tpu.memory_space<smem>>
    %983 = vector.broadcast %982 : f32 to vector<16x16xf32>
    %984 = arith.mulf %969, %983 : vector<16x16xf32>
    %985 = arith.addf %937, %984 : vector<16x16xf32>
    %c89 = arith.constant 89 : index
    %986 = memref.load %arg1[%c89] : memref<144xf32, #tpu.memory_space<smem>>
    %987 = vector.broadcast %986 : f32 to vector<16x16xf32>
    %988 = arith.mulf %969, %987 : vector<16x16xf32>
    %989 = arith.addf %941, %988 : vector<16x16xf32>
    %c125 = arith.constant 125 : index
    %990 = memref.load %arg1[%c125] : memref<144xf32, #tpu.memory_space<smem>>
    %991 = vector.broadcast %990 : f32 to vector<16x16xf32>
    %992 = arith.mulf %965, %991 : vector<16x16xf32>
    %993 = arith.addf %945, %992 : vector<16x16xf32>
    %c98 = arith.constant 98 : index
    %994 = memref.load %arg1[%c98] : memref<144xf32, #tpu.memory_space<smem>>
    %995 = vector.broadcast %994 : f32 to vector<16x16xf32>
    %996 = arith.mulf %973, %995 : vector<16x16xf32>
    %997 = arith.addf %949, %996 : vector<16x16xf32>
    %c134 = arith.constant 134 : index
    %998 = memref.load %arg1[%c134] : memref<144xf32, #tpu.memory_space<smem>>
    %999 = vector.broadcast %998 : f32 to vector<16x16xf32>
    %1000 = arith.mulf %977, %999 : vector<16x16xf32>
    %1001 = arith.addf %953, %1000 : vector<16x16xf32>
    %c107 = arith.constant 107 : index
    %1002 = memref.load %arg1[%c107] : memref<144xf32, #tpu.memory_space<smem>>
    %1003 = vector.broadcast %1002 : f32 to vector<16x16xf32>
    %1004 = arith.mulf %977, %1003 : vector<16x16xf32>
    %1005 = arith.addf %957, %1004 : vector<16x16xf32>
    %c143 = arith.constant 143 : index
    %1006 = memref.load %arg1[%c143] : memref<144xf32, #tpu.memory_space<smem>>
    %1007 = vector.broadcast %1006 : f32 to vector<16x16xf32>
    %1008 = arith.mulf %973, %1007 : vector<16x16xf32>
    %1009 = arith.addf %961, %1008 : vector<16x16xf32>
    %cst_258 = arith.constant 0.000000e+00 : f32
    %1010 = vector.broadcast %cst_258 : f32 to vector<16x16xf32>
    %1011 = arith.maximumf %981, %1010 : vector<16x16xf32>
    %cst_259 = arith.constant 0.000000e+00 : f32
    %1012 = vector.broadcast %cst_259 : f32 to vector<16x16xf32>
    %1013 = arith.maximumf %985, %1012 : vector<16x16xf32>
    %1014 = arith.addf %1011, %1013 : vector<16x16xf32>
    %1015 = arith.addf %1014, %559 : vector<16x16xf32>
    %cst_260 = arith.constant 0.000000e+00 : f32
    %1016 = vector.broadcast %cst_260 : f32 to vector<16x16xf32>
    %1017 = arith.maximumf %989, %1016 : vector<16x16xf32>
    %cst_261 = arith.constant 0.000000e+00 : f32
    %1018 = vector.broadcast %cst_261 : f32 to vector<16x16xf32>
    %1019 = arith.maximumf %993, %1018 : vector<16x16xf32>
    %1020 = arith.addf %1017, %1019 : vector<16x16xf32>
    %1021 = arith.addf %1020, %565 : vector<16x16xf32>
    %cst_262 = arith.constant 0.000000e+00 : f32
    %1022 = vector.broadcast %cst_262 : f32 to vector<16x16xf32>
    %1023 = arith.maximumf %997, %1022 : vector<16x16xf32>
    %cst_263 = arith.constant 0.000000e+00 : f32
    %1024 = vector.broadcast %cst_263 : f32 to vector<16x16xf32>
    %1025 = arith.maximumf %1001, %1024 : vector<16x16xf32>
    %1026 = arith.addf %1023, %1025 : vector<16x16xf32>
    %1027 = arith.addf %1026, %571 : vector<16x16xf32>
    %cst_264 = arith.constant 0.000000e+00 : f32
    %1028 = vector.broadcast %cst_264 : f32 to vector<16x16xf32>
    %1029 = arith.maximumf %1005, %1028 : vector<16x16xf32>
    %cst_265 = arith.constant 0.000000e+00 : f32
    %1030 = vector.broadcast %cst_265 : f32 to vector<16x16xf32>
    %1031 = arith.maximumf %1009, %1030 : vector<16x16xf32>
    %1032 = arith.addf %1029, %1031 : vector<16x16xf32>
    %1033 = arith.addf %1032, %577 : vector<16x16xf32>
    %1034 = arith.addf %1015, %1 : vector<16x16xf32>
    %c0_266 = arith.constant 0 : index
    %c0_267 = arith.constant 0 : index
    %c0_268 = arith.constant 0 : index
    %c0_269 = arith.constant 0 : index
    %1035 = vector.load %arg4[%c0_266, %c0_267, %c0_268, %c0_269] : memref<1x4x16x16xf32, #tpu.memory_space<vmem>>, vector<1x1x16x16xf32>
    %1036 = vector.shape_cast %1035 : vector<1x1x16x16xf32> to vector<16x16xf32>
    %1037 = vector.shape_cast %1034 : vector<16x16xf32> to vector<1x1x16x16xf32>
    tpu.vector_store %arg4[%c0_266, %c0_267, %c0_268, %c0_269], %1037 {strides = array<i32>} : memref<1x4x16x16xf32, #tpu.memory_space<vmem>>, vector<1x1x16x16xf32>,
    %1038 = arith.addf %1021, %3 : vector<16x16xf32>
    %c0_270 = arith.constant 0 : index
    %c1_271 = arith.constant 1 : index
    %c0_272 = arith.constant 0 : index
    %c0_273 = arith.constant 0 : index
    %1039 = vector.load %arg4[%c0_270, %c1_271, %c0_272, %c0_273] : memref<1x4x16x16xf32, #tpu.memory_space<vmem>>, vector<1x1x16x16xf32>
    %1040 = vector.shape_cast %1039 : vector<1x1x16x16xf32> to vector<16x16xf32>
    %1041 = vector.shape_cast %1038 : vector<16x16xf32> to vector<1x1x16x16xf32>
    tpu.vector_store %arg4[%c0_270, %c1_271, %c0_272, %c0_273], %1041 {strides = array<i32>} : memref<1x4x16x16xf32, #tpu.memory_space<vmem>>, vector<1x1x16x16xf32>,
    %1042 = arith.addf %1027, %5 : vector<16x16xf32>
    %c0_274 = arith.constant 0 : index
    %c2_275 = arith.constant 2 : index
    %c0_276 = arith.constant 0 : index
    %c0_277 = arith.constant 0 : index
    %1043 = vector.load %arg4[%c0_274, %c2_275, %c0_276, %c0_277] : memref<1x4x16x16xf32, #tpu.memory_space<vmem>>, vector<1x1x16x16xf32>
    %1044 = vector.shape_cast %1043 : vector<1x1x16x16xf32> to vector<16x16xf32>
    %1045 = vector.shape_cast %1042 : vector<16x16xf32> to vector<1x1x16x16xf32>
    tpu.vector_store %arg4[%c0_274, %c2_275, %c0_276, %c0_277], %1045 {strides = array<i32>} : memref<1x4x16x16xf32, #tpu.memory_space<vmem>>, vector<1x1x16x16xf32>,
    %1046 = arith.addf %1033, %7 : vector<16x16xf32>
    %c0_278 = arith.constant 0 : index
    %c3_279 = arith.constant 3 : index
    %c0_280 = arith.constant 0 : index
    %c0_281 = arith.constant 0 : index
    %1047 = vector.load %arg4[%c0_278, %c3_279, %c0_280, %c0_281] : memref<1x4x16x16xf32, #tpu.memory_space<vmem>>, vector<1x1x16x16xf32>
    %1048 = vector.shape_cast %1047 : vector<1x1x16x16xf32> to vector<16x16xf32>
    %1049 = vector.shape_cast %1046 : vector<16x16xf32> to vector<1x1x16x16xf32>
    tpu.vector_store %arg4[%c0_278, %c3_279, %c0_280, %c0_281], %1049 {strides = array<i32>} : memref<1x4x16x16xf32, #tpu.memory_space<vmem>>, vector<1x1x16x16xf32>,
    return
  }
  func.func @transform_0(%arg0: i32) -> i32 {
    %c0_i32 = arith.constant 0 : i32
    %c0_i32_0 = arith.constant 0 : i32
    return %c0_i32 : i32
  }
  func.func @transform_1(%arg0: i32) -> i32 {
    %c0_i32 = arith.constant 0 : i32
    %c0_i32_0 = arith.constant 0 : i32
    return %c0_i32 : i32
  }
  func.func @transform_2(%arg0: i32) -> (i32, i32, i32, i32) {
    %c0_i32 = arith.constant 0 : i32
    %c0_i32_0 = arith.constant 0 : i32
    %c0_i32_1 = arith.constant 0 : i32
    %c0_i32_2 = arith.constant 0 : i32
    return %arg0, %c0_i32, %c0_i32_0, %c0_i32_1 : i32, i32, i32, i32
  }
  func.func @transform_3(%arg0: i32) -> (i32, i32, i32, i32) {
    %c0_i32 = arith.constant 0 : i32
    %c0_i32_0 = arith.constant 0 : i32
    %c0_i32_1 = arith.constant 0 : i32
    %c0_i32_2 = arith.constant 0 : i32
    return %arg0, %c0_i32, %c0_i32_0, %c0_i32_1 : i32, i32, i32, i32
  }
}

</mosaic_0001>

<bundles_post_ra>
// kernel: butterfly_conv_v1.1
= control target key start
LH: loop header
LB: loop body
LE: loop exit
PB: predicated region body
PF: predicated region fallthrough
CT: control target
= control target key end

     0   :  { %s5384_s0 = inlined_call_operand.vmem [shape: f32[144], index: 0, kind: input, shape index: {}]   ;;  %s5385_s1 = inlined_call_operand.vmem [shape: f32[16], index: 1, kind: input, shape index: {}]   ;;  %s5386_s2 = inlined_call_operand.vmem [shape: f32[2,4,16,16], index: 2, kind: input, shape index: {}]   ;;  %s5387_s3 = inlined_call_operand.hbm [shape: f32[2,4,16,16], index: 3, kind: output, shape index: {}]  }
   0x1   :  { %5574 = sst [smem:[#allocation119_spill]] %s5384_s0 }
   0x2   :  { %5575 = sst [smem:[#allocation120_spill]] %s5385_s1 }
   0x3   :  { %5576 = sst [smem:[#allocation121_spill]] %s5386_s2 }
   0x4   :  { %5577 = sst [smem:[#allocation122_spill]] %s5387_s3 }
   0x5   :  { %8 = vsyncpa [#allocation4], 0 }
   0x6   :  { %9 = vsyncpa [#allocation6], 0 }
   0x7   :  { %10 = vsyncpa [#allocation3], 0 }
   0x8   :  { %12 = vsyncpa [#allocation3 + $0x1], 0  ;;  %s2556_s12 = smov 0   ;;  %s2558_s13 = smov 0  }
   0x9   :  { %s2560_s14 = smov 0   ;;  %s2562_s15 = smov 0  }
   0xa LB: > { %5578 = sst [smem:[#allocation11_spill]] %s2514_s12  ;;  %s2577_s16 = sadd.s32 4294967295, %s2526_s15   ;;  %s2526_s15 = sphi %s2562_s15, %s6285_s15   ;;  %s2522_s14 = sphi %s2560_s14, %s6288_s14   ;;  %s2518_s13 = sphi %s2558_s13, %s6287_s13   ;;  %s2514_s12 = sphi %s2556_s12, %s6286_s12  }
   0xb   : > { %5579 = sst [smem:[#allocation12_spill]] %s2518_s13  ;;  %s2157_s17 = sadd.s32 4294967294, %s2526_s15  }
   0xc   : > { %5580 = sst [smem:[#allocation13_spill]] %s2522_s14  ;;  %s2581_s18 = sadd.s32 1, %s2526_s15  }
   0xd   : > { %5581 = sst [smem:[#allocation14_spill]] %s2526_s15  ;;  %s93_s19 = sadd.s32 1, %s2522_s14 }
   0xe   : > { %5582 = sst [smem:[#allocation15_spill]] %s2577_s16  ;;  %s90_s20 = ssub.s32 %s2526_s15, %s2581_s18 }
   0xf   : > { %5583 = sst [smem:[#allocation16_spill]] %s2581_s18  ;;  %p103_p0 = scmp.ne.s32.totalorder %s2522_s14, %s2518_s13 }
  0x10   : > { %p91_p1 = scmp.eq.s32.totalorder %s90_s20, 0  ;;  %p104_p2 = scmp.eq.s32.totalorder %s2577_s16, 1 }
  0x11   : > { %p109_p3 = scmp.ne.s32.totalorder %s2518_s13, %s2514_s12  ;;  %p110_p4 = scmp.eq.s32.totalorder %s2157_s17, 1 }
  0x12   : > { %s2592_s21 = scalar_select %p91_p1, %s2522_s14, %s93_s19  }
  0x13   : > { %p2594_p5 = por %p104_p2, %p103_p0  ;;  %p2598_p6 = por %p110_p4, %p109_p3 }
  0x14   : > { %5584 = sst [smem:[#allocation17_spill]] %s2592_s21  ;;  %p2158_p7 = scmp.ge.s32.totalorder %s2526_s15, 1 }
  0x15   : > { %s5585_s22 = scalar_select %p2594_p5, 1, 0 }
  0x16   : > { %s5587_s23 = scalar_select %p2598_p6, 1, 0 }
  0x17   : > { %5586 = sst [smem:[#allocation18_spill]] %s5585_s22  ;;  %p117_p8 = scmp.lt.s32.totalorder %s2526_s15, 3 }
  0x18   : > { %5588 = sst [smem:[#allocation19_spill]] %s5587_s23  ;;  %p5388_p9 = scmp.eq.s32.totalorder %s2577_s16, 0 }
  0x19   : > { %p2605_p10 = pnand %p2158_p7, %p117_p8  ;;  %s5590_s0 = sld [smem:[#allocation119_spill]] }
  0x1a   : > { %s5591_s1 = sld [smem:[#allocation120_spill]] }
  0x1b   : > { %s5589_s24 = scalar_select %p2605_p10, 1, 0 }
  0x1c   : > { %p2355_p11 = pneg %p2605_p10 }
  0x1e   : > { %p2619_p12 = pnand %p5388_p9, %p2355_p11 }
  0x1f   : > { %s130_s27 = sshll.u32 %s5590_s0, 4  ;;  %s131_s27 = int_to_ptr.vmem [resolvable:$true] %s130_s27 }
  0x20   : > { %s141_s30 = sshll.u32 %s5591_s1, 4  ;;  %s2426_s5 = scalar_lea.vmem %s131_s27, 32  ;;  %s142_s30 = int_to_ptr.vmem [resolvable:$true] %s141_s30 }
  0x21   : > { %p2427_p13 = scmp.ne.s32.totalorder %s131_s27, %s2426_s5  ;;  %p2428_p0 = pneg %p2619_p12 }
  0x22   : > { %p2434_p3 = scmp.lt.s32.totalorder %s131_s27, %s131_s27  ;;  %p2435_p4 = scmp.lt.s32.totalorder %s2426_s5, %s2426_s5 }
  0x23   : > { %p2429_p1 = pnand %p2428_p0, %p2427_p13 }
  0x24   : > { %p2436_p7 = por %p2435_p4, %p2434_p3 }
  0x25   : > { %p2430_p2 = pneg %p2429_p1 }
  0x27   : > { %p2437_p8 = pnand %p2436_p7, %p2430_p2 }
  0x29   : > { %2440 = shalt.err (!%p2437_p8)
}
  0x2a   : > { %s2528_s6 = smov [#allocation2]   ;;  %s2441_s7 = scalar_lea.vmem %s142_s30, 16 }
  0x2b   : > { %2358 = dma.vmem_to_smem (!%p2619_p12), %s131_s27, 32, %s2528_s6, [#allocation4]  }
  0x2c   : > { %p2442_p11 = scmp.ne.s32.totalorder %s142_s30, %s2441_s7  ;;  %p2449_p5 = scmp.lt.s32.totalorder %s142_s30, %s142_s30 }
  0x2d   : > { %p2450_p10 = scmp.lt.s32.totalorder %s2441_s7, %s2441_s7 }
  0x2e   : > { %p2444_p9 = pnand %p2442_p11, %p2428_p0 }
  0x2f   : > { %p2451_p13 = por %p2450_p10, %p2449_p5 }
  0x30   : > { %p2445_p6 = pneg %p2444_p9 }
  0x32   : > { %p2452_p1 = pnand %p2451_p13, %p2445_p6 }
  0x34   : > { %2455 = shalt.err (!%p2452_p1)
}
  0x35   : > { %s2529_s8 = smov [#allocation5]   ;;  %p5593_p2 = scmp.ne.s32.totalorder %s5589_s24, 0 }
  0x36   : > { %2361 = dma.vmem_to_smem (!%p2619_p12), %s142_s30, 16, %s2529_s8, [#allocation6]  }
  0x37   : > { %162 = sbr.rel (%p5593_p2) target bundleno = 1061 (0x425), region = 32 }
  0x3e   : > { %p5594_p3 = scmp.eq.s32.totalorder %s2577_s16, 0 }
  0x40   : > { %2501 = dma.done.wait (%p5594_p3), [#allocation4], 32   ;;  %p5595_p4 = pmov %p5594_p3 }
  0x41   : > { %p5596_p9 = pmov %p5594_p3 }
  0x42   : > { %2503 = vsyncadd (%p5595_p4), [#allocation4], 4294967264 }
  0x43   : > { %2505 = dma.done.wait (%p5596_p9), [#allocation6], 16   ;;  %p5597_p5 = pmov %p5594_p3 }
  0x45   : > { %2507 = vsyncadd (%p5597_p5), [#allocation6], 4294967280 }
  0x46   : > { %172 = sfence }
  0x47   : > { %p191_p6 = scmp.lt.s32.totalorder %s2577_s16, 1  ;;  %v207_v0 = vlaneseq  ;;  %s5599_s2 = sld [smem:[#allocation121_spill]]  ;;  %vm273_vm2 = vcmask 1047680   ;;  %vm2041_vm13 = vcmask 130048  }
  0x48   : > { %s5395_s20 = smov 16   ;;  %s5393_s24 = smov 113  }
  0x49   : > { %s192_s9 = scalar_select %p191_p6, %s2577_s16, 1  ;;  %v2642_v1 = vshrl.u32 %v207_v0, 7 }
  0x4a   : > { %s5391_s25 = smov 127   ;;  %s2971_s26 = sld [smem:[#allocation2 + $0xa]] }
  0x4b   : > { %5598 = vst [vmem:[#allocation20_spill] sm:$0xff] %v2642_v1  ;;  %s2343_s10 = sshll.u32 %s192_s9, 6  ;;  %vm270_vm0 = vcmp.lt.s32.totalorder %v2642_v1, 1  ;;  %vm824_vm1 = vcmp.lt.s32.totalorder %v2642_v1, 7  ;;  %s2973_s27 = sld [smem:[#allocation2 + $0x40]] }
  0x4c   : > { %s2975_s28 = sld [smem:[#allocation2 + $0x1]]  ;;  %s2977_s29 = sld [smem:[#allocation2 + $0x37]] }
  0x4d   : > { %s2647_s19 = scalar_lea.vmem %s5599_s2, %s2343_s10  ;;  %s2979_s30 = sld [smem:[#allocation2 + $0x25]] }
  0x4e   : > { %5600 = sst [smem:[#allocation21_spill]] %s2647_s19  ;;  %v2650_v2 = vld [vmem:[%s2647_s19 + $0x10] sm:$0xff]  ;;  %v2653_v3 = vld [vmem:[%s2647_s19 + $0x18] sm:$0xff]  ;;  %v2659_v6 = vld [vmem:[%s2647_s19] sm:$0xff]  ;;  %s2981_s4 = sld [smem:[#allocation2 + $0x13]] }
  0x4f   : > { %v296_v4 = vrot.slane %v2650_v2, 7  ;;  %v297_v5 = vrot.slane %v2653_v3, 7  ;;  %v2662_v7 = vld [vmem:[%s2647_s19 + $0x8] sm:$0xff]  ;;  %v268_v8 = vrot.slane %v2659_v6, 7  ;;  %v2667_v10 = vld [vmem:[%s2647_s19 + $0x20] sm:$0xff]  ;;  %v2695_v18 = vld [vmem:[%s2647_s19 + $0x30] sm:$0xff] }
  0x50   : > { %v269_v9 = vrot.slane %v2662_v7, 7  ;;  %v2670_v11 = vld [vmem:[%s2647_s19 + $0x28] sm:$0xff]  ;;  %v322_v15 = vrot.slane %v2667_v10, 7  ;;  %v2698_v19 = vld [vmem:[%s2647_s19 + $0x38] sm:$0xff]  ;;  %v348_v21 = vrot.slane %v2695_v18, 7  ;;  %v822_v26 = vrot.slane %v2659_v6, 1 }
  0x51   : > { %v2674_v12 = vsel %vm270_vm0, %v297_v5, %v296_v4  ;;  %v2686_v14 = vsel %vm270_vm0, %v296_v4, %v297_v5  ;;  %v323_v16 = vrot.slane %v2670_v11, 7  ;;  %v349_v22 = vrot.slane %v2698_v19, 7  ;;  %5601 = sst [smem:[#allocation22_spill]] %s2971_s26  ;;  %s2983_s5 = sld [smem:[#allocation2 + $0x2e]] }
  0x52   : > { %300 = vrot.lane.b32.xlu1 %v2674_v12, %s5395_s20  ;;  %v2680_v13 = vsel %vm270_vm0, %v269_v9, %v268_v8  ;;  %v2692_v17 = vsel %vm270_vm0, %v268_v8, %v269_v9  ;;  %v823_v27 = vrot.slane %v2662_v7, 1  ;;  %v849_v29 = vrot.slane %v2650_v2, 1  ;;  %5602 = sst [smem:[#allocation23_spill]] %s2973_s27  ;;  %s2985_s6 = sld [smem:[#allocation2 + $0x1c]] }
  0x53   : > { %274 = vrot.lane.b32.xlu0 %v2680_v13, %s5395_s20  ;;  %v2706_v20 = vsel %vm270_vm0, %v322_v15, %v323_v16  ;;  %v2712_v23 = vsel %vm270_vm0, %v323_v16, %v322_v15  ;;  %v2720_v24 = vsel %vm270_vm0, %v348_v21, %v349_v22  ;;  %v2724_v25 = vsel %vm270_vm0, %v349_v22, %v348_v21  ;;  %5603 = sst [smem:[#allocation24_spill]] %s2975_s28  ;;  %s2987_s7 = sld [smem:[#allocation2 + $0x7]] }
  0x54   : > { %v2751_v28 = vsel %vm824_vm1, %v823_v27, %v822_v26  ;;  %v850_v30 = vrot.slane %v2653_v3, 1  ;;  %v2757_v31 = vsel %vm824_vm1, %v822_v26, %v823_v27  ;;  %v875_v33 = vrot.slane %v2667_v10, 1  ;;  %5604 = sst [smem:[#allocation25_spill]] %s2979_s30  ;;  %s2991_s9 = sld [smem:[#allocation2 + $0x10]] }
  0x55   : > { %v876_v34 = vrot.slane %v2670_v11, 1  ;;  %v901_v37 = vrot.slane %v2695_v18, 1  ;;  %v902_v38 = vrot.slane %v2698_v19, 1  ;;  %s2989_s8 = sld [smem:[#allocation2 + $0x3d]]  ;;  %s2993_s10 = sld [smem:[#allocation2 + $0x46]] }
  0x56   : > { %303 = vrot.lane.b32.xlu1 %v2686_v14, %s5395_s20  ;;  %v2765_v32 = vsel %vm824_vm1, %v850_v30, %v849_v29  ;;  %v2771_v35 = vsel %vm824_vm1, %v849_v29, %v850_v30  ;;  %s2995_s11 = sld [smem:[#allocation2 + $0x2b]]  ;;  %s2997_s17 = sld [smem:[#allocation2 + $0x19]] }
  0x57   : > { %277 = vrot.lane.b32.xlu0 %v2692_v17, %s5395_s20  ;;  %v2779_v36 = vsel %vm824_vm1, %v876_v34, %v875_v33  ;;  %v2785_v39 = vsel %vm824_vm1, %v875_v33, %v876_v34  ;;  %v2793_v40 = vsel %vm824_vm1, %v902_v38, %v901_v37  ;;  %v2797_v41 = vsel %vm824_vm1, %v901_v37, %v902_v38  ;;  %5605 = sst [smem:[#allocation26_spill]] %s2983_s5  ;;  %s3009_s0 = sld [smem:[#allocation2 + $0x42]] }
  0x58   : > { %5606 = sst [smem:[#allocation27_spill]] %s2985_s6  ;;  %s3013_s2 = sld [smem:[#allocation2 + $0x15]] }
  0x59   : > { %5607 = sst [smem:[#allocation28_spill]] %s2987_s7  ;;  %s3011_s1 = sld [smem:[#allocation2 + $0x27]] }
  0x5a   : > { %329 = vrot.lane.b32.xlu1 %v2706_v20, %s5395_s20  ;;  %5609 = sst [smem:[#allocation30_spill]] %s2991_s9  ;;  %s3015_s21 = sld [smem:[#allocation2 + $0x30]] }
  0x5b   : > { %326 = vrot.lane.b32.xlu0 %v2712_v23, %s5395_s20  ;;  %5608 = sst [smem:[#allocation29_spill]] %s2989_s8  ;;  %s3017_s14 = sld [smem:[#allocation2 + $0x1e]] }
  0x5c   : > { %5610 = sst [smem:[#allocation31_spill]] %s2993_s10  ;;  %s3020_s18 = sld [smem:[#allocation2 + $0x5]] }
  0x5d   : > { %5611 = sst [smem:[#allocation32_spill]] %s2995_s11  ;;  %s3022_s23 = sld [smem:[#allocation2 + $0x3b]] }
  0x5e   : > { %355 = vrot.lane.b32.xlu1 %v2720_v24, %s5395_s20  ;;  %5612 = sst [smem:[#allocation33_spill]] %s2997_s17  ;;  %s3028_s12 = sld [smem:[#allocation2 + $0xe]] }
  0x5f   : > { %352 = vrot.lane.b32.xlu0 %v2724_v25, %s5395_s20  ;;  %5617 = sst [smem:[#allocation38_spill]] %s3009_s0  ;;  %s3030_s15 = sld [smem:[#allocation2 + $0x44]] }
  0x60   : > { %5618 = sst [smem:[#allocation39_spill]] %s3011_s1  ;;  %s3040_s3 = sld [smem:[#allocation2 + $0x29]] }
  0x61   : > { %5619 = sst [smem:[#allocation40_spill]] %s3013_s2  ;;  %s3042_s22 = sld [smem:[#allocation2 + $0x17]] }
  0x62   : > { %561 = vrot.lane.b32.xlu1 %v2662_v7, %s5395_s20  ;;  %5620 = sst [smem:[#allocation41_spill]] %s3015_s21  ;;  %s3044_s16 = sld [smem:[#allocation2 + $0x32]] }
  0x63   : > { %558 = vrot.lane.b32.xlu0 %v2659_v6, %s5395_s20  ;;  %5621 = sst [smem:[#allocation42_spill]] %s3017_s14  ;;  %s3046_s13 = sld [smem:[#allocation2 + $0x20]] }
  0x64   : > { %5622 = sst [smem:[#allocation43_spill]] %s3020_s18  ;;  %s3053_s19 = sld [smem:[#allocation2]] }
  0x65   : > { %5623 = sst [smem:[#allocation44_spill]] %s3022_s23  ;;  %s3199_s0 = sld [smem:[#allocation2 + $0x3a]] }
  0x66   : > { %583 = vrot.lane.b32.xlu1 %v2653_v3, %s5395_s20  ;;  %5624 = sst [smem:[#allocation45_spill]] %s3028_s12  ;;  %s3213_s14 = sld [smem:[#allocation2 + $0xd]] }
  0x67   : > { %580 = vrot.lane.b32.xlu0 %v2650_v2, %s5395_s20  ;;  %5625 = sst [smem:[#allocation46_spill]] %s3030_s15  ;;  %s3055_s15 = sld [smem:[#allocation2 + $0x36]] }
  0x68   : > { %5626 = sst [smem:[#allocation47_spill]] %s3040_s3  ;;  %s3215_s23 = sld [smem:[#allocation2 + $0x43]] }
  0x69   : > { %5627 = sst [smem:[#allocation48_spill]] %s3042_s22  ;;  %s3229_s22 = sld [smem:[#allocation2 + $0x1d]] }
  0x6a   : > { %605 = vrot.lane.b32.xlu1 %v2670_v11, %s5395_s20  ;;  %5628 = sst [smem:[#allocation49_spill]] %s3044_s16  ;;  %s3267_s2 = sld [smem:[#allocation2 + $0x1f]] }
  0x6b   : > { %602 = vrot.lane.b32.xlu0 %v2667_v10, %s5395_s20  ;;  %5629 = sst [smem:[#allocation50_spill]] %s3046_s13  ;;  %s3072_s13 = sld [smem:[#allocation5]] }
  0x6c   : > { %5630 = sst [smem:[#allocation51_spill]] %s3053_s19  ;;  %s3319_s16 = sld [smem:[#allocation2 + $0x22]] }
  0x6d   : > { %5631 = sst [smem:[#allocation52_spill]] %s3055_s15  ;;  %s3074_s19 = sld [smem:[#allocation5 + $0x6]] }
  0x6e   : > { %627 = vrot.lane.b32.xlu1 %v2698_v19, %s5395_s20  ;;  %s3092_s15 = sld [smem:[#allocation5 + $0x7]]  ;;  %s3335_s18 = sld [smem:[#allocation2 + $0x21]] }
  0x6f   : > { %624 = vrot.lane.b32.xlu0 %v2695_v18, %s5395_s20  ;;  %s5653_s1 = sld [smem:[#allocation52_spill]]  ;;  %5664 = sst [smem:[#allocation22_spill]] %s3229_s22 }
  0x70   : > { %s3393_s22 = sld [smem:[#allocation2 + $0x35]] }
  0x71   : > { %5632 = sst [smem:[#allocation53_spill]] %s3072_s13  ;;  %s3243_s13 = sld [smem:[#allocation2 + $0x16]] }
  0x72   : > { %830 = vrot.lane.b32.xlu1 %v2751_v28, %s5395_s20 }
  0x73   : > { %827 = vrot.lane.b32.xlu0 %v2757_v31, %s5395_s20  ;;  %5633 = sst [smem:[#allocation54_spill]] %s3074_s19  ;;  %s3291_s19 = sld [smem:[#allocation2 + $0xf]] }
  0x74   : > { %5637 = sst [smem:[#allocation58_spill]] %s3092_s15  ;;  %s3117_s15 = sld [smem:[#allocation5 + $0x2]] }
  0x76   : > { %856 = vrot.lane.b32.xlu1 %v2765_v32, %s5395_s20 }
  0x77   : > { %853 = vrot.lane.b32.xlu0 %v2771_v35, %s5395_s20 }
  0x7a   : > { %882 = vrot.lane.b32.xlu1 %v2779_v36, %s5395_s20  ;;  %5640 = sst [smem:[#allocation61_spill]] %s3117_s15  ;;  %s3139_s15 = sld [smem:[#allocation2 + $0x2d]] }
  0x7b   : > { %879 = vrot.lane.b32.xlu0 %v2785_v39, %s5395_s20 }
  0x7e   : > { %908 = vrot.lane.b32.xlu1 %v2793_v40, %s5395_s20 }
  0x7f   : > { %905 = vrot.lane.b32.xlu0 %v2797_v41, %s5395_s20 }
  0xc4   : > { %v301_v42 = vpop.permute.xlu1 %300 }
  0xc5   : > { %v275_v43 = vpop.permute.xlu0 %274  ;;  %v302_v16 = vsel %vm273_vm2, %v301_v42, %v2674_v12 }
  0xc6   : > { %v276_v9 = vsel %vm273_vm2, %v275_v43, %v2680_v13 }
  0xc8   : > { %v304_v44 = vpop.permute.xlu1 %303 }
  0xc9   : > { %v278_v45 = vpop.permute.xlu0 %277  ;;  %v305_v15 = vsel %vm273_vm2, %v304_v44, %v2686_v14 }
  0xca   : > { %v279_v8 = vsel %vm273_vm2, %v278_v45, %v2692_v17 }
  0xcc   : > { %v330_v46 = vpop.permute.xlu1 %329 }
  0xcd   : > { %v327_v47 = vpop.permute.xlu0 %326  ;;  %v331_v26 = vsel %vm273_vm2, %v330_v46, %v2706_v20 }
  0xce   : > { %v328_v27 = vsel %vm273_vm2, %v327_v47, %v2712_v23 }
  0xd0   : > { %v356_v48 = vpop.permute.xlu1 %355 }
  0xd1   : > { %v353_v49 = vpop.permute.xlu0 %352  ;;  %v357_v30 = vsel %vm273_vm2, %v356_v48, %v2720_v24 }
  0xd2   : > { %v354_v34 = vsel %vm273_vm2, %v353_v49, %v2724_v25 }
  0xd4   : > { %v562_v50 = vpop.permute.xlu1 %561 }
  0xd5   : > { %v559_v51 = vpop.permute.xlu0 %558  ;;  %v563_v52 = vsel %vm273_vm2, %v562_v50, %v2662_v7 }
  0xd6   : > { %566 = vrot.lane.b32.xlu1 %v563_v52, %s5395_s20  ;;  %v560_v53 = vsel %vm273_vm2, %v559_v51, %v2659_v6 }
  0xd7   : > { %564 = vrot.lane.b32.xlu0 %v560_v53, %s5395_s20 }
  0xd8   : > { %v584_v54 = vpop.permute.xlu1 %583 }
  0xd9   : > { %v581_v55 = vpop.permute.xlu0 %580  ;;  %v585_v56 = vsel %vm273_vm2, %v584_v54, %v2653_v3 }
  0xda   : > { %588 = vrot.lane.b32.xlu1 %v585_v56, %s5395_s20  ;;  %v582_v57 = vsel %vm273_vm2, %v581_v55, %v2650_v2 }
  0xdb   : > { %586 = vrot.lane.b32.xlu0 %v582_v57, %s5395_s20 }
  0xdc   : > { %v606_v58 = vpop.permute.xlu1 %605 }
  0xdd   : > { %v603_v59 = vpop.permute.xlu0 %602  ;;  %v607_v60 = vsel %vm273_vm2, %v606_v58, %v2670_v11 }
  0xde   : > { %610 = vrot.lane.b32.xlu1 %v607_v60, %s5395_s20  ;;  %v604_v61 = vsel %vm273_vm2, %v603_v59, %v2667_v10 }
  0xdf   : > { %608 = vrot.lane.b32.xlu0 %v604_v61, %s5395_s20 }
  0xe0   : > { %v628_v62 = vpop.permute.xlu1 %627 }
  0xe1   : > { %v625_v63 = vpop.permute.xlu0 %624  ;;  %v629_v4 = vsel %vm273_vm2, %v628_v62, %v2698_v19 }
  0xe2   : > { %632 = vrot.lane.b32.xlu1 %v629_v4, %s5395_s20  ;;  %v626_v5 = vsel %vm273_vm2, %v625_v63, %v2695_v18 }
  0xe3   : > { %630 = vrot.lane.b32.xlu0 %v626_v5, %s5395_s20 }
  0xe4   : > { %v831_v21 = vpop.permute.xlu1 %830 }
  0xe5   : > { %v828_v22 = vpop.permute.xlu0 %827  ;;  %v832_v37 = vsel %vm273_vm2, %v831_v21, %v2751_v28 }
  0xe6   : > { %282 = vrot.lane.b32.xlu1 %v279_v8, %s5395_s20  ;;  %v829_v38 = vsel %vm273_vm2, %v828_v22, %v2757_v31 }
  0xe7   : > { %280 = vrot.lane.b32.xlu0 %v276_v9, %s5395_s20 }
  0xe8   : > { %v857_v29 = vpop.permute.xlu1 %856 }
  0xe9   : > { %v854_v33 = vpop.permute.xlu0 %853  ;;  %v858_v43 = vsel %vm273_vm2, %v857_v29, %v2765_v32 }
  0xea   : > { %308 = vrot.lane.b32.xlu1 %v305_v15, %s5395_s20  ;;  %v855_v45 = vsel %vm273_vm2, %v854_v33, %v2771_v35 }
  0xeb   : > { %306 = vrot.lane.b32.xlu0 %v302_v16, %s5395_s20 }
  0xec   : > { %v883_v42 = vpop.permute.xlu1 %882 }
  0xed   : > { %v880_v44 = vpop.permute.xlu0 %879  ;;  %v884_v46 = vsel %vm273_vm2, %v883_v42, %v2779_v36 }
  0xee   : > { %334 = vrot.lane.b32.xlu1 %v331_v26, %s5395_s20  ;;  %v881_v47 = vsel %vm273_vm2, %v880_v44, %v2785_v39 }
  0xef   : > { %332 = vrot.lane.b32.xlu0 %v328_v27, %s5395_s20 }
  0xf0   : > { %v909_v48 = vpop.permute.xlu1 %908 }
  0xf1   : > { %v906_v49 = vpop.permute.xlu0 %905  ;;  %v910_v50 = vsel %vm273_vm2, %v909_v48, %v2793_v40 }
  0xf2   : > { %360 = vrot.lane.b32.xlu1 %v357_v30, %s5395_s20  ;;  %v907_v51 = vsel %vm273_vm2, %v906_v49, %v2797_v41 }
  0xf3   : > { %358 = vrot.lane.b32.xlu0 %v354_v34, %s5395_s20 }
  0xf6   : > { %835 = vrot.lane.b32.xlu1 %v832_v37, %s5395_s20 }
  0xf7   : > { %833 = vrot.lane.b32.xlu0 %v829_v38, %s5395_s20 }
  0xfa   : > { %861 = vrot.lane.b32.xlu1 %v858_v43, %s5395_s20 }
  0xfb   : > { %859 = vrot.lane.b32.xlu0 %v855_v45, %s5395_s20 }
  0xfe   : > { %887 = vrot.lane.b32.xlu1 %v884_v46, %s5395_s20 }
  0xff   : > { %885 = vrot.lane.b32.xlu0 %v881_v47, %s5395_s20 }
 0x102   : > { %913 = vrot.lane.b32.xlu1 %v910_v50, %s5395_s20 }
 0x103   : > { %911 = vrot.lane.b32.xlu0 %v907_v51, %s5395_s20  ;;  %s3007_s20 = sld [smem:[#allocation2 + $0xc]] }
 0x109   : > { %5616 = sst [smem:[#allocation37_spill]] %s3007_s20  ;;  %s3197_s20 = sld [smem:[#allocation2 + $0x41]] }
 0x148   : > { %v567_v52 = vpop.permute.xlu1 %566 }
 0x149   : > { %v565_v53 = vpop.permute.xlu0 %564  ;;  %v569_v54 = vsel %vm273_vm2, %v567_v52, %v2662_v7 }
 0x14a   : > { %574 = vrot.lane.b32.xlu1 %v569_v54, %s5393_s24  ;;  %v568_v55 = vsel %vm273_vm2, %v565_v53, %v2659_v6 }
 0x14b   : > { %572 = vrot.lane.b32.xlu0 %v568_v55, %s5393_s24 }
 0x14c   : > { %v589_v56 = vpop.permute.xlu1 %588 }
 0x14d   : > { %v587_v57 = vpop.permute.xlu0 %586  ;;  %v591_v58 = vsel %vm273_vm2, %v589_v56, %v2653_v3 }
 0x14e   : > { %596 = vrot.lane.b32.xlu1 %v591_v58, %s5393_s24  ;;  %v590_v59 = vsel %vm273_vm2, %v587_v57, %v2650_v2 }
 0x14f   : > { %594 = vrot.lane.b32.xlu0 %v590_v59, %s5393_s24 }
 0x150   : > { %v611_v60 = vpop.permute.xlu1 %610 }
 0x151   : > { %v609_v61 = vpop.permute.xlu0 %608  ;;  %v613_v62 = vsel %vm273_vm2, %v611_v60, %v2670_v11 }
 0x152   : > { %618 = vrot.lane.b32.xlu1 %v613_v62, %s5393_s24  ;;  %v612_v63 = vsel %vm273_vm2, %v609_v61, %v2667_v10 }
 0x153   : > { %616 = vrot.lane.b32.xlu0 %v612_v63, %s5393_s24 }
 0x154   : > { %v633_v4 = vpop.permute.xlu1 %632 }
 0x155   : > { %v631_v5 = vpop.permute.xlu0 %630  ;;  %v635_v8 = vsel %vm273_vm2, %v633_v4, %v2698_v19  ;;  %v211_v4 = vand.u32 127, %v207_v0 }
 0x156   : > { %640 = vrot.lane.b32.xlu1 %v635_v8, %s5393_s24  ;;  %v634_v9 = vsel %vm273_vm2, %v631_v5, %v2695_v18  ;;  %v443_v5 = vstv %s2971_s26  ;;  %s3084_s26 = sld [smem:[#allocation2 + $0x3f]] }
 0x157   : > { %638 = vrot.lane.b32.xlu0 %v634_v9, %s5393_s24 }
 0x158   : > { %v283_v15 = vpop.permute.xlu1 %282 }
 0x159   : > { %v281_v16 = vpop.permute.xlu0 %280  ;;  %v285_v26 = vsel %vm273_vm2, %v283_v15, %v2692_v17  ;;  %v431_v15 = vstv %s2975_s28  ;;  %s3090_s28 = sld [smem:[#allocation5 + $0x1]] }
 0x15a   : > { %744 = vrot.lane.b32.xlu1 %v569_v54, %s5391_s25  ;;  %v284_v27 = vsel %vm273_vm2, %v281_v16, %v2680_v13 }
 0x15b   : > { %742 = vrot.lane.b32.xlu0 %v568_v55, %s5391_s25 }
 0x15c   : > { %v309_v21 = vpop.permute.xlu1 %308  ;;  %5635 = sst [smem:[#allocation56_spill]] %s3084_s26  ;;  %s3102_s26 = sld [smem:[#allocation2 + $0x24]] }
 0x15d   : > { %v307_v22 = vpop.permute.xlu0 %306  ;;  %v311_v33 = vsel %vm273_vm2, %v309_v21, %v2686_v14  ;;  %v3048_v21 = vadd.s32 4294967295, %v211_v4 }
 0x15e   : > { %752 = vrot.lane.b32.xlu1 %v591_v58, %s5391_s25  ;;  %v310_v34 = vsel %vm273_vm2, %v307_v22, %v2674_v12  ;;  %v3050_v22 = vadd.s32 1, %v211_v4 }
 0x15f   : > { %750 = vrot.lane.b32.xlu0 %v590_v59, %s5391_s25  ;;  %5636 = sst [smem:[#allocation57_spill]] %s3090_s28  ;;  %s3253_s28 = sld [smem:[#allocation2 + $0x6]]  ;;  %vm221_vm5 = vcmp.ge.s32.totalorder %v3048_v21, 0  ;;  %vm222_vm6 = vcmp.lt.s32.totalorder %v3048_v21, 16 }
 0x160   : > { %v335_v29 = vpop.permute.xlu1 %334  ;;  %vm228_vm7 = vcmp.lt.s32.totalorder %v3050_v22, 16  ;;  %vm3424_vm8 = vmand %vm221_vm5, %vm222_vm6 }
 0x161   : > { %v333_v30 = vpop.permute.xlu0 %332  ;;  %v337_v37 = vsel %vm273_vm2, %v335_v29, %v2706_v20 }
 0x162   : > { %760 = vrot.lane.b32.xlu1 %v613_v62, %s5391_s25  ;;  %v336_v42 = vsel %vm273_vm2, %v333_v30, %v2712_v23  ;;  %v3004_v62 = vadd.s32 4294967295, %v2642_v1  ;;  %v437_v30 = vstv %s2979_s30  ;;  %5638 = sst [smem:[#allocation59_spill]] %s3102_s26  ;;  %s3119_s26 = sld [smem:[#allocation5 + $0x4]] }
 0x163   : > { %758 = vrot.lane.b32.xlu0 %v612_v63, %s5391_s25  ;;  %v209_v63 = vadd.s32 8, %v2642_v1  ;;  %s3141_s30 = sld [smem:[#allocation2 + $0x1b]] }
 0x164   : > { %v361_v38 = vpop.permute.xlu1 %360  ;;  %5615 = vst [vmem:[#allocation36_spill] sm:$0xff] %v3004_v62  ;;  %vm214_vm3 = vcmp.ge.s32.totalorder %v3004_v62, 0 }
 0x165   : > { %v359_v43 = vpop.permute.xlu0 %358  ;;  %v363_v44 = vsel %vm273_vm2, %v361_v38, %v2720_v24  ;;  %v424_v0 = vsel %vm214_vm3, %v2674_v12, 0.0  ;;  %v422_v16 = vsel %vm214_vm3, %v2680_v13, 0.0  ;;  %v461_v12 = vstv %s2977_s29  ;;  %5667 = sst [smem:[#allocation23_spill]] %s3253_s28  ;;  %s3255_s29 = sld [smem:[#allocation2 + $0x31]]  ;;  %vm3535_vm9 = vmand %vm214_vm3, %vm3424_vm8 }
 0x166   : > { %768 = vrot.lane.b32.xlu1 %v635_v8, %s5391_s25  ;;  %v362_v45 = vsel %vm273_vm2, %v359_v43, %v2724_v25  ;;  %v3026_v8 = vadd.s32 1, %v209_v63  ;;  %v3059_v13 = vmul.f32 %v443_v5, %v424_v0  ;;  %v426_v29 = vsel %vm214_vm3, %v2712_v23, 0.0  ;;  %s3381_s28 = sld [smem:[#allocation2 + $0x1a]]  ;;  %vm3708_vm10 = vmand %vm214_vm3, %vm228_vm7 }
 0x167   : > { %766 = vrot.lane.b32.xlu0 %v634_v9, %s5391_s25  ;;  %v473_v9 = vstv %s2973_s27  ;;  %s3082_s27 = sld [smem:[#allocation2 + $0x9]]  ;;  %v449_v23 = vstv %s2983_s5  ;;  %v5477_v38 = vstv %s2987_s7  ;;  %s3161_s5 = sld [smem:[#allocation5 + $0x5]] }
 0x168   : > { %v836_v46 = vpop.permute.xlu1 %835  ;;  %vm237_vm4 = vcmp.lt.s32.totalorder %v3026_v8, 16  ;;  %s5651_s7 = sld [smem:[#allocation51_spill]] }
 0x169   : > { %v834_v47 = vpop.permute.xlu0 %833  ;;  %v838_v50 = vsel %vm273_vm2, %v836_v46, %v2751_v28  ;;  %v978_v43 = vsel %vm237_vm4, %v2765_v32, 0.0  ;;  %v3108_v46 = vmul.f32 %v461_v12, %v422_v16  ;;  %5652 = sst [smem:[#allocation51_spill]] %s3197_s20  ;;  %s5694_s20 = sld [smem:[#allocation33_spill]]  ;;  %v5814_v62 = vstv %s3141_s30  ;;  %vm3805_vm11 = vmand %vm237_vm4, %vm3424_vm8 }
 0x16a   : > { %290 = vrot.lane.b32.xlu1 %v285_v26, %s5393_s24  ;;  %v837_v51 = vsel %vm273_vm2, %v834_v47, %v2757_v31  ;;  %v5471_v47 = vstv %s2995_s11  ;;  %s3309_s11 = sld [smem:[#allocation2 + $0x18]]  ;;  %vm3898_vm12 = vmand %vm237_vm4, %vm228_vm7 }
 0x16b   : > { %288 = vrot.lane.b32.xlu0 %v284_v27, %s5393_s24 }
 0x16c   : > { %v862_v48 = vpop.permute.xlu1 %861 }
 0x16d   : > { %v860_v49 = vpop.permute.xlu0 %859  ;;  %v864_v53 = vsel %vm273_vm2, %v862_v48, %v2765_v32  ;;  %5634 = sst [smem:[#allocation55_spill]] %s3082_s27  ;;  %v5470_v48 = vstv %s2997_s17  ;;  %s3187_s17 = sld [smem:[#allocation2 + $0xb]] }
 0x16e   : > { %316 = vrot.lane.b32.xlu1 %v311_v33, %s5393_s24  ;;  %v863_v55 = vsel %vm273_vm2, %v860_v49, %v2771_v35  ;;  %s3104_s27 = sld [smem:[#allocation2 + $0x12]]  ;;  %v3123_v49 = vmul.f32 %v437_v30, %v426_v29 }
 0x16f   : > { %314 = vrot.lane.b32.xlu0 %v310_v34, %s5393_s24  ;;  %s5657_s21 = sld [smem:[#allocation55_spill]] }
 0x170   : > { %v888_v52 = vpop.permute.xlu1 %887 }
 0x171   : > { %v886_v54 = vpop.permute.xlu0 %885  ;;  %v890_v56 = vsel %vm273_vm2, %v888_v52, %v2779_v36 }
 0x172   : > { %342 = vrot.lane.b32.xlu1 %v337_v37, %s5393_s24  ;;  %v889_v57 = vsel %vm273_vm2, %v886_v54, %v2785_v39 }
 0x173   : > { %340 = vrot.lane.b32.xlu0 %v336_v42, %s5393_s24  ;;  %5649 = sst [smem:[#allocation69_spill]] %s3187_s17  ;;  %s3205_s17 = sld [smem:[#allocation2 + $0x26]] }
 0x174   : > { %v914_v58 = vpop.permute.xlu1 %913  ;;  %5639 = sst [smem:[#allocation60_spill]] %s3104_s27  ;;  %s3265_s27 = sld [smem:[#allocation2 + $0x3c]] }
 0x175   : > { %v912_v59 = vpop.permute.xlu0 %911  ;;  %v916_v60 = vsel %vm273_vm2, %v914_v58, %v2793_v40  ;;  %s5670_s12 = sld [smem:[#allocation69_spill]] }
 0x176   : > { %368 = vrot.lane.b32.xlu1 %v363_v44, %s5393_s24  ;;  %v915_v61 = vsel %vm273_vm2, %v912_v59, %v2797_v41  ;;  %v3174_v59 = vsel %vm237_vm4, %v2793_v40, 0.0 }
 0x177   : > { %366 = vrot.lane.b32.xlu0 %v362_v45, %s5393_s24 }
 0x179   : > { %5655 = sst [smem:[#allocation52_spill]] %s3205_s17  ;;  %s3345_s17 = sld [smem:[#allocation2 + $0x3e]] }
 0x17a   : > { %480 = vrot.lane.b32.xlu1 %v285_v26, %s5391_s25  ;;  %v3063_v26 = vmul.f32 %v473_v9, %v424_v0  ;;  %5668 = sst [smem:[#allocation25_spill]] %s3265_s27  ;;  %s3379_s27 = sld [smem:[#allocation2 + $0x2c]] }
 0x17b   : > { %478 = vrot.lane.b32.xlu0 %v284_v27, %s5391_s25  ;;  %v3067_v27 = vmul.f32 %v431_v15, %v422_v16  ;;  %v3239_v16 = vmul.f32 %v461_v12, %v2692_v17 }
 0x17e   : > { %488 = vrot.lane.b32.xlu1 %v311_v33, %s5391_s25  ;;  %v455_v33 = vstv %s2981_s4  ;;  %s3293_s4 = sld [smem:[#allocation2 + $0x45]] }
 0x17f   : > { %486 = vrot.lane.b32.xlu0 %v310_v34, %s5391_s25  ;;  %v428_v34 = vsel %vm214_vm3, %v2724_v25, 0.0  ;;  %v976_v25 = vsel %vm237_vm4, %v2751_v28, 0.0  ;;  %v980_v28 = vsel %vm237_vm4, %v2779_v36, 0.0  ;;  %v3280_v63 = vmul.f32 %v455_v33, %v2706_v20 }
 0x180   : > { %v3131_v36 = vmul.f32 %v449_v23, %v428_v34  ;;  %v3169_v58 = vmul.f32 %v5470_v48, %v980_v28 }
 0x182   : > { %496 = vrot.lane.b32.xlu1 %v337_v37, %s5391_s25  ;;  %v467_v37 = vstv %s2985_s6  ;;  %s3159_s6 = sld [smem:[#allocation5 + $0x3]]  ;;  %5646 = vst [vmem:[#allocation67_spill] sm:$0xff] %v3169_v58 }
 0x183   : > { %494 = vrot.lane.b32.xlu0 %v336_v42, %s5391_s25  ;;  %v5476_v42 = vstv %s2989_s8  ;;  %s3189_s8 = sld [smem:[#allocation2 + $0x4]] }
 0x184   : > { %v3149_v54 = vmul.f32 %v5476_v42, %v976_v25  ;;  %5674 = sst [smem:[#allocation69_spill]] %s3293_s4  ;;  %s5689_s4 = sld [smem:[#allocation31_spill]] }
 0x186   : > { %504 = vrot.lane.b32.xlu1 %v363_v44, %s5391_s25  ;;  %v5475_v44 = vstv %s2991_s9  ;;  %5642 = vst [vmem:[#allocation63_spill] sm:$0xff] %v3149_v54  ;;  %s3179_s9 = sld [smem:[#allocation2 + $0x38]]  ;;  %v1020_v54 = vstv %s3319_s16  ;;  %s5716_s16 = sld [smem:[#allocation40_spill]] }
 0x187   : > { %502 = vrot.lane.b32.xlu0 %v362_v45, %s5391_s25  ;;  %v5472_v45 = vstv %s2993_s10  ;;  %s3177_s10 = sld [smem:[#allocation2 + $0x2]] }
 0x18a   : > { %843 = vrot.lane.b32.xlu1 %v838_v50, %s5393_s24  ;;  %v5701_v21 = vstv %s5689_s4  ;;  %s5714_s4 = sld [smem:[#allocation38_spill]] }
 0x18b   : > { %841 = vrot.lane.b32.xlu0 %v837_v51, %s5393_s24 }
 0x18c   : > { %5647 = sst [smem:[#allocation68_spill]] %s3179_s9  ;;  %s3207_s9 = sld [smem:[#allocation2 + $0x14]] }
 0x18d   : > { %s5669_s3 = sld [smem:[#allocation68_spill]] }
 0x18e   : > { %869 = vrot.lane.b32.xlu1 %v864_v53, %s5393_s24  ;;  %5673 = sst [smem:[#allocation68_spill]] %s3291_s19  ;;  %s5692_s19 = sld [smem:[#allocation32_spill]] }
 0x18f   : > { %867 = vrot.lane.b32.xlu0 %v863_v55, %s5393_s24 }
 0x192   : > { %895 = vrot.lane.b32.xlu1 %v890_v56, %s5393_s24  ;;  %5656 = sst [smem:[#allocation24_spill]] %s3207_s9  ;;  %s3395_s9 = sld [smem:[#allocation2 + $0x23]] }
 0x193   : > { %893 = vrot.lane.b32.xlu0 %v889_v57, %s5393_s24  ;;  %s5831_s30 = sld [smem:[#allocation24_spill]] }
 0x196   : > { %921 = vrot.lane.b32.xlu1 %v916_v60, %s5393_s24 }
 0x197   : > { %919 = vrot.lane.b32.xlu0 %v915_v61, %s5393_s24  ;;  %s3001_s24 = sld [smem:[#allocation2 + $0x39]] }
 0x19a   : > { %1033 = vrot.lane.b32.xlu1 %v838_v50, %s5391_s25  ;;  %v3127_v50 = vmul.f32 %v455_v33, %v426_v29  ;;  %v725_v29 = vstv %s3199_s0  ;;  %v3300_v33 = vmul.f32 %v449_v23, %v2720_v24  ;;  %s3317_s0 = sld [smem:[#allocation2 + $0x34]]  ;;  %v731_v23 = vstv %s3267_s2  ;;  %s5683_s2 = sld [smem:[#allocation29_spill]] }
 0x19b   : > { %1031 = vrot.lane.b32.xlu0 %v837_v51, %s5391_s25  ;;  %v3135_v51 = vmul.f32 %v467_v37, %v428_v34 }
 0x19d   : > { %5614 = sst [smem:[#allocation35_spill]] %s3001_s24  ;;  %s3241_s24 = sld [smem:[#allocation2 + $0x28]] }
 0x19e   : > { %1041 = vrot.lane.b32.xlu1 %v864_v53, %s5391_s25  ;;  %v3145_v53 = vmul.f32 %v5477_v38, %v976_v25  ;;  %v3225_v25 = vmul.f32 %v431_v15, %v2692_v17  ;;  %v3263_v15 = vmul.f32 %v473_v9, %v2686_v14  ;;  %v3275_v17 = vmul.f32 %v437_v30, %v2706_v20 }
 0x19f   : > { %1039 = vrot.lane.b32.xlu0 %v863_v55, %s5391_s25  ;;  %v3153_v55 = vmul.f32 %v5475_v44, %v978_v43  ;;  %v707_v30 = vstv %s3213_s14  ;;  %v737_v20 = vstv %s3215_s23  ;;  %s3333_s14 = sld [smem:[#allocation2 + $0x33]]  ;;  %s3343_s23 = sld [smem:[#allocation2 + $0x8]] }
 0x1a0   : > { %5641 = vst [vmem:[#allocation62_spill] sm:$0xff] %v3145_v53  ;;  %v3349_v44 = vmul.f32 %v2653_v3, %v707_v30  ;;  %v3368_v1 = vmul.f32 %v2650_v2, %v737_v20 }
 0x1a1   : > { %5643 = vst [vmem:[#allocation64_spill] sm:$0xff] %v3153_v55 }
 0x1a2   : > { %1049 = vrot.lane.b32.xlu1 %v890_v56, %s5391_s25  ;;  %v3157_v56 = vmul.f32 %v5472_v45, %v978_v43  ;;  %v3251_v43 = vmul.f32 %v443_v5, %v2686_v14  ;;  %v695_v14 = vstv %s3189_s8  ;;  %s3307_s8 = sld [smem:[#allocation2 + $0x2a]]  ;;  %5675 = vst [vmem:[#allocation70_spill] sm:$0xff] %v3349_v44  ;;  %5678 = vst [vmem:[#allocation73_spill] sm:$0xff] %v3368_v1 }
 0x1a3   : > { %1047 = vrot.lane.b32.xlu0 %v889_v57, %s5391_s25  ;;  %v3165_v57 = vmul.f32 %v5471_v47, %v980_v28  ;;  %v3313_v12 = vmul.f32 %v695_v14, %v2662_v7  ;;  %v3331_v28 = vmul.f32 %v725_v29, %v2659_v6  ;;  %v701_v45 = vstv %s3241_s24  ;;  %s3363_s24 = sld [smem:[#allocation2 + $0x47]] }
 0x1a4   : > { %5644 = vst [vmem:[#allocation65_spill] sm:$0xff] %v3157_v56  ;;  %v3358_v47 = vmul.f32 %v2650_v2, %v707_v30  ;;  %v3377_v30 = vmul.f32 %v2667_v10, %v701_v45  ;;  %v5695_v56 = vstv %s5683_s2  ;;  %s5724_s2 = sld [smem:[#allocation42_spill]] }
 0x1a5   : > { %5645 = vst [vmem:[#allocation66_spill] sm:$0xff] %v3165_v57  ;;  %v3416_v55 = vmul.f32 %v5695_v56, %v2757_v31  ;;  %v3457_v56 = vmul.f32 %v1020_v54, %v3174_v59 }
 0x1a6   : > { %1057 = vrot.lane.b32.xlu1 %v916_v60, %s5391_s25  ;;  %v3305_v60 = vmul.f32 %v467_v37, %v2720_v24  ;;  %v3325_v37 = vmul.f32 %v725_v29, %v2662_v7  ;;  %v719_v7 = vstv %s3243_s13  ;;  %v713_v29 = vstv %s3255_s29  ;;  %5677 = vst [vmem:[#allocation72_spill] sm:$0xff] %v3358_v47  ;;  %s3361_s13 = sld [smem:[#allocation2 + $0x11]]  ;;  %s5680_s29 = sld [smem:[#allocation28_spill]]  ;;  %5682 = vst [vmem:[#allocation76_spill] sm:$0xff] %v3377_v30 }
 0x1a7   : > { %1055 = vrot.lane.b32.xlu0 %v915_v61, %s5391_s25  ;;  %s2999_s25 = sld [smem:[#allocation2 + $0x3]]  ;;  %v3328_v61 = vmul.f32 %v695_v14, %v2659_v6  ;;  %v3352_v6 = vmul.f32 %v2653_v3, %v737_v20  ;;  %v3371_v3 = vmul.f32 %v2670_v11, %v701_v45  ;;  %v3374_v42 = vmul.f32 %v2670_v11, %v719_v7 }
 0x1a8   : > { %v3388_v58 = vmul.f32 %v2667_v10, %v719_v7  ;;  %v3391_v11 = vmul.f32 %v2698_v19, %v713_v29  ;;  %v3399_v45 = vmul.f32 %v2698_v19, %v731_v23  ;;  %v3402_v10 = vmul.f32 %v2695_v18, %v713_v29  ;;  %5696 = vst [vmem:[#allocation83_spill] sm:$0xff] %v3416_v55 }
 0x1a9   : > { %5676 = vst [vmem:[#allocation71_spill] sm:$0xff] %v3352_v6  ;;  %5679 = vst [vmem:[#allocation74_spill] sm:$0xff] %v3371_v3  ;;  %v3405_v7 = vmul.f32 %v2695_v18, %v731_v23  ;;  %v1002_v19 = vstv %s3317_s0  ;;  %s5715_s0 = sld [smem:[#allocation39_spill]]  ;;  %v5756_v47 = vstv %s5651_s7  ;;  %s5776_s7 = sld [smem:[#allocation50_spill]] }
 0x1aa   : > { %5681 = vst [vmem:[#allocation75_spill] sm:$0xff] %v3374_v42  ;;  %5684 = vst [vmem:[#allocation77_spill] sm:$0xff] %v3388_v58  ;;  %v5762_v6 = vmov %v5756_v47 }
 0x1ab   : > { %5685 = vst [vmem:[#allocation78_spill] sm:$0xff] %v3391_v11  ;;  %5687 = vst [vmem:[#allocation79_spill] sm:$0xff] %v3399_v45 }
 0x1ac   : > { %5688 = vst [vmem:[#allocation80_spill] sm:$0xff] %v3402_v10  ;;  %5690 = vst [vmem:[#allocation81_spill] sm:$0xff] %v3405_v7  ;;  %v5691_v38 = vstv %s5680_s29  ;;  %v3441_v7 = vmul.f32 %v5701_v21, %v2771_v35  ;;  %v5703_v10 = vstv %s5692_s19  ;;  %s5711_s19 = sld [smem:[#allocation35_spill]]  ;;  %v3470_v21 = vmul.f32 %v1020_v54, %v2797_v41  ;;  %s5722_s29 = sld [smem:[#allocation41_spill]] }
 0x1ad   : > { %5613 = sst [smem:[#allocation34_spill]] %s2999_s25  ;;  %s3227_s25 = sld [smem:[#allocation2 + $0x2f]]  ;;  %v3410_v20 = vmul.f32 %v5691_v38, %v2757_v31  ;;  %v3446_v45 = vmul.f32 %v5703_v10, %v2785_v39  ;;  %5708 = vst [vmem:[#allocation89_spill] sm:$0xff] %v3457_v56 }
 0x1ae   : > { %5702 = vst [vmem:[#allocation85_spill] sm:$0xff] %v3441_v7  ;;  %5712 = vst [vmem:[#allocation91_spill] sm:$0xff] %v3470_v21 }
 0x1af   : > { %5693 = vst [vmem:[#allocation82_spill] sm:$0xff] %v3410_v20  ;;  %5704 = vst [vmem:[#allocation86_spill] sm:$0xff] %v3446_v45  ;;  %v5705_v20 = vstv %s5694_s20  ;;  %s5713_s20 = sld [smem:[#allocation37_spill]] }
 0x1b0   : > { %v3451_v29 = vmul.f32 %v5705_v20, %v2785_v39 }
 0x1b2   : > { %5706 = vst [vmem:[#allocation87_spill] sm:$0xff] %v3451_v29  ;;  %v5739_v58 = vstv %s5722_s29  ;;  %s5760_s29 = sld [smem:[#allocation53_spill]] }
 0x1b3   : > { %5663 = sst [smem:[#allocation55_spill]] %s3227_s25  ;;  %v5744_v30 = vmov %v5739_v58 }
 0x1b4   : > { %s5686_s25 = sld [smem:[#allocation30_spill]] }
 0x1b5   : > { %v5721_v20 = vstv %s5713_s20  ;;  %s5743_s20 = sld [smem:[#allocation45_spill]] }
 0x1ba   : > { %v5699_v57 = vstv %s5686_s25  ;;  %s5709_s25 = sld [smem:[#allocation34_spill]] }
 0x1bb   : > { %v3434_v53 = vmul.f32 %v5699_v57, %v2771_v35  ;;  %v3454_v57 = vmul.f32 %v1002_v19, %v3174_v59  ;;  %v3460_v35 = vmul.f32 %v1002_v19, %v2797_v41 }
 0x1bc   : > { %v3115_v32 = vpop.permute.xlu1 %574 }
 0x1bd   : > { %v3137_v52 = vpop.permute.xlu0 %572  ;;  %5700 = vst [vmem:[#allocation84_spill] sm:$0xff] %v3434_v53  ;;  %5707 = vst [vmem:[#allocation88_spill] sm:$0xff] %v3454_v57  ;;  %v579_v10 = vsel %vm3424_vm8, %v3115_v32, 0.0  ;;  %v5718_v32 = vstv %s5711_s19  ;;  %s5729_s19 = sld [smem:[#allocation44_spill]] }
 0x1be   : > { %5710 = vst [vmem:[#allocation90_spill] sm:$0xff] %v3460_v35  ;;  %v578_v39 = vsel %vm3424_vm8, %v3137_v52, 0.0  ;;  %v3492_v56 = vmul.f32 %v5718_v32, %v579_v10  ;;  %v5720_v57 = vmov %v5718_v32 }
 0x1c0   : > { %v3184_v0 = vpop.permute.xlu1 %596  ;;  %v5717_v21 = vstv %s5709_s25  ;;  %s5728_s25 = sld [smem:[#allocation43_spill]] }
 0x1c1   : > { %v3191_v40 = vpop.permute.xlu0 %594  ;;  %v601_v59 = vsel %vm3424_vm8, %v3184_v0, 0.0  ;;  %v3488_v55 = vmul.f32 %v5717_v21, %v579_v10  ;;  %v5719_v38 = vmov %v5717_v21  ;;  %v5723_v21 = vstv %s5714_s4  ;;  %s5748_s4 = sld [smem:[#allocation46_spill]] }
 0x1c2   : > { %v600_v52 = vsel %vm3424_vm8, %v3191_v40, 0.0  ;;  %v3496_v35 = vmul.f32 %v5719_v38, %v578_v39  ;;  %v3507_v0 = vmul.f32 %v5721_v20, %v601_v59  ;;  %v3511_v29 = vmul.f32 %v5723_v21, %v601_v59 }
 0x1c3   : > { %v5725_v10 = vmov %v5721_v20 }
 0x1c4   : > { %v3217_v4 = vpop.permute.xlu1 %618  ;;  %v3518_v32 = vmul.f32 %v5725_v10, %v600_v52 }
 0x1c5   : > { %v3231_v34 = vpop.permute.xlu0 %616  ;;  %v623_v41 = vsel %vm3424_vm8, %v3217_v4, 0.0  ;;  %v3503_v4 = vmul.f32 %v5720_v57, %v578_v39  ;;  %v5727_v39 = vstv %s5715_s0  ;;  %s5753_s0 = sld [smem:[#allocation47_spill]] }
 0x1c6   : > { %v622_v40 = vsel %vm3424_vm8, %v3231_v34, 0.0  ;;  %v5726_v34 = vmov %v5723_v21  ;;  %v3526_v45 = vmul.f32 %v5727_v39, %v623_v41  ;;  %v5735_v10 = vmov %v5727_v39 }
 0x1c7   : > { %v3522_v57 = vmul.f32 %v5726_v34, %v600_v52  ;;  %v5733_v52 = vstv %s5716_s16  ;;  %v3545_v34 = vmul.f32 %v5735_v10, %v622_v40  ;;  %s5757_s16 = sld [smem:[#allocation48_spill]]  ;;  %v5764_v44 = vstv %s5748_s4  ;;  %s5787_s4 = sld [smem:[#allocation58_spill]] }
 0x1c8   : > { %v3269_v5 = vpop.permute.xlu1 %640  ;;  %v3541_v21 = vmul.f32 %v5733_v52, %v623_v41  ;;  %v5737_v53 = vmov %v5733_v52  ;;  %v5741_v52 = vstv %s5724_s2  ;;  %s5763_s2 = sld [smem:[#allocation54_spill]] }
 0x1c9   : > { %v3285_v9 = vpop.permute.xlu0 %638  ;;  %v645_v38 = vsel %vm3424_vm8, %v3269_v5, 0.0  ;;  %v5730_v5 = vmov 0  ;;  %5736 = vst [vmem:[#allocation94_spill] sm:$0xff] %v3545_v34  ;;  %v3555_v11 = vmul.f32 %v5737_v53, %v622_v40  ;;  %v5746_v3 = vmov %v5741_v52 }
 0x1ca   : > { %v644_v20 = vsel %vm3424_vm8, %v3285_v9, 0.0  ;;  %v5731_v5 = vsel %vm3535_vm9, 4294967295, %v5730_v5  ;;  %5734 = vst [vmem:[#allocation93_spill] sm:$0xff] %v3541_v21  ;;  %v3559_v41 = vmul.f32 %v5739_v58, %v645_v38  ;;  %v3563_v10 = vmul.f32 %v5741_v52, %v645_v38 }
 0x1cb   : > { %5732 = vst [vmem:[#allocation92_spill] sm:$0xff] %v5731_v5  ;;  %5738 = vst [vmem:[#allocation95_spill] sm:$0xff] %v3555_v11  ;;  %v3569_v42 = vmul.f32 %v5744_v30, %v644_v20  ;;  %v5749_v40 = vstv %s5728_s25  ;;  %s5767_s25 = sld [smem:[#allocation56_spill]]  ;;  %v5823_v21 = vstv %s5669_s3 }
 0x1cc   : > { %v3321_v24 = vpop.permute.xlu1 %744  ;;  %5740 = vst [vmem:[#allocation96_spill] sm:$0xff] %v3559_v41  ;;  %5742 = vst [vmem:[#allocation97_spill] sm:$0xff] %v3563_v10  ;;  %v5751_v52 = vmov %v5749_v40  ;;  %v5769_v10 = vmov %v5764_v44 }
 0x1cd   : > { %v3337_v48 = vpop.permute.xlu0 %742  ;;  %v749_v9 = vsel %vm228_vm7, %v3321_v24, 0.0  ;;  %5745 = vst [vmem:[#allocation98_spill] sm:$0xff] %v3569_v42 }
 0x1ce   : > { %v748_v39 = vsel %vm228_vm7, %v3337_v48, 0.0  ;;  %v3573_v48 = vmul.f32 %v5746_v3, %v644_v20  ;;  %v3582_v38 = vmul.f32 %v5749_v40, %v749_v9 }
 0x1cf   : > { %v3590_v3 = vmul.f32 %v5751_v52, %v748_v39 }
 0x1d0   : > { %v3365_v14 = vpop.permute.xlu1 %752  ;;  %5747 = vst [vmem:[#allocation99_spill] sm:$0xff] %v3573_v48  ;;  %v5758_v48 = vstv %s5743_s20  ;;  %s5783_s20 = sld [smem:[#allocation59_spill]] }
 0x1d1   : > { %v3383_v2 = vpop.permute.xlu0 %750  ;;  %v757_v53 = vsel %vm228_vm7, %v3365_v14, 0.0  ;;  %5752 = vst [vmem:[#allocation100_spill] sm:$0xff] %v3590_v3  ;;  %v5786_v41 = vstv %s5767_s25 }
 0x1d2   : > { %v756_v14 = vsel %vm228_vm7, %v3383_v2, 0.0  ;;  %v3607_v42 = vmul.f32 %v5758_v48, %v757_v53 }
 0x1d4   : > { %v761_v23 = vpop.permute.xlu1 %760  ;;  %5759 = vst [vmem:[#allocation102_spill] sm:$0xff] %v3607_v42 }
 0x1d5   : > { %v759_v31 = vpop.permute.xlu0 %758  ;;  %v765_v40 = vsel %vm228_vm7, %v761_v23, 0.0 }
 0x1d6   : > { %v764_v2 = vsel %vm228_vm7, %v759_v31, 0.0  ;;  %v5772_v31 = vstv %s5753_s0  ;;  %s5794_s0 = sld [smem:[#allocation60_spill]] }
 0x1d8   : > { %v769_v19 = vpop.permute.xlu1 %768 }
 0x1d9   : > { %v767_v54 = vpop.permute.xlu0 %766 }
 0x1dc   : > { %v291_v59 = vpop.permute.xlu1 %290 }
 0x1dd   : > { %v289_v7 = vpop.permute.xlu0 %288  ;;  %v295_v24 = vsel %vm3424_vm8, %v291_v59, 0.0  ;;  %v5750_v59 = vstv %s5729_s19  ;;  %s5773_s19 = sld [smem:[#allocation49_spill]] }
 0x1de   : > { %v294_v58 = vsel %vm3535_vm9, %v289_v7, 0.0  ;;  %v3586_v30 = vmul.f32 %v5750_v59, %v749_v9  ;;  %v5754_v1 = vmov %v5750_v59  ;;  %v377_v9 = vmul.f32 %v5756_v47, %v295_v24 }
 0x1df   : > { %v3597_v7 = vmul.f32 %v5754_v1, %v748_v39  ;;  %v5761_v1 = vstv %s5653_s1  ;;  %v376_v23 = vmul.f32 %v5762_v6, %v294_v58  ;;  %v3617_v47 = vmul.f32 %v5764_v44, %v757_v53  ;;  %s5778_s1 = sld [smem:[#allocation57_spill]] }
 0x1e0   : > { %v317_v20 = vpop.permute.xlu1 %316  ;;  %v407_v39 = vmul.f32 %v5761_v1, %v295_v24  ;;  %v5771_v42 = vmov %v5761_v1  ;;  %v3631_v24 = vmul.f32 %v5772_v31, %v765_v40  ;;  %v773_v6 = vsel %vm228_vm7, %v769_v19, 0.0 }
 0x1e1   : > { %5755 = vst [vmem:[#allocation101_spill] sm:$0xff] %v3597_v7  ;;  %v321_v59 = vsel %vm3424_vm8, %v317_v20, 0.0  ;;  %v315_v52 = vpop.permute.xlu0 %314  ;;  %5765 = vst [vmem:[#allocation103_spill] sm:$0xff] %v3617_v47  ;;  %v5766_v7 = vmov %v5758_v48  ;;  %v3625_v48 = vmul.f32 %v5769_v10, %v756_v14  ;;  %v406_v3 = vmul.f32 %v5771_v42, %v294_v58 }
 0x1e2   : > { %v3621_v20 = vmul.f32 %v5766_v7, %v756_v14  ;;  %5774 = vst [vmem:[#allocation106_spill] sm:$0xff] %v3631_v24  ;;  %v5775_v44 = vstv %s5657_s21  ;;  %v320_v7 = vsel %vm3535_vm9, %v315_v52, 0.0  ;;  %v5777_v14 = vstv %s5757_s16  ;;  %s5859_s16 = sld [smem:[#allocation69_spill]] }
 0x1e3   : > { %5770 = vst [vmem:[#allocation105_spill] sm:$0xff] %v3625_v48  ;;  %v389_v53 = vmul.f32 %v5775_v44, %v321_v59  ;;  %v3641_v42 = vmul.f32 %v5777_v14, %v765_v40  ;;  %v5780_v58 = vmov %v5772_v31  ;;  %v772_v19 = vsel %vm228_vm7, %v767_v54, 0.0 }
 0x1e4   : > { %5768 = vst [vmem:[#allocation104_spill] sm:$0xff] %v3621_v20  ;;  %v343_v10 = vpop.permute.xlu1 %342  ;;  %v3645_v1 = vmul.f32 %v5780_v58, %v764_v2  ;;  %v5782_v31 = vstv %s5760_s29  ;;  %v5784_v48 = vstv %s5763_s2  ;;  %v419_v11 = vmul.f32 %v5786_v41, %v321_v59  ;;  %s4330_s29 = sld [smem:[#allocation2 + $0x6d]]  ;;  %s4332_s2 = sld [smem:[#allocation2 + $0x52]] }
 0x1e5   : > { %5779 = vst [vmem:[#allocation107_spill] sm:$0xff] %v3641_v42  ;;  %v379_v44 = vadd.f32 %v377_v9, %v5782_v31  ;;  %v341_v24 = vpop.permute.xlu0 %340  ;;  %v409_v52 = vadd.f32 %v407_v39, %v5784_v48  ;;  %v5785_v20 = vmov %v5782_v31  ;;  %v347_v40 = vsel %vm3424_vm8, %v343_v10, 0.0 }
 0x1e6   : > { %5781 = vst [vmem:[#allocation108_spill] sm:$0xff] %v3645_v1  ;;  %v378_v47 = vadd.f32 %v376_v23, %v5785_v20  ;;  %v3661_v58 = vmul.f32 %v5777_v14, %v764_v2  ;;  %v5789_v1 = vstv %s5773_s19  ;;  %v5791_v42 = vmov %v5784_v48  ;;  %s4336_s19 = sld [smem:[#allocation2 + $0x64]] }
 0x1e7   : > { %v3665_v54 = vmul.f32 %v5789_v1, %v773_v6  ;;  %v408_v9 = vadd.f32 %v406_v3, %v5791_v42  ;;  %v5792_v31 = vstv %s5657_s21  ;;  %v5793_v39 = vstv %s5776_s7  ;;  %s5808_s21 = sld [smem:[#allocation61_spill]] }
 0x1e8   : > { %5788 = vst [vmem:[#allocation109_spill] sm:$0xff] %v3661_v58  ;;  %v388_v34 = vmul.f32 %v5792_v31, %v320_v7  ;;  %v3673_v23 = vmul.f32 %v5793_v39, %v773_v6  ;;  %v5796_v41 = vmov %v5789_v1  ;;  %v5798_v20 = vstv %s5778_s1  ;;  %v369_v14 = vpop.permute.xlu1 %368  ;;  %s4338_s7 = sld [smem:[#allocation2 + $0x70]] }
 0x1e9   : > { %5790 = vst [vmem:[#allocation110_spill] sm:$0xff] %v3665_v54  ;;  %v3677_v59 = vmul.f32 %v5796_v41, %v772_v19  ;;  %v391_v48 = vadd.f32 %v389_v53, %v5798_v20  ;;  %v5799_v10 = vstv %s5767_s25  ;;  %v5800_v1 = vmov %v5793_v39  ;;  %v367_v31 = vpop.permute.xlu0 %366  ;;  %s4334_s25 = sld [smem:[#allocation2 + $0x7f]] }
 0x1ea   : > { %5795 = vst [vmem:[#allocation111_spill] sm:$0xff] %v3673_v23  ;;  %v418_v2 = vmul.f32 %v5799_v10, %v320_v7  ;;  %v3685_v54 = vmul.f32 %v5800_v1, %v772_v19  ;;  %v5802_v3 = vstv %s5783_s20  ;;  %v346_v6 = vsel %vm3535_vm9, %v341_v24, 0.0 }
 0x1eb   : > { %5797 = vst [vmem:[#allocation112_spill] sm:$0xff] %v3677_v59  ;;  %v383_v42 = vmul.f32 %v5802_v3, %v347_v40  ;;  %v435_v39 = vadd.f32 %v3225_v25, %v379_v44  ;;  %v5803_v41 = vstv %s5787_s4  ;;  %v373_v7 = vsel %vm3424_vm8, %v369_v14, 0.0  ;;  %s4344_s4 = sld [smem:[#allocation2 + $0x7c]] }
 0x1ec   : > { %5801 = vst [vmem:[#allocation113_spill] sm:$0xff] %v3685_v54  ;;  %v421_v53 = vadd.f32 %v419_v11, %v5803_v41  ;;  %v465_v19 = vadd.f32 %v3239_v16, %v409_v52  ;;  %v434_v20 = vadd.f32 %v3067_v27, %v378_v47  ;;  %v5804_v10 = vstv %s5778_s1  ;;  %v481_v14 = vpop.permute.xlu1 %480  ;;  %s4340_s1 = sld [smem:[#allocation2 + $0x55]] }
 0x1ed   : > { %v390_v1 = vadd.f32 %v388_v34, %v5804_v10  ;;  %v5805_v3 = vstv %s5794_s0  ;;  %v372_v25 = vsel %vm3535_vm9, %v367_v31, 0.0  ;;  %v464_v27 = vadd.f32 %v3108_v46, %v408_v9  ;;  %v479_v9 = vpop.permute.xlu0 %478  ;;  %s4346_s0 = sld [smem:[#allocation2 + $0x82]] }
 0x1ee   : > { %v401_v24 = vmul.f32 %v5805_v3, %v347_v40  ;;  %v5809_v16 = vmov %v5803_v41  ;;  %v5810_v47 = vstv %s5783_s20  ;;  %v5811_v52 = vmov %v5805_v3  ;;  %s4342_s20 = sld [smem:[#allocation2 + $0x4f]] }
 0x1ef   : > { %v420_v34 = vadd.f32 %v418_v2, %v5809_v16  ;;  %v382_v44 = vmul.f32 %v5810_v47, %v346_v6  ;;  %v400_v40 = vmul.f32 %v5811_v52, %v346_v6  ;;  %v447_v31 = vadd.f32 %v3251_v43, %v391_v48 }
 0x1f0   : > { %v5812_v41 = vstv %s3119_s26  ;;  %v5813_v3 = vstv %s3139_s15  ;;  %v413_v54 = vmul.f32 %v5814_v62, %v373_v7  ;;  %v485_v46 = vsel %vm228_vm7, %v481_v14, 0.0  ;;  %v489_v58 = vpop.permute.xlu1 %488  ;;  %s5822_s15 = sld [smem:[#allocation51_spill]] }
 0x1f1   : > { %v385_v10 = vadd.f32 %v383_v42, %v5812_v41  ;;  %v395_v5 = vmul.f32 %v5813_v3, %v373_v7  ;;  %v5815_v2 = vmov %v5813_v3  ;;  %v5816_v47 = vstv %s3177_s10  ;;  %s5847_s10 = sld [smem:[#allocation25_spill]] }
 0x1f2   : > { %v394_v16 = vmul.f32 %v5815_v2, %v372_v25  ;;  %v513_v6 = vmul.f32 %v5816_v47, %v485_v46  ;;  %v5817_v52 = vstv %s5669_s3  ;;  %v484_v43 = vsel %vm3708_vm10, %v479_v9, 0.0  ;;  %s5857_s3 = sld [smem:[#allocation68_spill]] }
 0x1f3   : > { %v543_v59 = vmul.f32 %v5817_v52, %v485_v46  ;;  %v5818_v48 = vstv %s5808_s21  ;;  %v412_v7 = vmul.f32 %v5814_v62, %v372_v25  ;;  %v5819_v41 = vmov %v5816_v47  ;;  %s4348_s21 = sld [smem:[#allocation2 + $0x67]] }
 0x1f4   : > { %v403_v42 = vadd.f32 %v401_v24, %v5818_v48  ;;  %v512_v14 = vmul.f32 %v5819_v41, %v484_v43  ;;  %v477_v3 = vadd.f32 %v3263_v15, %v421_v53  ;;  %v5820_v2 = vstv %s3119_s26  ;;  %v487_v41 = vpop.permute.xlu0 %486  ;;  %s5830_s26 = sld [smem:[#allocation52_spill]] }
 0x1f5   : > { %v384_v23 = vadd.f32 %v382_v44, %v5820_v2  ;;  %v515_v47 = vadd.f32 %v513_v6, %v435_v39  ;;  %v446_v46 = vadd.f32 %v3059_v13, %v390_v1  ;;  %v476_v9 = vadd.f32 %v3063_v26, %v420_v34 }
 0x1f6   : > { %v5821_v52 = vmov %v5818_v48  ;;  %v545_v48 = vadd.f32 %v543_v59, %v465_v19  ;;  %v542_v25 = vmul.f32 %v5823_v21, %v484_v43  ;;  %v493_v62 = vsel %vm228_vm7, %v489_v58, 0.0  ;;  %v497_v43 = vpop.permute.xlu1 %496 }
 0x1f7   : > { %v402_v24 = vadd.f32 %v400_v40, %v5821_v52  ;;  %v5824_v15 = vstv %s3161_s5  ;;  %v5825_v44 = vstv %s3159_s6  ;;  %v441_v13 = vadd.f32 %v3275_v17, %v385_v10  ;;  %s5834_s5 = sld [smem:[#allocation55_spill]]  ;;  %s5845_s6 = sld [smem:[#allocation23_spill]] }
 0x1f8   : > { %v397_v53 = vadd.f32 %v395_v5, %v5824_v15  ;;  %v415_v39 = vadd.f32 %v413_v54, %v5825_v44  ;;  %v5826_v6 = vmov %v5824_v15  ;;  %v5827_v26 = vmov %v5825_v44 }
 0x1f9   : > { %v396_v2 = vadd.f32 %v394_v16, %v5826_v6  ;;  %v414_v1 = vadd.f32 %v412_v7, %v5827_v26  ;;  %v514_v34 = vadd.f32 %v512_v14, %v434_v20  ;;  %v492_v59 = vsel %vm3708_vm10, %v487_v41, 0.0 }
 0x1fa   : > { %v459_v21 = vadd.f32 %v3280_v63, %v403_v42  ;;  %v651_v58 = vadd.f32 %v3488_v55, %v515_v47  ;;  %v5828_v19 = vstv %s5670_s12  ;;  %v5829_v40 = vstv %s5822_s15  ;;  %v495_v63 = vpop.permute.xlu0 %494  ;;  %s5835_s12 = sld [smem:[#allocation22_spill]]  ;;  %s4350_s15 = sld [smem:[#allocation2 + $0x61]] }
 0x1fb   : > { %v525_v5 = vmul.f32 %v5828_v19, %v493_v62  ;;  %v555_v54 = vmul.f32 %v5829_v40, %v493_v62  ;;  %v440_v16 = vadd.f32 %v3123_v49, %v384_v23  ;;  %v681_v17 = vadd.f32 %v3492_v56, %v545_v48 }
 0x1fc   : > { %v544_v10 = vadd.f32 %v542_v25, %v464_v27  ;;  %v501_v20 = vsel %vm228_vm7, %v497_v43, 0.0  ;;  %v458_v7 = vadd.f32 %v3127_v50, %v402_v24  ;;  %v5832_v42 = vmov %v5828_v19 }
 0x1fd   : > { %v524_v55 = vmul.f32 %v5832_v42, %v492_v59  ;;  %v453_v14 = vadd.f32 %v3300_v33, %v397_v53  ;;  %v471_v47 = vadd.f32 %v3305_v60, %v415_v39  ;;  %v452_v52 = vadd.f32 %v3131_v36, %v396_v2  ;;  %v505_v60 = vpop.permute.xlu1 %504 }
 0x1fe   : > { %v650_v49 = vadd.f32 %v3496_v35, %v514_v34  ;;  %v5833_v56 = vmov %v5829_v40  ;;  %v500_v50 = vsel %vm3708_vm10, %v495_v63, 0.0  ;;  %v470_v27 = vadd.f32 %v3135_v51, %v414_v1  ;;  %v503_v53 = vpop.permute.xlu0 %502 }
 0x1ff   : > { %v554_v23 = vmul.f32 %v5833_v56, %v492_v59  ;;  %v527_v24 = vadd.f32 %v525_v5, %v447_v31  ;;  %v557_v48 = vadd.f32 %v555_v54, %v477_v3  ;;  %v5836_v33 = vstv %s5830_s26  ;;  %s4352_s26 = sld [smem:[#allocation2 + $0x8e]] }
 0x200   : > { %v519_v25 = vmul.f32 %v5836_v33, %v501_v20  ;;  %v699_v36 = vadd.f32 %v3313_v12, %v651_v58  ;;  %v680_v62 = vadd.f32 %v3503_v4, %v544_v10  ;;  %v5837_v35 = vstv %s5831_s30  ;;  %s4354_s30 = sld [smem:[#allocation2 + $0x73]] }
 0x201   : > { %v537_v41 = vmul.f32 %v5837_v35, %v501_v20  ;;  %v509_v15 = vsel %vm228_vm7, %v505_v60, 0.0  ;;  %v729_v44 = vadd.f32 %v3325_v37, %v681_v17  ;;  %v526_v51 = vadd.f32 %v524_v55, %v446_v46  ;;  %v844_v5 = vpop.permute.xlu1 %843 }
 0x202   : > { %v5838_v31 = vmov %v5836_v33  ;;  %v5839_v39 = vmov %v5837_v35  ;;  %v5840_v2 = vstv %s5834_s5  ;;  %v5841_v12 = vmov 0  ;;  %v842_v63 = vpop.permute.xlu0 %841  ;;  %s4356_s5 = sld [smem:[#allocation2 + $0x58]] }
 0x203   : > { %v518_v3 = vmul.f32 %v5838_v31, %v500_v50  ;;  %v536_v6 = vmul.f32 %v5839_v39, %v500_v50  ;;  %v531_v26 = vmul.f32 %v5840_v2, %v509_v15  ;;  %v5842_v12 = vsel %vm3805_vm11, 4294967295, %v5841_v12 }
 0x204   : > { %5843 = vst [vmem:[#allocation114_spill] sm:$0xff] %v5842_v12  ;;  %v556_v4 = vadd.f32 %v554_v23, %v476_v9  ;;  %v5844_v1 = vstv %s5835_s12  ;;  %v508_v46 = vsel %vm3708_vm10, %v503_v53, 0.0  ;;  %v698_v34 = vadd.f32 %v3328_v61, %v650_v49  ;;  %s4358_s12 = sld [smem:[#allocation2 + $0x85]] }
 0x205   : > { %v549_v37 = vmul.f32 %v5844_v1, %v509_v15  ;;  %v663_v59 = vadd.f32 %v3507_v0, %v527_v24  ;;  %v693_v58 = vadd.f32 %v3511_v29, %v557_v48  ;;  %v521_v19 = vadd.f32 %v519_v25, %v441_v13  ;;  %v5853_v25 = vld [vmem:[#allocation94_spill] sm:$0xff]  ;;  %v5858_v15 = vld [vmem:[#allocation97_spill] sm:$0xff] }
 0x206   : > { %v779_v40 = vadd.f32 %v3582_v38, %v699_v36  ;;  %v539_v54 = vadd.f32 %v537_v41, %v459_v21  ;;  %v5846_v43 = vmov %v5840_v2  ;;  %v5848_v17 = vmov %v5844_v1  ;;  %v5854_v36 = vld [vmem:[#allocation95_spill] sm:$0xff]  ;;  %v5856_v41 = vld [vmem:[#allocation100_spill] sm:$0xff] }
 0x207   : > { %v530_v9 = vmul.f32 %v5846_v43, %v508_v46  ;;  %v548_v10 = vmul.f32 %v5848_v17, %v508_v46  ;;  %v848_v20 = vsel %vm3805_vm11, %v844_v5, 0.0  ;;  %v662_v61 = vadd.f32 %v3518_v32, %v526_v51 }
 0x208   : > { %v520_v0 = vadd.f32 %v518_v3, %v440_v16  ;;  %v538_v29 = vadd.f32 %v536_v6, %v458_v7  ;;  %v533_v13 = vadd.f32 %v531_v26, %v453_v14  ;;  %v692_v42 = vadd.f32 %v3522_v57, %v556_v4  ;;  %v870_v16 = vpop.permute.xlu1 %869  ;;  %v5851_v7 = vld [vmem:[#allocation93_spill] sm:$0xff]  ;;  %v5862_v6 = vld [vmem:[#allocation70_spill] sm:$0xff]  ;;  %v5863_v26 = vld [vmem:[#allocation71_spill] sm:$0xff] }
 0x209   : > { %v551_v38 = vadd.f32 %v549_v37, %v471_v47  ;;  %v728_v21 = vadd.f32 %v3331_v28, %v680_v62  ;;  %v847_v55 = vsel %vm3424_vm8, %v842_v63, 0.0  ;;  %v657_v49 = vadd.f32 %v3526_v45, %v521_v19  ;;  %v868_v28 = vpop.permute.xlu0 %867  ;;  %v5855_v45 = vld [vmem:[#allocation96_spill] sm:$0xff]  ;;  %v5864_v37 = vld [vmem:[#allocation98_spill] sm:$0xff] }
 0x20a   : > { %v809_v56 = vadd.f32 %v3586_v30, %v729_v44  ;;  %v5849_v23 = vstv %s5845_s6  ;;  %v5850_v32 = vstv %s5847_s10  ;;  %v675_v14 = vadd.f32 %v5851_v7, %v539_v54  ;;  %v5860_v44 = vld [vmem:[#allocation101_spill] sm:$0xff]  ;;  %s4360_s6 = sld [smem:[#allocation2 + $0x6a]]  ;;  %s4362_s10 = sld [smem:[#allocation2 + $0x4b]] }
 0x20b   : > { %v930_v50 = vmul.f32 %v5849_v23, %v848_v20  ;;  %v960_v24 = vmul.f32 %v5850_v32, %v848_v20  ;;  %v532_v48 = vadd.f32 %v530_v9, %v452_v52  ;;  %v550_v57 = vadd.f32 %v548_v10, %v470_v27 }
 0x20c   : > { %v5852_v47 = vmov %v5849_v23  ;;  %v656_v60 = vadd.f32 %v5853_v25, %v520_v0  ;;  %v674_v62 = vadd.f32 %v5854_v36, %v538_v29  ;;  %v669_v35 = vadd.f32 %v5855_v45, %v533_v13  ;;  %v896_v1 = vpop.permute.xlu1 %895  ;;  %v5869_v0 = vld [vmem:[#allocation73_spill] sm:$0xff]  ;;  %v5870_v13 = vld [vmem:[#allocation74_spill] sm:$0xff] }
 0x20d   : > { %v929_v33 = vmul.f32 %v5852_v47, %v847_v55  ;;  %v778_v30 = vadd.f32 %v5856_v41, %v698_v34  ;;  %v687_v53 = vadd.f32 %v5858_v15, %v551_v38  ;;  %v808_v51 = vadd.f32 %v5860_v44, %v728_v21  ;;  %v5865_v34 = vld [vmem:[#allocation99_spill] sm:$0xff]  ;;  %v5879_v41 = vld [vmem:[#allocation104_spill] sm:$0xff]  ;;  %v5880_v15 = vld [vmem:[#allocation77_spill] sm:$0xff] }
 0x20e   : > { %v5861_v31 = vmov %v5850_v32  ;;  %v874_v27 = vsel %vm3805_vm11, %v870_v16, 0.0  ;;  %v932_v3 = vadd.f32 %v930_v50, %v779_v40  ;;  %v3847_v39 = vadd.f32 %v960_v24, %v809_v56  ;;  %v894_v40 = vpop.permute.xlu0 %893  ;;  %v5871_v21 = vld [vmem:[#allocation75_spill] sm:$0xff]  ;;  %v5872_v56 = vld [vmem:[#allocation102_spill] sm:$0xff] }
 0x20f   : > { %v959_v52 = vmul.f32 %v5861_v31, %v847_v55  ;;  %v711_v2 = vadd.f32 %v5862_v6, %v663_v59  ;;  %v741_v4 = vadd.f32 %v5863_v26, %v693_v58  ;;  %v668_v46 = vadd.f32 %v5864_v37, %v532_v48  ;;  %v5868_v58 = vld [vmem:[#allocation72_spill] sm:$0xff]  ;;  %v5873_v50 = vld [vmem:[#allocation103_spill] sm:$0xff] }
 0x210   : > { %v686_v19 = vadd.f32 %v5865_v34, %v550_v57  ;;  %v3853_v5 = vadd.f32 %v929_v33, %v778_v30  ;;  %v873_v54 = vsel %vm3424_vm8, %v868_v28, 0.0  ;;  %v5866_v43 = vstv %s5857_s3  ;;  %v922_v7 = vpop.permute.xlu1 %921  ;;  %v5878_v28 = vld [vmem:[#allocation76_spill] sm:$0xff]  ;;  %v5883_v6 = vld [vmem:[#allocation107_spill] sm:$0xff]  ;;  %5948 = sst [smem:[#allocation26_spill]] %s4362_s10  ;;  %s4364_s3 = sld [smem:[#allocation2 + $0x78]] }
 0x211   : > { %v942_v9 = vmul.f32 %v5866_v43, %v874_v27  ;;  %v5867_v59 = vstv %s5859_s16  ;;  %v710_v10 = vadd.f32 %v5868_v58, %v662_v61  ;;  %v900_v20 = vsel %vm3805_vm11, %v896_v1, 0.0  ;;  %v5890_v58 = vld [vmem:[#allocation108_spill] sm:$0xff]  ;;  %s4368_s16 = sld [smem:[#allocation2 + $0x6f]]  ;;  %s4752_s10 = sld [smem:[#allocation2 + $0x7d]] }
 0x212   : > { %v972_v17 = vmul.f32 %v5867_v59, %v874_v27  ;;  %v3864_v63 = vadd.f32 %v959_v52, %v808_v51  ;;  %v740_v29 = vadd.f32 %v5869_v0, %v692_v42  ;;  %v705_v38 = vadd.f32 %v5870_v13, %v657_v49  ;;  %v920_v25 = vpop.permute.xlu0 %919  ;;  %v5881_v51 = vld [vmem:[#allocation105_spill] sm:$0xff]  ;;  %v5882_v52 = vld [vmem:[#allocation106_spill] sm:$0xff] }
 0x213   : > { %v723_v55 = vadd.f32 %v5871_v21, %v675_v14  ;;  %v791_v23 = vadd.f32 %v5872_v56, %v711_v2  ;;  %v821_v32 = vadd.f32 %v5873_v50, %v741_v4  ;;  %v5874_v24 = vmov %v5866_v43 }
 0x214   : > { %v941_v16 = vmul.f32 %v5874_v24, %v873_v54  ;;  %v899_v61 = vsel %vm3424_vm8, %v894_v40, 0.0  ;;  %v5875_v48 = vmov %v5867_v59  ;;  %v5876_v47 = vstv %s3307_s8  ;;  %v1034_v43 = vpop.permute.xlu1 %1033  ;;  %s4316_s8 = sld [smem:[#allocation2 + $0x4c]] }
 0x215   : > { %v971_v57 = vmul.f32 %v5875_v48, %v873_v54  ;;  %v936_v42 = vmul.f32 %v5876_v47, %v900_v20  ;;  %v5877_v33 = vstv %s3309_s11  ;;  %v704_v14 = vadd.f32 %v5878_v28, %v656_v60  ;;  %v5886_v60 = vld [vmem:[#allocation78_spill] sm:$0xff]  ;;  %s4318_s11 = sld [smem:[#allocation2 + $0x76]] }
 0x216   : > { %v954_v49 = vmul.f32 %v5877_v33, %v900_v20  ;;  %v944_v36 = vadd.f32 %v942_v9, %v791_v23  ;;  %v974_v45 = vadd.f32 %v972_v17, %v821_v32  ;;  %v790_v30 = vadd.f32 %v5879_v41, %v710_v10  ;;  %v1032_v10 = vpop.permute.xlu0 %1031  ;;  %v5891_v20 = vld [vmem:[#allocation109_spill] sm:$0xff]  ;;  %5949 = sst [smem:[#allocation27_spill]] %s4364_s3 }
 0x217   : > { %v722_v44 = vadd.f32 %v5880_v15, %v674_v62  ;;  %v820_v31 = vadd.f32 %v5881_v51, %v740_v29  ;;  %v785_v27 = vadd.f32 %v5882_v52, %v705_v38  ;;  %v803_v2 = vadd.f32 %v5883_v6, %v723_v55  ;;  %v5892_v29 = vld [vmem:[#allocation79_spill] sm:$0xff]  ;;  %v5893_v38 = vld [vmem:[#allocation80_spill] sm:$0xff]  ;;  %v5895_v32 = vld [vmem:[#allocation81_spill] sm:$0xff]  ;;  %5950 = sst [smem:[#allocation28_spill]] %s4368_s16  ;;  %s4776_s16 = sld [smem:[#allocation2 + $0x86]] }
 0x218   : > { %v5884_v26 = vmov %v5876_v47  ;;  %v943_v1 = vadd.f32 %v941_v16, %v790_v30  ;;  %v5885_v37 = vmov %v5877_v33  ;;  %v717_v54 = vadd.f32 %v5886_v60, %v669_v35  ;;  %v5902_v15 = vld [vmem:[#allocation111_spill] sm:$0xff]  ;;  %v5903_v51 = vld [vmem:[#allocation112_spill] sm:$0xff]  ;;  %v5907_v60 = vld [vmem:[#allocation82_spill] sm:$0xff] }
 0x219   : > { %v935_v4 = vmul.f32 %v5884_v26, %v899_v61  ;;  %v953_v34 = vmul.f32 %v5885_v37, %v899_v61  ;;  %v926_v40 = vsel %vm3805_vm11, %v922_v7, 0.0  ;;  %v5887_v62 = vmov 0  ;;  %v5896_v7 = vld [vmem:[#allocation110_spill] sm:$0xff] }
 0x21a   : > { %v5888_v62 = vsel %vm3898_vm12, 4294967295, %v5887_v62  ;;  %v973_v9 = vadd.f32 %v971_v57, %v820_v31  ;;  %v938_v59 = vadd.f32 %v936_v42, %v785_v27  ;;  %v956_v17 = vadd.f32 %v954_v49, %v803_v2  ;;  %v1042_v42 = vpop.permute.xlu1 %1041  ;;  %v1040_v30 = vpop.permute.xlu0 %1039 }
 0x21b   : > { %5889 = vst [vmem:[#allocation93_spill] sm:$0xff] %v5888_v62  ;;  %v784_v35 = vadd.f32 %v5890_v58, %v704_v14  ;;  %v802_v0 = vadd.f32 %v5891_v20, %v722_v44  ;;  %v735_v13 = vadd.f32 %v5892_v29, %v687_v53  ;;  %v716_v21 = vadd.f32 %v5893_v38, %v668_v46 }
 0x21c   : > { %v925_v55 = vsel %vm3424_vm8, %v920_v25, 0.0  ;;  %v5894_v23 = vstv %s3333_s14  ;;  %v734_v24 = vadd.f32 %v5895_v32, %v686_v19  ;;  %v1038_v16 = vsel %vm3898_vm12, %v1034_v43, 0.0  ;;  %v5901_v25 = vld [vmem:[#allocation62_spill] sm:$0xff]  ;;  %v5912_v32 = vld [vmem:[#allocation65_spill] sm:$0xff]  ;;  %s4320_s14 = sld [smem:[#allocation2 + $0x5b]] }
 0x21d   : > { %v937_v56 = vadd.f32 %v935_v4, %v784_v35  ;;  %v948_v50 = vmul.f32 %v5894_v23, %v926_v40  ;;  %v955_v61 = vadd.f32 %v953_v34, %v802_v0  ;;  %v797_v48 = vadd.f32 %v5896_v7, %v717_v54  ;;  %v5906_v4 = vld [vmem:[#allocation113_spill] sm:$0xff] }
 0x21e   : > { %v5897_v57 = vstv %s3335_s18  ;;  %v5898_v47 = vstv %s3343_s23  ;;  %v5899_v33 = vmov %v5894_v23  ;;  %v988_v41 = vadd.f32 %v5901_v25, %v932_v3  ;;  %v1050_v20 = vpop.permute.xlu1 %1049  ;;  %v5911_v23 = vld [vmem:[#allocation64_spill] sm:$0xff]  ;;  %s4322_s18 = sld [smem:[#allocation2 + $0x88]]  ;;  %s4324_s23 = sld [smem:[#allocation2 + $0x79]] }
 0x21f   : > { %v966_v53 = vmul.f32 %v5897_v57, %v926_v40  ;;  %v1066_v46 = vmul.f32 %v5898_v47, %v1038_v16  ;;  %v947_v49 = vmul.f32 %v5899_v33, %v925_v55  ;;  %v5900_v28 = vmov %v5897_v57  ;;  %v5908_v40 = vld [vmem:[#allocation63_spill] sm:$0xff]  ;;  %v5914_v57 = vld [vmem:[#allocation84_spill] sm:$0xff] }
 0x220   : > { %v965_v14 = vmul.f32 %v5900_v28, %v925_v55  ;;  %v1037_v19 = vsel %vm228_vm7, %v1032_v10, 0.0  ;;  %v815_v44 = vadd.f32 %v5902_v15, %v735_v13  ;;  %v796_v31 = vadd.f32 %v5903_v51, %v716_v21 }
 0x221   : > { %v5904_v52 = vstv %s3345_s17  ;;  %v5905_v6 = vmov %v5898_v47  ;;  %v950_v26 = vadd.f32 %v948_v50, %v797_v48  ;;  %v814_v37 = vadd.f32 %v5906_v4, %v734_v24  ;;  %v5915_v47 = vld [vmem:[#allocation85_spill] sm:$0xff]  ;;  %s4314_s17 = sld [smem:[#allocation2 + $0x49]] }
 0x222   : > { %v1096_v27 = vmul.f32 %v5904_v52, %v1038_v16  ;;  %v1065_v2 = vmul.f32 %v5905_v6, %v1037_v19  ;;  %v1068_v34 = vadd.f32 %v1066_v46, %v988_v41  ;;  %v987_v54 = vadd.f32 %v5907_v60, %v3853_v5  ;;  %v1048_v5 = vpop.permute.xlu0 %1047 }
 0x223   : > { %v968_v3 = vadd.f32 %v966_v53, %v815_v44  ;;  %v1018_v43 = vadd.f32 %v5908_v40, %v3847_v39  ;;  %v5909_v58 = vmov %v5904_v52  ;;  %v1046_v10 = vsel %vm3898_vm12, %v1042_v42, 0.0  ;;  %v5910_v39 = vld [vmem:[#allocation83_spill] sm:$0xff] }
 0x224   : > { %v1095_v35 = vmul.f32 %v5909_v58, %v1037_v19  ;;  %v949_v0 = vadd.f32 %v947_v49, %v796_v31  ;;  %v967_v29 = vadd.f32 %v965_v14, %v814_v37  ;;  %v1067_v13 = vadd.f32 %v1065_v2, %v987_v54  ;;  %v5922_v31 = vld [vmem:[#allocation86_spill] sm:$0xff]  ;;  %v5924_v37 = vld [vmem:[#allocation67_spill] sm:$0xff]  ;;  %v5926_v58 = vld [vmem:[#allocation87_spill] sm:$0xff] }
 0x225   : > { %v1045_v38 = vsel %vm228_vm7, %v1040_v30, 0.0  ;;  %v3942_v21 = vadd.f32 %v1096_v27, %v1018_v43  ;;  %v1017_v55 = vadd.f32 %v5910_v39, %v3864_v63  ;;  %v1000_v50 = vadd.f32 %v5911_v23, %v944_v36 }
 0x226   : > { %v1030_v24 = vadd.f32 %v5912_v32, %v974_v45  ;;  %v1112_v16 = vmax.f32 %v1068_v34, 0.0  ;;  %v5913_v7 = vstv %s3361_s13  ;;  %v999_v53 = vadd.f32 %v5914_v57, %v943_v1  ;;  %v1058_v45 = vpop.permute.xlu1 %1057  ;;  %v5919_v1 = vld [vmem:[#allocation66_spill] sm:$0xff]  ;;  %v1056_v2 = vpop.permute.xlu0 %1055  ;;  %s4326_s13 = sld [smem:[#allocation2 + $0x5e]] }
 0x227   : > { %v1078_v48 = vmul.f32 %v5913_v7, %v1046_v10  ;;  %v1029_v46 = vadd.f32 %v5915_v47, %v973_v9  ;;  %v3952_v42 = vadd.f32 %v1095_v35, %v1017_v55  ;;  %v5916_v33 = vmov %v5913_v7 }
 0x228   : > { %v1077_v49 = vmul.f32 %v5916_v33, %v1045_v38  ;;  %v1054_v63 = vsel %vm3898_vm12, %v1050_v20, 0.0  ;;  %v1053_v36 = vsel %vm228_vm7, %v1048_v5, 0.0  ;;  %v1111_v28 = vmax.f32 %v1067_v13, 0.0  ;;  %v5929_v5 = vld [vmem:[#allocation90_spill] sm:$0xff] }
 0x229   : > { %v5917_v14 = vstv %s3363_s24  ;;  %v994_v9 = vadd.f32 %v5919_v1, %v938_v59  ;;  %v5920_v30 = vstv %s3379_s27  ;;  %v5921_v44 = vstv %s3381_s28  ;;  %s5930_s27 = sld [smem:[#allocation21_spill]]  ;;  %s5946_s28 = smov 113  }
 0x22a   : > { %v1108_v25 = vmul.f32 %v5917_v14, %v1046_v10  ;;  %v5918_v41 = vmov %v5917_v14  ;;  %v1072_v15 = vmul.f32 %v5920_v30, %v1054_v63  ;;  %v1090_v51 = vmul.f32 %v5921_v44, %v1054_v63  ;;  %s4328_s24 = sld [smem:[#allocation2 + $0x8b]] }
 0x22b   : > { %v1107_v19 = vmul.f32 %v5918_v41, %v1045_v38  ;;  %v993_v52 = vadd.f32 %v5922_v31, %v937_v56  ;;  %v5923_v27 = vmov %v5920_v30  ;;  %v1080_v4 = vadd.f32 %v1078_v48, %v1000_v50  ;;  %v5927_v56 = vld [vmem:[#allocation88_spill] sm:$0xff]  ;;  %v5935_v41 = vld [vmem:[#allocation91_spill] sm:$0xff] }
 0x22c   : > { %v1071_v6 = vmul.f32 %v5923_v27, %v1053_v36  ;;  %v1012_v34 = vadd.f32 %v5924_v37, %v956_v17  ;;  %v5925_v60 = vmov %v5921_v44  ;;  %v1062_v40 = vsel %vm3898_vm12, %v1058_v45, 0.0 }
 0x22d   : > { %v1089_v54 = vmul.f32 %v5925_v60, %v1053_v36  ;;  %v1079_v59 = vadd.f32 %v1077_v49, %v999_v53  ;;  %v1074_v43 = vadd.f32 %v1072_v15, %v994_v9  ;;  %v1011_v35 = vadd.f32 %v5926_v58, %v955_v61 }
 0x22e   : > { %v1073_v10 = vadd.f32 %v1071_v6, %v993_v52  ;;  %v1006_v20 = vadd.f32 %v5927_v56, %v950_v26  ;;  %v5928_v13 = vstv %s3393_s22  ;;  %v1005_v39 = vadd.f32 %v5929_v5, %v949_v0  ;;  %v5934_v0 = vld [vmem:[#allocation89_spill] sm:$0xff]  ;;  %s5938_s22 = smov 16  }
 0x22f   : > { %v1084_v38 = vmul.f32 %v5928_v13, %v1062_v40  ;;  %v1061_v17 = vsel %vm228_vm7, %v1056_v2, 0.0  ;;  %v1092_v55 = vadd.f32 %v1090_v51, %v1012_v34  ;;  %v1114_v23 = vmax.f32 %v1074_v43, 0.0  ;;  %v2410_v30 = vld [vmem:[%s5930_s27 + $0x8] sm:$0xff]  ;;  %v2411_v51 = vld [vmem:[%s5930_s27] sm:$0xff]  ;;  %v2412_v37 = vld [vmem:[%s5930_s27 + $0x18] sm:$0xff] }
 0x230   : > { %v1113_v50 = vmax.f32 %v1073_v10, 0.0  ;;  %v5931_v32 = vstv %s3395_s9  ;;  %v1091_v48 = vadd.f32 %v1089_v54, %v1011_v35  ;;  %v5932_v61 = vmov %v5928_v13  ;;  %v2415_v35 = vld [vmem:[%s5930_s27 + $0x20] sm:$0xff]  ;;  %s5947_s9 = smov 127  }
 0x231   : > { %v1102_v7 = vmul.f32 %v5931_v32, %v1062_v40  ;;  %v1086_v57 = vadd.f32 %v1084_v38, %v1006_v20  ;;  %v1083_v53 = vmul.f32 %v5932_v61, %v1061_v17  ;;  %v5933_v47 = vmov %v5931_v32  ;;  %v2416_v20 = vld [vmem:[%s5930_s27 + $0x38] sm:$0xff]  ;;  %v2417_v38 = vld [vmem:[%s5930_s27 + $0x30] sm:$0xff] }
 0x232   : > { %v1101_v26 = vmul.f32 %v5933_v47, %v1061_v17  ;;  %v1120_v33 = vmax.f32 %v1080_v4, 0.0  ;;  %v1116_v49 = vadd.f32 %v1114_v23, %v1112_v16  ;;  %v1115_v63 = vadd.f32 %v1113_v50, %v1111_v28 }
 0x233   : > { %v1024_v36 = vadd.f32 %v5934_v0, %v968_v3  ;;  %v1119_v45 = vmax.f32 %v1079_v59, 0.0  ;;  %v1122_v14 = vmax.f32 %v1086_v57, 0.0  ;;  %v1023_v1 = vadd.f32 %v5935_v41, %v967_v29 }
 0x234   : > { %v1085_v9 = vadd.f32 %v1083_v53, %v1005_v39  ;;  %v3993_v15 = vadd.f32 %v2410_v30, %v1116_v49  ;;  %v1128_v44 = vmax.f32 %v1092_v55, 0.0  ;;  %v3996_v31 = vadd.f32 %v2411_v51, %v1115_v63 }
 0x235   : > { %v1104_v52 = vadd.f32 %v1102_v7, %v1024_v36  ;;  %v1127_v27 = vmax.f32 %v1091_v48, 0.0  ;;  %v1124_v16 = vadd.f32 %v1122_v14, %v1120_v33  ;;  %v1103_v28 = vadd.f32 %v1101_v26, %v1023_v1 }
 0x236   : > { %5936 = vst [vmem:[#allocation94_spill] sm:$0xff] %v3993_v15  ;;  %5937 = vst [vmem:[#allocation95_spill] sm:$0xff] %v3996_v31  ;;  %v1121_v6 = vmax.f32 %v1085_v9, 0.0  ;;  %v1130_v3 = vmax.f32 %v3942_v21, 0.0  ;;  %v1110_v2 = vadd.f32 %v1108_v25, %v1030_v24  ;;  %1455 = vrot.lane.b32.xlu0 %v3996_v31, %s5938_s22  ;;  %1458 = vrot.lane.b32.xlu1 %v3993_v15, %s5938_s22  ;;  %v1129_v29 = vmax.f32 %v3952_v42, 0.0  ;;  %v2413_v21 = vld [vmem:[%s5930_s27 + $0x10] sm:$0xff] }
 0x237   : > { %v1109_v4 = vadd.f32 %v1107_v19, %v1029_v46  ;;  %v4005_v34 = vadd.f32 %v2412_v37, %v1124_v16  ;;  %v1136_v40 = vmax.f32 %v1104_v52, 0.0  ;;  %v1135_v25 = vmax.f32 %v1103_v28, 0.0  ;;  %v2414_v46 = vld [vmem:[%s5930_s27 + $0x28] sm:$0xff]  ;;  %s4386_s27 = sld [smem:[#allocation2 + $0x66]] }
 0x238   : > { %v1123_v60 = vadd.f32 %v1121_v6, %v1119_v45  ;;  %v1132_v54 = vadd.f32 %v1130_v3, %v1128_v44  ;;  %v1131_v59 = vadd.f32 %v1129_v29, %v1127_v27  ;;  %v1138_v43 = vmax.f32 %v1110_v2, 0.0 }
 0x239   : > { %5939 = vst [vmem:[#allocation96_spill] sm:$0xff] %v4005_v34  ;;  %v1137_v42 = vmax.f32 %v1109_v4, 0.0  ;;  %v1167_v39 = vrot.slane %v3996_v31, 7  ;;  %v1168_v17 = vrot.slane %v3993_v15, 7  ;;  %v1194_v32 = vrot.slane %v4005_v34, 7 }
 0x23a   : > { %v4008_v24 = vadd.f32 %v2413_v21, %v1123_v60  ;;  %1480 = vrot.lane.b32.xlu1 %v4005_v34, %s5938_s22  ;;  %v4015_v19 = vadd.f32 %v2414_v46, %v1132_v54  ;;  %v1140_v58 = vadd.f32 %v1138_v43, %v1136_v40  ;;  %v4018_v10 = vadd.f32 %v2415_v35, %v1131_v59 }
 0x23b   : > { %v1139_v56 = vadd.f32 %v1137_v42, %v1135_v25  ;;  %v4038_v23 = vsel %vm270_vm0, %v1167_v39, %v1168_v17  ;;  %v4044_v7 = vsel %vm270_vm0, %v1168_v17, %v1167_v39  ;;  %v1719_v0 = vrot.slane %v3996_v31, 1 }
 0x23c   : > { %5940 = vst [vmem:[#allocation100_spill] sm:$0xff] %v4008_v24  ;;  %1477 = vrot.lane.b32.xlu0 %v4008_v24, %s5938_s22  ;;  %5941 = vst [vmem:[#allocation97_spill] sm:$0xff] %v4015_v19  ;;  %v4025_v13 = vadd.f32 %v2416_v20, %v1140_v58  ;;  %v1193_v50 = vrot.slane %v4008_v24, 7  ;;  %v1219_v57 = vrot.slane %v4018_v10, 7  ;;  %v1220_v61 = vrot.slane %v4015_v19, 7 }
 0x23d   : > { %5942 = vst [vmem:[#allocation101_spill] sm:$0xff] %v4018_v10  ;;  %v4028_v5 = vadd.f32 %v2417_v38, %v1139_v56  ;;  %v1720_v36 = vrot.slane %v3993_v15, 1  ;;  %v1745_v41 = vrot.slane %v4008_v24, 1  ;;  %v1746_v1 = vrot.slane %v4005_v34, 1  ;;  %5955 = sst [smem:[#allocation33_spill]] %s4386_s27  ;;  %s6053_s27 = sld [smem:[#allocation28_spill]] }
 0x23e   : > { %1502 = vrot.lane.b32.xlu1 %v4015_v19, %s5938_s22  ;;  %5943 = vst [vmem:[#allocation70_spill] sm:$0xff] %v4025_v13  ;;  %v4052_v48 = vsel %vm270_vm0, %v1193_v50, %v1194_v32  ;;  %v4058_v53 = vsel %vm270_vm0, %v1194_v32, %v1193_v50  ;;  %v4066_v47 = vsel %vm270_vm0, %v1219_v57, %v1220_v61  ;;  %v1246_v33 = vrot.slane %v4025_v13, 7 }
 0x23f   : > { %5944 = vst [vmem:[#allocation71_spill] sm:$0xff] %v4028_v5  ;;  %v1245_v26 = vrot.slane %v4028_v5, 7  ;;  %v4072_v49 = vsel %vm270_vm0, %v1220_v61, %v1219_v57  ;;  %v4094_v14 = vsel %vm824_vm1, %v1720_v36, %v1719_v0  ;;  %v4100_v9 = vsel %vm824_vm1, %v1719_v0, %v1720_v36 }
 0x240   : > { %1499 = vrot.lane.b32.xlu0 %v4018_v10, %s5938_s22  ;;  %v4108_v30 = vsel %vm824_vm1, %v1746_v1, %v1745_v41  ;;  %v1771_v44 = vrot.slane %v4018_v10, 1  ;;  %v1772_v51 = vrot.slane %v4015_v19, 1  ;;  %v4114_v52 = vsel %vm824_vm1, %v1745_v41, %v1746_v1 }
 0x241   : > { %v4080_v63 = vsel %vm270_vm0, %v1245_v26, %v1246_v33  ;;  %v4086_v45 = vsel %vm270_vm0, %v1246_v33, %v1245_v26  ;;  %v1797_v16 = vrot.slane %v4028_v5, 1  ;;  %v1798_v28 = vrot.slane %v4025_v13, 1 }
 0x242   : > { %1524 = vrot.lane.b32.xlu1 %v4025_v13, %s5938_s22  ;;  %v4122_v27 = vsel %vm824_vm1, %v1772_v51, %v1771_v44  ;;  %v4128_v6 = vsel %vm824_vm1, %v1771_v44, %v1772_v51 }
 0x243   : > { %v4136_v3 = vsel %vm824_vm1, %v1798_v28, %v1797_v16  ;;  %v4140_v2 = vsel %vm824_vm1, %v1797_v16, %v1798_v28 }
 0x244   : > { %1521 = vrot.lane.b32.xlu0 %v4028_v5, %s5938_s22 }
 0x246   : > { %1174 = vrot.lane.b32.xlu1 %v4038_v23, %s5938_s22 }
 0x248   : > { %1171 = vrot.lane.b32.xlu0 %v4044_v7, %s5938_s22 }
 0x24a   : > { %1200 = vrot.lane.b32.xlu1 %v4052_v48, %s5938_s22 }
 0x24c   : > { %1197 = vrot.lane.b32.xlu0 %v4058_v53, %s5938_s22 }
 0x24e   : > { %1226 = vrot.lane.b32.xlu1 %v4066_v47, %s5938_s22 }
 0x250   : > { %1223 = vrot.lane.b32.xlu0 %v4072_v49, %s5938_s22 }
 0x252   : > { %1252 = vrot.lane.b32.xlu1 %v4080_v63, %s5938_s22 }
 0x254   : > { %1249 = vrot.lane.b32.xlu0 %v4086_v45, %s5938_s22 }
 0x256   : > { %1726 = vrot.lane.b32.xlu1 %v4094_v14, %s5938_s22 }
 0x258   : > { %1723 = vrot.lane.b32.xlu0 %v4100_v9, %s5938_s22 }
 0x25a   : > { %1752 = vrot.lane.b32.xlu1 %v4108_v30, %s5938_s22 }
 0x25c   : > { %1749 = vrot.lane.b32.xlu0 %v4114_v52, %s5938_s22 }
 0x25e   : > { %1778 = vrot.lane.b32.xlu1 %v4122_v27, %s5938_s22 }
 0x260   : > { %1775 = vrot.lane.b32.xlu0 %v4128_v6, %s5938_s22 }
 0x262   : > { %1804 = vrot.lane.b32.xlu1 %v4136_v3, %s5938_s22 }
 0x264   : > { %1801 = vrot.lane.b32.xlu0 %v4140_v2, %s5938_s22 }
 0x2a8   : > { %v1456_v29 = vpop.permute.xlu0 %1455  ;;  %v1459_v4 = vpop.permute.xlu1 %1458 }
 0x2a9   : > { %v1457_v37 = vsel %vm273_vm2, %v1456_v29, %v3996_v31  ;;  %v1460_v60 = vsel %vm273_vm2, %v1459_v4, %v3993_v15 }
 0x2aa   : > { %1461 = vrot.lane.b32.xlu0 %v1457_v37, %s5938_s22  ;;  %1463 = vrot.lane.b32.xlu1 %v1460_v60, %s5938_s22 }
 0x2ac   : > { %v1481_v54 = vpop.permute.xlu1 %1480 }
 0x2ad   : > { %v1482_v59 = vsel %vm273_vm2, %v1481_v54, %v4005_v34 }
 0x2ae   : > { %v1478_v40 = vpop.permute.xlu0 %1477  ;;  %1485 = vrot.lane.b32.xlu1 %v1482_v59, %s5938_s22 }
 0x2af   : > { %v1479_v21 = vsel %vm273_vm2, %v1478_v40, %v4008_v24 }
 0x2b0   : > { %1483 = vrot.lane.b32.xlu0 %v1479_v21, %s5938_s22  ;;  %v1503_v25 = vpop.permute.xlu1 %1502 }
 0x2b1   : > { %v1504_v42 = vsel %vm273_vm2, %v1503_v25, %v4015_v19 }
 0x2b2   : > { %v1500_v43 = vpop.permute.xlu0 %1499  ;;  %1507 = vrot.lane.b32.xlu1 %v1504_v42, %s5938_s22 }
 0x2b3   : > { %v1501_v46 = vsel %vm273_vm2, %v1500_v43, %v4018_v10 }
 0x2b4   : > { %1505 = vrot.lane.b32.xlu0 %v1501_v46, %s5938_s22  ;;  %v1525_v58 = vpop.permute.xlu1 %1524 }
 0x2b5   : > { %v1526_v56 = vsel %vm273_vm2, %v1525_v58, %v4025_v13 }
 0x2b6   : > { %v1522_v35 = vpop.permute.xlu0 %1521  ;;  %1529 = vrot.lane.b32.xlu1 %v1526_v56, %s5938_s22 }
 0x2b7   : > { %v1523_v20 = vsel %vm273_vm2, %v1522_v35, %v4028_v5 }
 0x2b8   : > { %1527 = vrot.lane.b32.xlu0 %v1523_v20, %s5938_s22  ;;  %v1175_v38 = vpop.permute.xlu1 %1174 }
 0x2b9   : > { %v1176_v17 = vsel %vm273_vm2, %v1175_v38, %v4038_v23 }
 0x2ba   : > { %v1172_v39 = vpop.permute.xlu0 %1171  ;;  %1179 = vrot.lane.b32.xlu1 %v1176_v17, %s5938_s22 }
 0x2bb   : > { %v1173_v55 = vsel %vm273_vm2, %v1172_v39, %v4044_v7 }
 0x2bc   : > { %1177 = vrot.lane.b32.xlu0 %v1173_v55, %s5938_s22  ;;  %v1201_v50 = vpop.permute.xlu1 %1200 }
 0x2bd   : > { %v1202_v57 = vsel %vm273_vm2, %v1201_v50, %v4052_v48 }
 0x2be   : > { %v1198_v32 = vpop.permute.xlu0 %1197  ;;  %1205 = vrot.lane.b32.xlu1 %v1202_v57, %s5938_s22 }
 0x2bf   : > { %v1199_v61 = vsel %vm273_vm2, %v1198_v32, %v4058_v53 }
 0x2c0   : > { %1203 = vrot.lane.b32.xlu0 %v1199_v61, %s5938_s22  ;;  %v1227_v26 = vpop.permute.xlu1 %1226 }
 0x2c1   : > { %v1228_v0 = vsel %vm273_vm2, %v1227_v26, %v4066_v47 }
 0x2c2   : > { %v1224_v33 = vpop.permute.xlu0 %1223  ;;  %1231 = vrot.lane.b32.xlu1 %v1228_v0, %s5938_s22 }
 0x2c3   : > { %v1225_v36 = vsel %vm273_vm2, %v1224_v33, %v4072_v49 }
 0x2c4   : > { %1229 = vrot.lane.b32.xlu0 %v1225_v36, %s5938_s22  ;;  %v1253_v41 = vpop.permute.xlu1 %1252 }
 0x2c5   : > { %v1254_v44 = vsel %vm273_vm2, %v1253_v41, %v4080_v63 }
 0x2c6   : > { %v1250_v1 = vpop.permute.xlu0 %1249  ;;  %1257 = vrot.lane.b32.xlu1 %v1254_v44, %s5938_s22 }
 0x2c7   : > { %v1251_v51 = vsel %vm273_vm2, %v1250_v1, %v4086_v45 }
 0x2c8   : > { %1255 = vrot.lane.b32.xlu0 %v1251_v51, %s5938_s22  ;;  %v1727_v16 = vpop.permute.xlu1 %1726 }
 0x2c9   : > { %v1728_v29 = vsel %vm273_vm2, %v1727_v16, %v4094_v14 }
 0x2ca   : > { %v1724_v28 = vpop.permute.xlu0 %1723  ;;  %1731 = vrot.lane.b32.xlu1 %v1728_v29, %s5938_s22 }
 0x2cb   : > { %v1725_v4 = vsel %vm273_vm2, %v1724_v28, %v4100_v9 }
 0x2cc   : > { %1729 = vrot.lane.b32.xlu0 %v1725_v4, %s5938_s22  ;;  %v1753_v37 = vpop.permute.xlu1 %1752 }
 0x2cd   : > { %v1754_v54 = vsel %vm273_vm2, %v1753_v37, %v4108_v30 }
 0x2ce   : > { %v1750_v60 = vpop.permute.xlu0 %1749  ;;  %1757 = vrot.lane.b32.xlu1 %v1754_v54, %s5938_s22 }
 0x2cf   : > { %v1751_v40 = vsel %vm273_vm2, %v1750_v60, %v4114_v52 }
 0x2d0   : > { %1755 = vrot.lane.b32.xlu0 %v1751_v40, %s5938_s22  ;;  %v1779_v59 = vpop.permute.xlu1 %1778 }
 0x2d1   : > { %v1780_v25 = vsel %vm273_vm2, %v1779_v59, %v4122_v27 }
 0x2d2   : > { %v1776_v21 = vpop.permute.xlu0 %1775  ;;  %1783 = vrot.lane.b32.xlu1 %v1780_v25, %s5938_s22 }
 0x2d3   : > { %v1777_v43 = vsel %vm273_vm2, %v1776_v21, %v4128_v6 }
 0x2d4   : > { %1781 = vrot.lane.b32.xlu0 %v1777_v43, %s5938_s22  ;;  %v1805_v42 = vpop.permute.xlu1 %1804 }
 0x2d5   : > { %v1806_v58 = vsel %vm273_vm2, %v1805_v42, %v4136_v3 }
 0x2d6   : > { %v1802_v46 = vpop.permute.xlu0 %1801  ;;  %1809 = vrot.lane.b32.xlu1 %v1806_v58, %s5938_s22 }
 0x2d7   : > { %v1803_v35 = vsel %vm273_vm2, %v1802_v46, %v4140_v2 }
 0x2d8   : > { %1807 = vrot.lane.b32.xlu0 %v1803_v35, %s5938_s22  ;;  %s4370_s22 = sld [smem:[#allocation2 + $0x54]] }
 0x2de   : > { %5951 = sst [smem:[#allocation29_spill]] %s4370_s22  ;;  %s4734_s22 = sld [smem:[#allocation2 + $0x8d]] }
 0x2e4   : > { %6032 = sst [smem:[#allocation55_spill]] %s4734_s22  ;;  %s4750_s22 = sld [smem:[#allocation2 + $0x50]] }
 0x2ea   : > { %6039 = sst [smem:[#allocation22_spill]] %s4750_s22 }
 0x31c   : > { %v1462_v56 = vpop.permute.xlu0 %1461  ;;  %v1464_v20 = vpop.permute.xlu1 %1463 }
 0x31d   : > { %v1465_v38 = vsel %vm273_vm2, %v1462_v56, %v3996_v31  ;;  %v1466_v39 = vsel %vm273_vm2, %v1464_v20, %v3993_v15 }
 0x31e   : > { %1469 = vrot.lane.b32.xlu0 %v1465_v38, %s5946_s28  ;;  %1471 = vrot.lane.b32.xlu1 %v1466_v39, %s5946_s28 }
 0x320   : > { %v1486_v17 = vpop.permute.xlu1 %1485 }
 0x321   : > { %v1488_v50 = vsel %vm273_vm2, %v1486_v17, %v4005_v34 }
 0x322   : > { %v1484_v55 = vpop.permute.xlu0 %1483  ;;  %1493 = vrot.lane.b32.xlu1 %v1488_v50, %s5946_s28 }
 0x323   : > { %v1487_v32 = vsel %vm273_vm2, %v1484_v55, %v4008_v24 }
 0x324   : > { %1491 = vrot.lane.b32.xlu0 %v1487_v32, %s5946_s28  ;;  %v1508_v57 = vpop.permute.xlu1 %1507 }
 0x325   : > { %v1510_v26 = vsel %vm273_vm2, %v1508_v57, %v4015_v19 }
 0x326   : > { %v1506_v61 = vpop.permute.xlu0 %1505  ;;  %1515 = vrot.lane.b32.xlu1 %v1510_v26, %s5946_s28 }
 0x327   : > { %v1509_v33 = vsel %vm273_vm2, %v1506_v61, %v4018_v10 }
 0x328   : > { %1513 = vrot.lane.b32.xlu0 %v1509_v33, %s5946_s28  ;;  %v1530_v0 = vpop.permute.xlu1 %1529 }
 0x329   : > { %v1532_v41 = vsel %vm273_vm2, %v1530_v0, %v4025_v13 }
 0x32a   : > { %v1528_v36 = vpop.permute.xlu0 %1527  ;;  %1537 = vrot.lane.b32.xlu1 %v1532_v41, %s5946_s28 }
 0x32b   : > { %v1531_v1 = vsel %vm273_vm2, %v1528_v36, %v4028_v5 }
 0x32c   : > { %1535 = vrot.lane.b32.xlu0 %v1531_v1, %s5946_s28  ;;  %v1180_v44 = vpop.permute.xlu1 %1179 }
 0x32d   : > { %v1182_v29 = vsel %vm273_vm2, %v1180_v44, %v4038_v23  ;;  %v1346_v44 = vstv %s4318_s11  ;;  %s4392_s11 = sld [smem:[#allocation2 + $0x4d]] }
 0x32e   : > { %1641 = vrot.lane.b32.xlu1 %v1466_v39, %s5947_s9  ;;  %v1178_v51 = vpop.permute.xlu0 %1177 }
 0x32f   : > { %v1181_v4 = vsel %vm273_vm2, %v1178_v51, %v4044_v7  ;;  %v1352_v51 = vstv %s4320_s14  ;;  %s4394_s14 = sld [smem:[#allocation2 + $0x7a]] }
 0x330   : > { %1639 = vrot.lane.b32.xlu0 %v1465_v38, %s5947_s9  ;;  %v1206_v16 = vpop.permute.xlu1 %1205  ;;  %v4495_v8 = vmul.f32 %v1352_v51, %v4066_v47 }
 0x331   : > { %v1208_v60 = vsel %vm273_vm2, %v1206_v16, %v4052_v48  ;;  %v1370_v16 = vstv %s4322_s18  ;;  %s4406_s18 = sld [smem:[#allocation2 + $0x71]] }
 0x332   : > { %1649 = vrot.lane.b32.xlu1 %v1488_v50, %s5947_s9  ;;  %v1204_v28 = vpop.permute.xlu0 %1203 }
 0x333   : > { %v1207_v40 = vsel %vm273_vm2, %v1204_v28, %v4058_v53  ;;  %v1610_v28 = vstv %s4324_s23  ;;  %5956 = sst [smem:[#allocation34_spill]] %s4392_s11 }
 0x334   : > { %1647 = vrot.lane.b32.xlu0 %v1487_v32, %s5947_s9  ;;  %v1232_v37 = vpop.permute.xlu1 %1231  ;;  %s4576_s23 = sld [smem:[#allocation2 + $0x7e]] }
 0x335   : > { %v1234_v59 = vsel %vm273_vm2, %v1232_v37, %v4066_v47  ;;  %v1616_v37 = vstv %s4326_s13  ;;  %5957 = sst [smem:[#allocation35_spill]] %s4394_s14  ;;  %s4602_s13 = sld [smem:[#allocation2 + $0x4a]] }
 0x336   : > { %1657 = vrot.lane.b32.xlu1 %v1510_v26, %s5947_s9  ;;  %v1230_v54 = vpop.permute.xlu0 %1229  ;;  %s4778_s14 = sld [smem:[#allocation2 + $0x6b]] }
 0x337   : > { %v1233_v21 = vsel %vm273_vm2, %v1230_v54, %v4072_v49  ;;  %v1358_v54 = vstv %s4334_s25  ;;  %5959 = sst [smem:[#allocation37_spill]] %s4406_s18  ;;  %s4420_s25 = sld [smem:[#allocation2 + $0x8c]] }
 0x338   : > { %1655 = vrot.lane.b32.xlu0 %v1509_v33, %s5947_s9  ;;  %v1258_v25 = vpop.permute.xlu1 %1257 }
 0x339   : > { %v1260_v42 = vsel %vm273_vm2, %v1258_v25, %v4080_v63  ;;  %v1622_v25 = vstv %s4346_s0  ;;  %s4630_s0 = sld [smem:[#allocation2 + $0x53]] }
 0x33a   : > { %1665 = vrot.lane.b32.xlu1 %v1532_v41, %s5947_s9  ;;  %v1256_v43 = vpop.permute.xlu0 %1255  ;;  %v1328_v41 = vstv %s4314_s17  ;;  %s4384_s17 = sld [smem:[#allocation2 + $0x81]] }
 0x33b   : > { %v1259_v46 = vsel %vm273_vm2, %v1256_v43, %v4086_v45  ;;  %v1628_v43 = vstv %s4348_s21  ;;  %s4652_s21 = sld [smem:[#allocation2 + $0x5c]] }
 0x33c   : > { %1663 = vrot.lane.b32.xlu0 %v1531_v1, %s5947_s9  ;;  %v1732_v58 = vpop.permute.xlu1 %1731  ;;  %v1592_v1 = vstv %s4316_s8  ;;  %s4554_s8 = sld [smem:[#allocation5 + $0xe]]  ;;  %6048 = sst [smem:[#allocation69_spill]] %s4778_s14 }
 0x33d   : > { %v1734_v38 = vsel %vm273_vm2, %v1732_v58, %v4094_v14  ;;  %5962 = sst [smem:[#allocation40_spill]] %s4420_s25  ;;  %s4449_s25 = sld [smem:[#allocation5 + $0x8]]  ;;  %v4477_v58 = vsel %vm237_vm4, %v4136_v3, 0.0 }
 0x33e   : > { %1187 = vrot.lane.b32.xlu1 %v1182_v29, %s5946_s28  ;;  %v1730_v35 = vpop.permute.xlu0 %1729 }
 0x33f   : > { %v1733_v39 = vsel %vm273_vm2, %v1730_v35, %v4100_v9  ;;  %v1319_v35 = vsel %vm214_vm3, %v4044_v7, 0.0  ;;  %v1325_v7 = vsel %vm214_vm3, %v4086_v45, 0.0 }
 0x340   : > { %1185 = vrot.lane.b32.xlu0 %v1181_v4, %s5946_s28  ;;  %v1758_v56 = vpop.permute.xlu1 %1757  ;;  %5954 = sst [smem:[#allocation32_spill]] %s4384_s17  ;;  %s4742_s17 = sld [smem:[#allocation2 + $0x69]] }
 0x341   : > { %v1760_v55 = vsel %vm273_vm2, %v1758_v56, %v4108_v30  ;;  %v1323_v56 = vsel %vm214_vm3, %v4072_v49, 0.0 }
 0x342   : > { %1213 = vrot.lane.b32.xlu1 %v1208_v60, %s5946_s28  ;;  %v1756_v20 = vpop.permute.xlu0 %1755 }
 0x343   : > { %v1759_v32 = vsel %vm273_vm2, %v1756_v20, %v4114_v52  ;;  %5965 = sst [smem:[#allocation43_spill]] %s4449_s25  ;;  %s4492_s25 = sld [smem:[#allocation2 + $0x51]] }
 0x344   : > { %1211 = vrot.lane.b32.xlu0 %v1207_v40, %s5946_s28  ;;  %v1784_v17 = vpop.permute.xlu1 %1783 }
 0x345   : > { %v1786_v57 = vsel %vm273_vm2, %v1784_v17, %v4122_v27 }
 0x346   : > { %1239 = vrot.lane.b32.xlu1 %v1234_v59, %s5946_s28  ;;  %v1782_v50 = vpop.permute.xlu0 %1781 }
 0x347   : > { %v1785_v61 = vsel %vm273_vm2, %v1782_v50, %v4128_v6  ;;  %v4432_v50 = vsel %vm237_vm4, %v4108_v30, 0.0  ;;  %v4453_v30 = vmul.f32 %v1328_v41, %v1319_v35 }
 0x348   : > { %1237 = vrot.lane.b32.xlu0 %v1233_v21, %s5946_s28  ;;  %v1810_v26 = vpop.permute.xlu1 %1809 }
 0x349   : > { %v1812_v0 = vsel %vm273_vm2, %v1810_v26, %v4136_v3  ;;  %v4458_v26 = vmul.f32 %v1328_v41, %v4038_v23  ;;  %v4486_v41 = vmul.f32 %v1352_v51, %v1323_v56  ;;  %5972 = sst [smem:[#allocation54_spill]] %s4492_s25  ;;  %v4498_v3 = vmul.f32 %v1370_v16, %v4066_v47  ;;  %s4508_s25 = sld [smem:[#allocation5 + $0xf]] }
 0x34a   : > { %1265 = vrot.lane.b32.xlu1 %v1260_v42, %s5946_s28  ;;  %v1808_v33 = vpop.permute.xlu0 %1807  ;;  %v4511_v51 = vmul.f32 %v1358_v54, %v4080_v63 }
 0x34b   : > { %v1811_v36 = vsel %vm273_vm2, %v1808_v33, %v4140_v2 }
 0x34c   : > { %1263 = vrot.lane.b32.xlu0 %v1259_v46, %s5946_s28 }
 0x34e   : > { %1377 = vrot.lane.b32.xlu1 %v1182_v29, %s5947_s9  ;;  %v1334_v29 = vstv %s4330_s29  ;;  %s4408_s29 = sld [smem:[#allocation2 + $0x56]] }
 0x34f   : > { %5974 = sst [smem:[#allocation49_spill]] %s4508_s25  ;;  %s4528_s25 = sld [smem:[#allocation2 + $0x5a]] }
 0x350   : > { %1375 = vrot.lane.b32.xlu0 %v1181_v4, %s5947_s9  ;;  %v1340_v4 = vstv %s4332_s2  ;;  %s4418_s2 = sld [smem:[#allocation2 + $0x5f]] }
 0x352   : > { %1385 = vrot.lane.b32.xlu1 %v1208_v60, %s5947_s9  ;;  %v1634_v60 = vstv %s4328_s24  ;;  %s4628_s24 = sld [smem:[#allocation2 + $0x6e]] }
 0x353   : > { %v4574_v45 = vmul.f32 %v1634_v60, %v4018_v10 }
 0x354   : > { %1383 = vrot.lane.b32.xlu0 %v1207_v40, %s5947_s9  ;;  %v1364_v40 = vstv %s4336_s19  ;;  %5960 = sst [smem:[#allocation38_spill]] %s4408_s29  ;;  %s4434_s19 = sld [smem:[#allocation2 + $0x83]] }
 0x355   : > { %s4436_s29 = sld [smem:[#allocation2 + $0x68]]  ;;  %v4514_v47 = vmul.f32 %v1364_v40, %v4080_v63  ;;  %5975 = sst [smem:[#allocation50_spill]] %s4528_s25  ;;  %v4535_v63 = vmul.f32 %v1592_v1, %v3993_v15  ;;  %5982 = vst [vmem:[#allocation75_spill] sm:$0xff] %v4574_v45 }
 0x356   : > { %1393 = vrot.lane.b32.xlu1 %v1234_v59, %s5947_s9  ;;  %v1598_v59 = vstv %s4338_s7  ;;  %5961 = sst [smem:[#allocation39_spill]] %s4418_s2  ;;  %s4451_s2 = sld [smem:[#allocation5 + $0xd]] }
 0x357   : > { %s4552_s25 = sld [smem:[#allocation5 + $0xb]]  ;;  %s6038_s18 = sld [smem:[#allocation50_spill]] }
 0x358   : > { %1391 = vrot.lane.b32.xlu0 %v1233_v21, %s5947_s9  ;;  %v1604_v21 = vstv %s4340_s1  ;;  %s4578_s7 = sld [smem:[#allocation2 + $0x63]]  ;;  %s4604_s1 = sld [smem:[#allocation2 + $0x77]] }
 0x35a   : > { %1401 = vrot.lane.b32.xlu1 %v1260_v42, %s5947_s9  ;;  %v1880_v42 = vstv %s4342_s20  ;;  %5963 = sst [smem:[#allocation41_spill]] %s4434_s19  ;;  %s4462_s19 = sld [smem:[#allocation2 + $0x75]] }
 0x35b   : > { %5964 = sst [smem:[#allocation42_spill]] %s4436_s29  ;;  %s4460_s29 = sld [smem:[#allocation2 + $0x48]]  ;;  %v4619_v17 = vmul.f32 %v1880_v42, %v4100_v9 }
 0x35c   : > { %1399 = vrot.lane.b32.xlu0 %v1259_v46, %s5947_s9  ;;  %v1898_v46 = vstv %s4344_s4  ;;  %5966 = sst [smem:[#allocation44_spill]] %s4451_s2  ;;  %s4479_s2 = sld [smem:[#allocation5 + $0x9]] }
 0x35d   : > { %5978 = sst [smem:[#allocation57_spill]] %s4552_s25  ;;  %5989 = vst [vmem:[#allocation106_spill] sm:$0xff] %v4619_v17  ;;  %v4624_v49 = vmul.f32 %v1898_v46, %v4100_v9  ;;  %v5993_v9 = vstv %s4354_s30  ;;  %s4654_s20 = sld [smem:[#allocation2 + $0x89]] }
 0x35e   : > { %1739 = vrot.lane.b32.xlu1 %v1734_v38, %s5946_s28  ;;  %s4676_s4 = sld [smem:[#allocation2 + $0x80]]  ;;  %s4678_s30 = sld [smem:[#allocation2 + $0x65]] }
 0x35f   : > { %5990 = vst [vmem:[#allocation107_spill] sm:$0xff] %v4624_v49  ;;  %s6051_s25 = sld [smem:[#allocation26_spill]]  ;;  %s6116_s14 = sld [smem:[#allocation44_spill]] }
 0x360   : > { %1737 = vrot.lane.b32.xlu0 %v1733_v39, %s5946_s28  ;;  %5968 = sst [smem:[#allocation46_spill]] %s4462_s19  ;;  %s4490_s19 = sld [smem:[#allocation2 + $0x6c]] }
 0x361   : > { %5967 = sst [smem:[#allocation45_spill]] %s4460_s29  ;;  %s4481_s29 = sld [smem:[#allocation5 + $0xc]] }
 0x362   : > { %1765 = vrot.lane.b32.xlu1 %v1760_v55, %s5946_s28  ;;  %5969 = sst [smem:[#allocation47_spill]] %s4479_s2 }
 0x363   : > { %5997 = sst [smem:[#allocation59_spill]] %s4654_s20  ;;  %s4732_s20 = sld [smem:[#allocation2 + $0x60]] }
 0x364   : > { %1763 = vrot.lane.b32.xlu0 %v1759_v32, %s5946_s28  ;;  %6006 = sst [smem:[#allocation58_spill]] %s4676_s4  ;;  %s4762_s4 = sld [smem:[#allocation2 + $0x59]] }
 0x365   : > { %6007 = sst [smem:[#allocation60_spill]] %s4678_s30  ;;  %s6043_s2 = sld [smem:[#allocation59_spill]] }
 0x366   : > { %1791 = vrot.lane.b32.xlu1 %v1786_v57, %s5946_s28  ;;  %5971 = sst [smem:[#allocation53_spill]] %s4490_s19  ;;  %s4506_s19 = sld [smem:[#allocation5 + $0xa]] }
 0x367   : > { %5970 = sst [smem:[#allocation48_spill]] %s4481_s29  ;;  %s4726_s30 = sld [smem:[#allocation2 + $0x57]] }
 0x368   : > { %1789 = vrot.lane.b32.xlu0 %v1785_v61, %s5946_s28  ;;  %s6052_s29 = sld [smem:[#allocation27_spill]] }
 0x369   : > { %6030 = sst [smem:[#allocation24_spill]] %s4732_s20  ;;  %s6054_s20 = sld [smem:[#allocation29_spill]] }
 0x36a   : > { %1817 = vrot.lane.b32.xlu1 %v1812_v0, %s5946_s28  ;;  %6040 = sst [smem:[#allocation23_spill]] %s4762_s4 }
 0x36c   : > { %1815 = vrot.lane.b32.xlu0 %v1811_v36, %s5946_s28  ;;  %s4376_s28 = sld [smem:[#allocation2 + $0x5d]]  ;;  %5973 = sst [smem:[#allocation56_spill]] %s4506_s19 }
 0x36d   : > { %s4530_s19 = sld [smem:[#allocation2 + $0x87]] }
 0x36e   : > { %1929 = vrot.lane.b32.xlu1 %v1734_v38, %s5947_s9  ;;  %v4598_v38 = vmul.f32 %v1628_v43, %v4028_v5  ;;  %6027 = sst [smem:[#allocation52_spill]] %s4726_s30 }
 0x36f   : > { %s6049_s11 = sld [smem:[#allocation52_spill]] }
 0x370   : > { %1927 = vrot.lane.b32.xlu0 %v1733_v39, %s5947_s9  ;;  %v1321_v39 = vsel %vm214_vm3, %v4058_v53, 0.0  ;;  %v4593_v53 = vmul.f32 %v1622_v25, %v4028_v5  ;;  %5986 = vst [vmem:[#allocation104_spill] sm:$0xff] %v4598_v38  ;;  %v5995_v5 = vstv %s4356_s5  ;;  %s6021_s5 = sld [smem:[#allocation38_spill]] }
 0x371   : > { %v4467_v33 = vmul.f32 %v1334_v29, %v1321_v39 }
 0x372   : > { %1937 = vrot.lane.b32.xlu1 %v1760_v55, %s5947_s9  ;;  %5952 = sst [smem:[#allocation30_spill]] %s4376_s28  ;;  %v4427_v55 = vsel %vm237_vm4, %v4094_v14, 0.0  ;;  %5985 = vst [vmem:[#allocation76_spill] sm:$0xff] %v4593_v53  ;;  %s4740_s28 = sld [smem:[#allocation2 + $0x84]] }
 0x373   : > { %s6056_s22 = sld [smem:[#allocation30_spill]] }
 0x374   : > { %1935 = vrot.lane.b32.xlu0 %v1759_v32, %s5947_s9  ;;  %v4443_v32 = vsel %vm237_vm4, %v4122_v27, 0.0  ;;  %v4465_v27 = vmul.f32 %v1346_v44, %v4038_v23  ;;  %v4484_v23 = vmul.f32 %v1340_v4, %v4052_v48 }
 0x376   : > { %1945 = vrot.lane.b32.xlu1 %v1786_v57, %s5947_s9 }
 0x378   : > { %1943 = vrot.lane.b32.xlu0 %v1785_v61, %s5947_s9  ;;  %v4455_v61 = vmul.f32 %v1346_v44, %v1319_v35  ;;  %v4488_v44 = vmul.f32 %v1370_v16, %v1323_v56  ;;  %v4519_v16 = vmul.f32 %v1592_v1, %v3996_v31  ;;  %v4524_v35 = vmul.f32 %v1610_v28, %v3996_v31 }
 0x379   : > { %v4559_v1 = vmul.f32 %v1598_v59, %v4005_v34  ;;  %v6067_v17 = vstv %s6056_s22  ;;  %s6080_s22 = sld [smem:[#allocation39_spill]] }
 0x37a   : > { %1953 = vrot.lane.b32.xlu1 %v1812_v0, %s5947_s9  ;;  %v4469_v0 = vmul.f32 %v1340_v4, %v1321_v39  ;;  %v4550_v39 = vmul.f32 %v1604_v21, %v4008_v24 }
 0x37b   : > { %5979 = vst [vmem:[#allocation72_spill] sm:$0xff] %v4559_v1 }
 0x37c   : > { %1951 = vrot.lane.b32.xlu0 %v1811_v36, %s5947_s9  ;;  %s4378_s9 = sld [smem:[#allocation2 + $0x8a]]  ;;  %v4472_v36 = vmul.f32 %v1334_v29, %v4052_v48  ;;  %v4500_v48 = vmul.f32 %v1358_v54, %v1325_v7  ;;  %v4502_v29 = vmul.f32 %v1364_v40, %v1325_v7  ;;  %v4540_v54 = vmul.f32 %v1610_v28, %v3993_v15 }
 0x37d   : > { %v4545_v40 = vmul.f32 %v1598_v59, %v4008_v24  ;;  %5977 = vst [vmem:[#allocation99_spill] sm:$0xff] %v4550_v39  ;;  %v4564_v28 = vmul.f32 %v1604_v21, %v4005_v34  ;;  %v4569_v7 = vmul.f32 %v1616_v37, %v4018_v10  ;;  %v4583_v59 = vmul.f32 %v1616_v37, %v4015_v19 }
 0x37e   : > { %v4588_v21 = vmul.f32 %v1634_v60, %v4015_v19  ;;  %v4609_v37 = vmul.f32 %v1622_v25, %v4025_v13  ;;  %v4614_v60 = vmul.f32 %v1628_v43, %v4025_v13  ;;  %v4635_v25 = vmul.f32 %v1880_v42, %v4427_v55 }
 0x37f   : > { %5976 = vst [vmem:[#allocation98_spill] sm:$0xff] %v4545_v40  ;;  %5980 = vst [vmem:[#allocation73_spill] sm:$0xff] %v4564_v28  ;;  %v4640_v43 = vmul.f32 %v1898_v46, %v4427_v55  ;;  %v4645_v13 = vmul.f32 %v5993_v9, %v4114_v52  ;;  %v4650_v10 = vmul.f32 %v5995_v5, %v4114_v52  ;;  %v5998_v42 = vmov %v5993_v9 }
 0x380   : > { %5981 = vst [vmem:[#allocation74_spill] sm:$0xff] %v4569_v7  ;;  %5983 = vst [vmem:[#allocation102_spill] sm:$0xff] %v4583_v59  ;;  %v4659_v34 = vmul.f32 %v5998_v42, %v4432_v50  ;;  %v6000_v46 = vmov %v5995_v5  ;;  %v6002_v9 = vstv %s4350_s15  ;;  %v6004_v5 = vstv %s4352_s26  ;;  %s4704_s15 = sld [smem:[#allocation2 + $0x4e]]  ;;  %s4706_s26 = sld [smem:[#allocation2 + $0x7b]] }
 0x381   : > { %5984 = vst [vmem:[#allocation103_spill] sm:$0xff] %v4588_v21  ;;  %5987 = vst [vmem:[#allocation77_spill] sm:$0xff] %v4609_v37  ;;  %v4664_v55 = vmul.f32 %v6000_v46, %v4432_v50  ;;  %v4669_v15 = vmul.f32 %v6002_v9, %v4128_v6  ;;  %v4674_v52 = vmul.f32 %v6004_v5, %v4128_v6  ;;  %v6008_v42 = vmov %v6002_v9 }
 0x382   : > { %5953 = sst [smem:[#allocation31_spill]] %s4378_s9  ;;  %5988 = vst [vmem:[#allocation105_spill] sm:$0xff] %v4614_v60  ;;  %5991 = vst [vmem:[#allocation78_spill] sm:$0xff] %v4635_v25  ;;  %v4683_v50 = vmul.f32 %v6008_v42, %v4443_v32  ;;  %v6010_v46 = vmov %v6004_v5  ;;  %v6012_v9 = vstv %s4358_s12  ;;  %v6014_v6 = vstv %s4360_s6  ;;  %s4768_s6 = sld [smem:[#allocation2 + $0x62]] }
 0x383   : > { %5992 = vst [vmem:[#allocation108_spill] sm:$0xff] %v4640_v43  ;;  %5994 = vst [vmem:[#allocation109_spill] sm:$0xff] %v4645_v13  ;;  %v4688_v24 = vmul.f32 %v6010_v46, %v4443_v32  ;;  %v4693_v31 = vmul.f32 %v6012_v9, %v4140_v2  ;;  %v4698_v5 = vmul.f32 %v6014_v6, %v4140_v2  ;;  %v6018_v32 = vmov %v6012_v9  ;;  %s4770_s12 = sld [smem:[#allocation2 + $0x8f]]  ;;  %s6057_s4 = sld [smem:[#allocation31_spill]] }
 0x384   : > { %5996 = vst [vmem:[#allocation79_spill] sm:$0xff] %v4650_v10  ;;  %5999 = vst [vmem:[#allocation80_spill] sm:$0xff] %v4659_v34  ;;  %v4711_v46 = vmul.f32 %v6018_v32, %v4477_v58  ;;  %v6020_v9 = vmov %v6014_v6  ;;  %s6045_s9 = sld [smem:[#allocation60_spill]] }
 0x385   : > { %6001 = vst [vmem:[#allocation81_spill] sm:$0xff] %v4664_v55  ;;  %6003 = vst [vmem:[#allocation110_spill] sm:$0xff] %v4669_v15  ;;  %v4716_v2 = vmul.f32 %v6020_v9, %v4477_v58 }
 0x386   : > { %6005 = vst [vmem:[#allocation62_spill] sm:$0xff] %v4674_v52  ;;  %6009 = vst [vmem:[#allocation111_spill] sm:$0xff] %v4683_v50  ;;  %6016 = sst [smem:[#allocation61_spill]] %s4704_s15  ;;  %s4760_s15 = sld [smem:[#allocation2 + $0x74]]  ;;  %v6055_v50 = vstv %s6051_s25 }
 0x387   : > { %6011 = vst [vmem:[#allocation112_spill] sm:$0xff] %v4688_v24  ;;  %6013 = vst [vmem:[#allocation113_spill] sm:$0xff] %v4693_v31  ;;  %6017 = sst [smem:[#allocation51_spill]] %s4706_s26  ;;  %s4724_s26 = sld [smem:[#allocation2 + $0x72]] }
 0x388   : > { %6015 = vst [vmem:[#allocation82_spill] sm:$0xff] %v4698_v5  ;;  %6019 = vst [vmem:[#allocation63_spill] sm:$0xff] %v4711_v46  ;;  %6041 = sst [smem:[#allocation25_spill]] %s4768_s6  ;;  %s6046_s3 = sld [smem:[#allocation61_spill]] }
 0x389   : > { %6022 = vst [vmem:[#allocation83_spill] sm:$0xff] %v4716_v2  ;;  %6042 = sst [smem:[#allocation68_spill]] %s4770_s12  ;;  %s6047_s30 = sld [smem:[#allocation51_spill]]  ;;  %v6063_v2 = vstv %s6053_s27 }
 0x38a   : > { %s6061_s12 = sld [smem:[#allocation32_spill]]  ;;  %s6062_s6 = sld [smem:[#allocation33_spill]]  ;;  %v6064_v46 = vmov %v6063_v2 }
 0x38b   : > { %s6070_s27 = sld [smem:[#allocation34_spill]]  ;;  %s6075_s25 = sld [smem:[#allocation37_spill]] }
 0x390   : > { %v4445_v57 = vpop.permute.xlu0 %1469  ;;  %v4447_v14 = vpop.permute.xlu1 %1471 }
 0x391   : > { %v1475_v15 = vsel %vm3424_vm8, %v4445_v57, 0.0  ;;  %v1476_v32 = vsel %vm3424_vm8, %v4447_v14, 0.0  ;;  %v6086_v21 = vstv %s6070_s27  ;;  %v6095_v1 = vstv %s6075_s25  ;;  %s6107_s27 = sld [smem:[#allocation41_spill]]  ;;  %s6110_s25 = sld [smem:[#allocation43_spill]] }
 0x392   : > { %v4818_v14 = vmul.f32 %v6055_v50, %v1475_v15  ;;  %v6087_v59 = vmov %v6086_v21 }
 0x394   : > { %v4504_v4 = vpop.permute.xlu1 %1493 }
 0x395   : > { %v1498_v13 = vsel %vm3424_vm8, %v4504_v4, 0.0  ;;  %v6059_v4 = vmov %v6055_v50 }
 0x396   : > { %v4526_v56 = vpop.permute.xlu0 %1491  ;;  %v4831_v10 = vmul.f32 %v6059_v4, %v1476_v32  ;;  %v4846_v49 = vmul.f32 %v6064_v46, %v1498_v13  ;;  %v6071_v46 = vmov %v6067_v17 }
 0x397   : > { %v1497_v57 = vsel %vm3424_vm8, %v4526_v56, 0.0  ;;  %v6058_v56 = vstv %s6052_s29  ;;  %s6073_s29 = sld [smem:[#allocation35_spill]] }
 0x398   : > { %v4600_v20 = vpop.permute.xlu1 %1515  ;;  %v4827_v52 = vmul.f32 %v6058_v56, %v1475_v15  ;;  %v6060_v34 = vmov %v6058_v56  ;;  %v4842_v25 = vmul.f32 %v6063_v2, %v1497_v57  ;;  %v6065_v15 = vstv %s6054_s20  ;;  %s6083_s20 = sld [smem:[#allocation45_spill]] }
 0x399   : > { %v1520_v62 = vsel %vm3424_vm8, %v4600_v20, 0.0  ;;  %v4835_v43 = vmul.f32 %v6060_v34, %v1476_v32  ;;  %v4850_v56 = vmul.f32 %v6065_v15, %v1498_v13  ;;  %v6066_v4 = vmov %v6065_v15 }
 0x39a   : > { %v4626_v19 = vpop.permute.xlu0 %1513  ;;  %v4861_v60 = vmul.f32 %v6067_v17, %v1520_v62  ;;  %v6068_v2 = vstv %s6057_s4  ;;  %s6085_s4 = sld [smem:[#allocation40_spill]] }
 0x39b   : > { %v1519_v50 = vsel %vm3424_vm8, %v4626_v19, 0.0  ;;  %v4857_v19 = vmul.f32 %v6066_v4, %v1497_v57  ;;  %v4865_v37 = vmul.f32 %v6068_v2, %v1520_v62  ;;  %v6074_v57 = vstv %s6061_s12  ;;  %s6093_s12 = sld [smem:[#allocation46_spill]] }
 0x39c   : > { %v4702_v42 = vpop.permute.xlu1 %1537  ;;  %v4872_v15 = vmul.f32 %v6071_v46, %v1519_v50  ;;  %v6077_v4 = vstv %s6062_s6  ;;  %s6103_s6 = sld [smem:[#allocation53_spill]] }
 0x39d   : > { %v1542_v34 = vsel %vm3424_vm8, %v4702_v42, 0.0  ;;  %6069 = vst [vmem:[#allocation64_spill] sm:$0xff] %v4865_v37  ;;  %v6072_v42 = vmov %v6068_v2  ;;  %v6082_v53 = vmov %v6077_v4 }
 0x39e   : > { %v4722_v31 = vpop.permute.xlu0 %1535  ;;  %v4876_v38 = vmul.f32 %v6072_v42, %v1519_v50  ;;  %v4890_v2 = vmul.f32 %v6077_v4, %v1542_v34  ;;  %v6079_v42 = vmov %v6074_v57 }
 0x39f   : > { %v1541_v13 = vsel %vm3424_vm8, %v4722_v31, 0.0  ;;  %v4886_v31 = vmul.f32 %v6074_v57, %v1542_v34 }
 0x3a0   : > { %v4744_v58 = vpop.permute.xlu1 %1641  ;;  %6078 = vst [vmem:[#allocation84_spill] sm:$0xff] %v4890_v2  ;;  %v4902_v57 = vmul.f32 %v6082_v53, %v1541_v13  ;;  %v6097_v2 = vmov %v6095_v1 }
 0x3a1   : > { %v1646_v62 = vsel %vm228_vm7, %v4744_v58, 0.0  ;;  %6076 = vst [vmem:[#allocation65_spill] sm:$0xff] %v4886_v31  ;;  %v4898_v58 = vmul.f32 %v6079_v42, %v1541_v13  ;;  %v6089_v42 = vstv %s6073_s29  ;;  %s6108_s29 = sld [smem:[#allocation42_spill]] }
 0x3a2   : > { %v4754_v6 = vpop.permute.xlu0 %1639  ;;  %6084 = vst [vmem:[#allocation66_spill] sm:$0xff] %v4902_v57  ;;  %v4914_v28 = vmul.f32 %v6087_v59, %v1646_v62  ;;  %v4918_v45 = vmul.f32 %v6089_v42, %v1646_v62  ;;  %v6092_v7 = vmov %v6089_v42  ;;  %v6099_v57 = vstv %s6021_s5  ;;  %s6112_s5 = sld [smem:[#allocation54_spill]] }
 0x3a3   : > { %v1645_v17 = vsel %vm228_vm7, %v4754_v6, 0.0  ;;  %6081 = vst [vmem:[#allocation85_spill] sm:$0xff] %v4898_v58  ;;  %v6101_v62 = vmov %v6099_v57 }
 0x3a4   : > { %v1650_v9 = vpop.permute.xlu1 %1649  ;;  %6088 = vst [vmem:[#allocation86_spill] sm:$0xff] %v4914_v28  ;;  %6090 = vst [vmem:[#allocation67_spill] sm:$0xff] %v4918_v45 }
 0x3a5   : > { %v1654_v6 = vsel %vm228_vm7, %v1650_v9, 0.0  ;;  %v4910_v9 = vmul.f32 %v6086_v21, %v1645_v17 }
 0x3a6   : > { %v1648_v24 = vpop.permute.xlu0 %1647  ;;  %v4932_v21 = vmul.f32 %v6097_v2, %v1654_v6  ;;  %v4936_v59 = vmul.f32 %v6099_v57, %v1654_v6 }
 0x3a7   : > { %v1653_v50 = vsel %vm228_vm7, %v1648_v24, 0.0 }
 0x3a8   : > { %v1658_v55 = vpop.permute.xlu1 %1657  ;;  %6098 = vst [vmem:[#allocation90_spill] sm:$0xff] %v4932_v21  ;;  %6100 = vst [vmem:[#allocation89_spill] sm:$0xff] %v4936_v59  ;;  %v4940_v42 = vmul.f32 %v6101_v62, %v1653_v50 }
 0x3a9   : > { %v1662_v34 = vsel %vm228_vm7, %v1658_v55, 0.0  ;;  %v4924_v55 = vmul.f32 %v6092_v7, %v1645_v17  ;;  %v6104_v17 = vstv %s6080_s22 }
 0x3aa   : > { %v1656_v5 = vpop.permute.xlu0 %1655  ;;  %6102 = vst [vmem:[#allocation91_spill] sm:$0xff] %v4940_v42  ;;  %v6119_v42 = vstv %s6085_s4 }
 0x3ab   : > { %6094 = vst [vmem:[#allocation87_spill] sm:$0xff] %v4924_v55  ;;  %v1661_v7 = vsel %vm228_vm7, %v1656_v5, 0.0  ;;  %v6142_v55 = vstv %s4530_s19 }
 0x3ac   : > { %v1666_v20 = vpop.permute.xlu1 %1665  ;;  %v4974_v39 = vmul.f32 %v6119_v42, %v1661_v7 }
 0x3ae   : > { %v1664_v32 = vpop.permute.xlu0 %1663  ;;  %6120 = vst [vmem:[#allocation115_spill] sm:$0xff] %v4974_v39 }
 0x3b0   : > { %v1188_v46 = vpop.permute.xlu1 %1187 }
 0x3b1   : > { %v1192_v24 = vsel %vm3424_vm8, %v1188_v46, 0.0  ;;  %v4928_v46 = vmul.f32 %v6095_v1, %v1653_v50  ;;  %v6106_v1 = vstv %s6083_s20  ;;  %v1670_v50 = vsel %vm228_vm7, %v1666_v20, 0.0  ;;  %s6123_s20 = sld [smem:[#allocation48_spill]] }
 0x3b2   : > { %v1186_v4 = vpop.permute.xlu0 %1185  ;;  %v1274_v2 = vmul.f32 %v6106_v1, %v1192_v24  ;;  %v6113_v57 = vmov %v6106_v1  ;;  %v1669_v1 = vsel %vm228_vm7, %v1664_v32, 0.0 }
 0x3b3   : > { %v1191_v13 = vsel %vm3535_vm9, %v1186_v4, 0.0  ;;  %6096 = vst [vmem:[#allocation88_spill] sm:$0xff] %v4928_v46  ;;  %v4946_v4 = vmul.f32 %v6104_v17, %v1662_v34  ;;  %v6109_v46 = vstv %s6085_s4  ;;  %s6135_s4 = sld [smem:[#allocation56_spill]] }
 0x3b4   : > { %v1214_v21 = vpop.permute.xlu1 %1213  ;;  %v4952_v6 = vmul.f32 %v6109_v46, %v1662_v34  ;;  %v1273_v62 = vmul.f32 %v6113_v57, %v1191_v13 }
 0x3b5   : > { %6105 = vst [vmem:[#allocation20_spill] sm:$0xff] %v4946_v4  ;;  %v1218_v17 = vsel %vm3424_vm8, %v1214_v21, 0.0  ;;  %v6114_v4 = vstv %s6093_s12  ;;  %v6121_v21 = vstv %s6103_s6  ;;  %s6144_s12 = sld [smem:[#allocation49_spill]] }
 0x3b6   : > { %6111 = vst [vmem:[#allocation36_spill] sm:$0xff] %v4952_v6  ;;  %v1212_v5 = vpop.permute.xlu0 %1211  ;;  %v1291_v59 = vmul.f32 %v6114_v4, %v1191_v13  ;;  %v6115_v34 = vmov %v6114_v4  ;;  %v6117_v6 = vstv %s6080_s22  ;;  %v6122_v58 = vmov %v6121_v21  ;;  %s6130_s22 = sld [smem:[#allocation47_spill]] }
 0x3b7   : > { %v1292_v46 = vmul.f32 %v6115_v34, %v1192_v24  ;;  %v1217_v20 = vsel %vm3535_vm9, %v1212_v5, 0.0  ;;  %v4970_v57 = vmul.f32 %v6117_v6, %v1661_v7  ;;  %v1280_v32 = vmul.f32 %v6122_v58, %v1218_v17 }
 0x3b8   : > { %v1279_v40 = vmul.f32 %v6121_v21, %v1217_v20  ;;  %v6124_v13 = vstv %s6107_s27  ;;  %v6126_v4 = vstv %s6108_s29  ;;  %v6128_v34 = vstv %s6110_s25  ;;  %v1240_v7 = vpop.permute.xlu1 %1239  ;;  %s2533_s25 = smov [#allocation7]  }
 0x3b9   : > { %6118 = vst [vmem:[#allocation92_spill] sm:$0xff] %v4970_v57  ;;  %v4982_v24 = vmul.f32 %v6124_v13, %v1670_v50  ;;  %v4986_v5 = vmul.f32 %v6126_v4, %v1670_v50  ;;  %v1276_v6 = vadd.f32 %v1274_v2, %v6128_v34  ;;  %v6129_v57 = vstv %s6112_s5  ;;  %s2460_s5 = sshll.u32 %s2533_s25, 4  ;;  %s2461_s5 = int_to_ptr.vmem [resolvable:$false] %s2460_s5 }
 0x3ba   : > { %v1285_v42 = vmul.f32 %v6129_v57, %v1217_v20  ;;  %v6131_v21 = vmov %v6124_v13  ;;  %v6133_v58 = vmov %v6128_v34  ;;  %v6134_v13 = vmov %v6129_v57  ;;  %v1238_v28 = vpop.permute.xlu0 %1237 }
 0x3bb   : > { %6125 = vst [vmem:[#allocation116_spill] sm:$0xff] %v4982_v24  ;;  %6127 = vst [vmem:[#allocation117_spill] sm:$0xff] %v4986_v5  ;;  %v4994_v39 = vmul.f32 %v6131_v21, %v1669_v1  ;;  %v1275_v45 = vadd.f32 %v1273_v62, %v6133_v58  ;;  %v1286_v24 = vmul.f32 %v6134_v13, %v1218_v17  ;;  %v1244_v50 = vsel %vm3424_vm8, %v1240_v7, 0.0 }
 0x3bc   : > { %v6136_v2 = vstv %s6116_s14  ;;  %v1243_v57 = vsel %vm3535_vm9, %v1238_v28, 0.0  ;;  %v6138_v5 = vstv %s6038_s18  ;;  %v6143_v7 = vstv %s6108_s29  ;;  %s6155_s14 = sld [smem:[#allocation57_spill]]  ;;  %s6172_s18 = sld [smem:[#allocation58_spill]] }
 0x3bd   : > { %6132 = vst [vmem:[#allocation118_spill] sm:$0xff] %v4994_v39  ;;  %v1293_v4 = vadd.f32 %v1291_v59, %v6136_v2  ;;  %v6137_v34 = vmov %v6136_v2  ;;  %v1298_v21 = vmul.f32 %v6138_v5, %v1244_v50  ;;  %v6139_v39 = vstv %s6123_s20  ;;  %s2462_s20 = scalar_lea.vmem %s2461_s5, 2048 }
 0x3be   : > { %v1294_v20 = vadd.f32 %v1292_v46, %v6137_v34  ;;  %v1281_v62 = vadd.f32 %v1279_v40, %v6139_v39  ;;  %v6140_v58 = vmov %v6139_v39  ;;  %v6141_v13 = vmov %v6138_v5  ;;  %v1266_v5 = vpop.permute.xlu1 %1265  ;;  %v1264_v12 = vpop.permute.xlu0 %1263 }
 0x3bf   : > { %v1282_v17 = vadd.f32 %v1280_v32, %v6140_v58  ;;  %v1297_v31 = vmul.f32 %v6141_v13, %v1243_v57  ;;  %v1315_v37 = vmul.f32 %v6142_v55, %v1243_v57  ;;  %v5020_v59 = vmul.f32 %v6143_v7, %v1669_v1 }
 0x3c0   : > { %v6145_v46 = vstv %s6130_s22  ;;  %v6146_v34 = vmov %v6142_v55  ;;  %v1332_v40 = vadd.f32 %v4458_v26, %v1276_v6  ;;  %v6148_v58 = vstv %s6135_s4 }
 0x3c1   : > { %v1287_v2 = vadd.f32 %v1285_v42, %v6145_v46  ;;  %v1316_v28 = vmul.f32 %v6146_v34, %v1244_v50  ;;  %v6147_v39 = vmov %v6145_v46  ;;  %v1300_v13 = vadd.f32 %v1298_v21, %v6148_v58 }
 0x3c2   : > { %v1288_v32 = vadd.f32 %v1286_v24, %v6147_v39  ;;  %v1270_v55 = vsel %vm3424_vm8, %v1266_v5, 0.0  ;;  %v1331_v1 = vadd.f32 %v4453_v30, %v1275_v45  ;;  %v1269_v42 = vsel %vm3535_vm9, %v1264_v12, 0.0  ;;  %v1376_v39 = vpop.permute.xlu0 %1375 }
 0x3c3   : > { %v6149_v50 = vstv %s4576_s23  ;;  %v1349_v7 = vadd.f32 %v4455_v61, %v1293_v4  ;;  %v1350_v26 = vadd.f32 %v4465_v27, %v1294_v20  ;;  %v6150_v24 = vmov %v6148_v58  ;;  %v1378_v27 = vpop.permute.xlu1 %1377  ;;  %s6254_s23 = sld [smem:[#allocation21_spill]] }
 0x3c4   : > { %v1304_v57 = vmul.f32 %v6149_v50, %v1270_v55  ;;  %v1299_v6 = vadd.f32 %v1297_v31, %v6150_v24  ;;  %v6151_v21 = vstv %s6144_s12  ;;  %v1337_v34 = vadd.f32 %v4467_v33, %v1281_v62 }
 0x3c5   : > { %v1317_v46 = vadd.f32 %v1315_v37, %v6151_v21  ;;  %v1338_v45 = vadd.f32 %v4472_v36, %v1282_v17  ;;  %v6152_v30 = vmov %v6151_v21  ;;  %v6153_v53 = vmov %v6149_v50 }
 0x3c6   : > { %v1318_v12 = vadd.f32 %v1316_v28, %v6152_v30  ;;  %v1303_v5 = vmul.f32 %v6153_v53, %v1269_v42  ;;  %v6154_v61 = vstv %s4578_s7  ;;  %v1343_v31 = vadd.f32 %v4469_v0, %v1287_v2  ;;  %s6263_s7 = sld [smem:[#allocation69_spill]] }
 0x3c7   : > { %v1310_v4 = vmul.f32 %v6154_v61, %v1270_v55  ;;  %v6156_v20 = vmov %v6154_v61  ;;  %v1382_v33 = vsel %vm228_vm7, %v1378_v27, 0.0  ;;  %v1344_v36 = vadd.f32 %v4484_v23, %v1288_v32 }
 0x3c8   : > { %v1309_v37 = vmul.f32 %v6156_v20, %v1269_v42  ;;  %v1356_v62 = vadd.f32 %v4495_v8, %v1300_v13  ;;  %v6157_v17 = vstv %s4554_s8  ;;  %v1381_v58 = vsel %vm3708_vm10, %v1376_v39, 0.0  ;;  %v1386_v20 = vpop.permute.xlu1 %1385 }
 0x3c9   : > { %v1306_v28 = vadd.f32 %v1304_v57, %v6157_v17  ;;  %v6158_v55 = vstv %s4602_s13  ;;  %v6159_v24 = vstv %s4604_s1  ;;  %v1355_v53 = vadd.f32 %v4486_v41, %v1299_v6  ;;  %s6272_s1 = sld [smem:[#allocation15_spill]] }
 0x3ca   : > { %v1410_v50 = vmul.f32 %v6158_v55, %v1382_v33  ;;  %v1428_v0 = vmul.f32 %v6159_v24, %v1382_v33  ;;  %v6160_v2 = vmov %v6158_v55  ;;  %v6161_v21 = vmov %v6159_v24  ;;  %v1384_v24 = vpop.permute.xlu0 %1383 }
 0x3cb   : > { %v1409_v42 = vmul.f32 %v6160_v2, %v1381_v58  ;;  %v1427_v30 = vmul.f32 %v6161_v21, %v1381_v58  ;;  %v1373_v23 = vadd.f32 %v4488_v44, %v1317_v46  ;;  %v6162_v32 = vmov %v6157_v17 }
 0x3cc   : > { %v1305_v8 = vadd.f32 %v1303_v5, %v6162_v32  ;;  %v6163_v13 = vstv %s6155_s14  ;;  %v1412_v61 = vadd.f32 %v1410_v50, %v1332_v40  ;;  %v1430_v27 = vadd.f32 %v1428_v0, %v1350_v26  ;;  %v1394_v21 = vpop.permute.xlu1 %1393 }
 0x3cd   : > { %v1312_v57 = vadd.f32 %v1310_v4, %v6163_v13  ;;  %v6164_v39 = vmov %v6163_v13  ;;  %v1411_v17 = vadd.f32 %v1409_v42, %v1331_v1  ;;  %v1429_v55 = vadd.f32 %v1427_v30, %v1349_v7 }
 0x3ce   : > { %v1311_v33 = vadd.f32 %v1309_v37, %v6164_v39  ;;  %v1390_v41 = vsel %vm228_vm7, %v1386_v20, 0.0  ;;  %v1389_v44 = vsel %vm3708_vm10, %v1384_v24, 0.0  ;;  %v6165_v6 = vstv %s4628_s24 }
 0x3cf   : > { %v1416_v46 = vmul.f32 %v6165_v6, %v1390_v41  ;;  %v1374_v5 = vadd.f32 %v4498_v3, %v1318_v12  ;;  %v1362_v40 = vadd.f32 %v4511_v51, %v1306_v28  ;;  %v1548_v26 = vadd.f32 %v4831_v10, %v1412_v61  ;;  %v1392_v51 = vpop.permute.xlu0 %1391 }
 0x3d0   : > { %v1566_v4 = vadd.f32 %v4835_v43, %v1430_v27  ;;  %v6166_v37 = vmov %v6165_v6  ;;  %v6167_v7 = vstv %s4630_s0  ;;  %v1547_v50 = vadd.f32 %v4818_v14, %v1411_v17  ;;  %s6276_s0 = sld [smem:[#allocation18_spill]] }
 0x3d1   : > { %v1415_v1 = vmul.f32 %v6166_v37, %v1389_v44  ;;  %v1421_v58 = vmul.f32 %v6167_v7, %v1389_v44  ;;  %v1418_v0 = vadd.f32 %v1416_v46, %v1338_v45  ;;  %v6168_v2 = vmov %v6167_v7 }
 0x3d2   : > { %v1422_v42 = vmul.f32 %v6168_v2, %v1390_v41  ;;  %v1361_v3 = vadd.f32 %v4500_v48, %v1305_v8  ;;  %v1565_v10 = vadd.f32 %v4827_v52, %v1429_v55  ;;  %v1398_v43 = vsel %vm228_vm7, %v1394_v21, 0.0  ;;  %v6180_v21 = vld [vmem:[#allocation87_spill] sm:$0xff] }
 0x3d3   : > { %v1367_v12 = vadd.f32 %v4502_v29, %v1311_v33  ;;  %v1368_v28 = vadd.f32 %v4514_v47, %v1312_v57  ;;  %v1417_v30 = vadd.f32 %v1415_v1, %v1337_v34  ;;  %v1423_v32 = vadd.f32 %v1421_v58, %v1343_v31  ;;  %v1402_v57 = vpop.permute.xlu1 %1401  ;;  %v1400_v24 = vpop.permute.xlu0 %1399 }
 0x3d4   : > { %v1397_v14 = vsel %vm3708_vm10, %v1392_v51, 0.0  ;;  %v6169_v45 = vstv %s4652_s21  ;;  %v6171_v8 = vstv %s6043_s2  ;;  %v1596_v52 = vadd.f32 %v4535_v63, %v1548_v26  ;;  %s6236_s2 = sld [smem:[#allocation23_spill]] }
 0x3d5   : > { %v1434_v13 = vmul.f32 %v6169_v45, %v1398_v43  ;;  %v6170_v61 = vmov %v6169_v45  ;;  %v1451_v27 = vmul.f32 %v6171_v8, %v1397_v14  ;;  %v1614_v20 = vadd.f32 %v4540_v54, %v1566_v4 }
 0x3d6   : > { %v1433_v48 = vmul.f32 %v6170_v61, %v1397_v14  ;;  %v1424_v29 = vadd.f32 %v1422_v42, %v1344_v36  ;;  %v1554_v47 = vadd.f32 %v4846_v49, %v1418_v0  ;;  %v6173_v34 = vmov %v6171_v8  ;;  %v6187_v61 = vld [vmem:[#allocation85_spill] sm:$0xff]  ;;  %p6280_p12 = scmp.ne.s32.totalorder %s6276_s0, 0 }
 0x3d7   : > { %v1452_v31 = vmul.f32 %v6173_v34, %v1398_v43  ;;  %v1595_v39 = vadd.f32 %v4519_v16, %v1547_v50  ;;  %v1453_v17 = vadd.f32 %v1451_v27, %v1373_v23  ;;  %v1436_v55 = vadd.f32 %v1434_v13, %v1356_v62  ;;  %v1740_v11 = vpop.permute.xlu1 %1739 }
 0x3d8   : > { %v1435_v33 = vadd.f32 %v1433_v48, %v1355_v53  ;;  %v1406_v63 = vsel %vm228_vm7, %v1402_v57, 0.0  ;;  %v1553_v54 = vadd.f32 %v4842_v25, %v1417_v30  ;;  %v1559_v36 = vadd.f32 %v4857_v19, %v1423_v32  ;;  %v6184_v30 = vld [vmem:[#allocation86_spill] sm:$0xff] }
 0x3d9   : > { %v1405_v49 = vsel %vm3708_vm10, %v1400_v24, 0.0  ;;  %v6174_v41 = vstv %s6172_s18  ;;  %v1454_v6 = vadd.f32 %v1452_v31, %v1374_v5  ;;  %v6176_v26 = vstv %s6045_s9  ;;  %v6190_v31 = vld [vmem:[#allocation99_spill] sm:$0xff]  ;;  %s6202_s9 = sld [smem:[#allocation55_spill]] }
 0x3da   : > { %v1440_v44 = vmul.f32 %v6174_v41, %v1406_v63  ;;  %v6175_v46 = vmov %v6174_v41  ;;  %v1445_v53 = vmul.f32 %v6176_v26, %v1405_v49  ;;  %v1613_v62 = vadd.f32 %v4524_v35, %v1565_v10  ;;  %v1738_v35 = vpop.permute.xlu0 %1737 }
 0x3db   : > { %v1439_v16 = vmul.f32 %v6175_v46, %v1405_v49  ;;  %v1560_v23 = vadd.f32 %v4850_v56, %v1424_v29  ;;  %v6177_v37 = vmov %v6176_v26  ;;  %v1675_v19 = vadd.f32 %v4910_v9, %v1595_v39  ;;  %v6179_v9 = vld [vmem:[#allocation64_spill] sm:$0xff]  ;;  %v1766_v13 = vpop.permute.xlu1 %1765 }
 0x3dc   : > { %v1442_v4 = vadd.f32 %v1440_v44, %v1362_v40  ;;  %v1446_v25 = vmul.f32 %v6177_v37, %v1406_v63  ;;  %v1571_v1 = vadd.f32 %v4872_v15, %v1435_v33  ;;  %v1589_v5 = vadd.f32 %v4876_v38, %v1453_v17  ;;  %v6189_v29 = vld [vmem:[#allocation98_spill] sm:$0xff]  ;;  %v6191_v33 = vld [vmem:[#allocation66_spill] sm:$0xff] }
 0x3dd   : > { %v1572_v7 = vadd.f32 %v4861_v60, %v1436_v55  ;;  %v1441_v58 = vadd.f32 %v1439_v16, %v1361_v3  ;;  %v1447_v50 = vadd.f32 %v1445_v53, %v1367_v12  ;;  %v1743_v40 = vsel %vm3424_vm8, %v1738_v35, 0.0  ;;  %v6183_v60 = vld [vmem:[#allocation65_spill] sm:$0xff]  ;;  %v6192_v55 = vld [vmem:[#allocation84_spill] sm:$0xff]  ;;  %v6201_v35 = vld [vmem:[#allocation73_spill] sm:$0xff] }
 0x3de   : > { %v1448_v56 = vadd.f32 %v1446_v25, %v1368_v28  ;;  %v1744_v2 = vsel %vm3805_vm11, %v1740_v11, 0.0  ;;  %v1590_v42 = vadd.f32 %v6179_v9, %v1454_v6  ;;  %v1693_v15 = vadd.f32 %v6180_v21, %v1613_v62  ;;  %v6185_v28 = vld [vmem:[#allocation67_spill] sm:$0xff]  ;;  %v1764_v39 = vpop.permute.xlu0 %1763  ;;  %v6197_v62 = vld [vmem:[#allocation75_spill] sm:$0xff]  ;;  %v6204_v9 = vld [vmem:[#allocation92_spill] sm:$0xff] }
 0x3df   : > { %v6181_v10 = vstv %s6046_s3  ;;  %v6182_v38 = vstv %s6047_s30  ;;  %v1578_v3 = vadd.f32 %v6183_v60, %v1442_v4  ;;  %v1676_v12 = vadd.f32 %v6184_v30, %v1596_v52  ;;  %s6198_s3 = sld [smem:[#allocation24_spill]]  ;;  %v1792_v37 = vpop.permute.xlu1 %1791  ;;  %v6200_v11 = vld [vmem:[#allocation91_spill] sm:$0xff]  ;;  %v6207_v60 = vld [vmem:[#allocation102_spill] sm:$0xff] }
 0x3e0   : > { %v1825_v51 = vmul.f32 %v6181_v10, %v1743_v40  ;;  %v1843_v43 = vmul.f32 %v6182_v38, %v1743_v40  ;;  %v1694_v32 = vadd.f32 %v6185_v28, %v1614_v20  ;;  %v6186_v14 = vmov %v6181_v10  ;;  %v6193_v20 = vld [vmem:[#allocation72_spill] sm:$0xff]  ;;  %v6203_v40 = vld [vmem:[#allocation90_spill] sm:$0xff] }
 0x3e1   : > { %v1826_v45 = vmul.f32 %v6186_v14, %v1744_v2  ;;  %v1577_v48 = vadd.f32 %v6187_v61, %v1441_v58  ;;  %v6188_v8 = vmov %v6182_v38  ;;  %v1601_v34 = vadd.f32 %v6189_v29, %v1553_v54  ;;  %v6210_v14 = vld [vmem:[#allocation103_spill] sm:$0xff] }
 0x3e2   : > { %v1844_v27 = vmul.f32 %v6188_v8, %v1744_v2  ;;  %v1607_v57 = vadd.f32 %v6190_v31, %v1559_v36  ;;  %v1583_v17 = vadd.f32 %v6191_v33, %v1447_v50  ;;  %v1584_v24 = vadd.f32 %v6192_v55, %v1448_v56  ;;  %v6196_v36 = vld [vmem:[#allocation74_spill] sm:$0xff]  ;;  %v1790_v56 = vpop.permute.xlu0 %1789  ;;  %v6211_v8 = vld [vmem:[#allocation89_spill] sm:$0xff]  ;;  %v6215_v55 = vld [vmem:[#allocation36_spill] sm:$0xff] }
 0x3e3   : > { %v1769_v52 = vsel %vm3424_vm8, %v1764_v39, 0.0  ;;  %v1602_v63 = vadd.f32 %v6193_v20, %v1554_v47  ;;  %v1827_v49 = vadd.f32 %v1825_v51, %v1675_v19  ;;  %v1845_v41 = vadd.f32 %v1843_v43, %v1693_v15  ;;  %v6199_v47 = vld [vmem:[#allocation88_spill] sm:$0xff]  ;;  %v6205_v15 = vld [vmem:[#allocation115_spill] sm:$0xff]  ;;  %v1818_v61 = vpop.permute.xlu1 %1817  ;;  %v6213_v31 = vld [vmem:[#allocation20_spill] sm:$0xff] }
 0x3e4   : > { %v6194_v44 = vstv %s4724_s26  ;;  %v6195_v46 = vstv %s6049_s11  ;;  %v1828_v26 = vadd.f32 %v1826_v45, %v1676_v12  ;;  %v1770_v54 = vsel %vm3805_vm11, %v1766_v13, 0.0  ;;  %v6214_v39 = vld [vmem:[#allocation76_spill] sm:$0xff]  ;;  %s6223_s11 = sld [smem:[#allocation22_spill]] }
 0x3e5   : > { %v1831_v6 = vmul.f32 %v6194_v44, %v1769_v52  ;;  %v1837_v16 = vmul.f32 %v6195_v46, %v1769_v52  ;;  %v1619_v53 = vadd.f32 %v6196_v36, %v1571_v1  ;;  %v1637_v4 = vadd.f32 %v6197_v62, %v1589_v5  ;;  %v6219_v36 = vld [vmem:[#allocation77_spill] sm:$0xff] }
 0x3e6   : > { %v1846_v25 = vadd.f32 %v1844_v27, %v1694_v32  ;;  %v1681_v19 = vadd.f32 %v6199_v47, %v1601_v34  ;;  %v1687_v58 = vadd.f32 %v6200_v11, %v1607_v57  ;;  %v1608_v50 = vadd.f32 %v6201_v35, %v1560_v23  ;;  %v1816_v33 = vpop.permute.xlu0 %1815  ;;  %v6220_v62 = vld [vmem:[#allocation105_spill] sm:$0xff] }
 0x3e7   : > { %v1682_v2 = vadd.f32 %v6203_v40, %v1602_v63  ;;  %v1699_v21 = vadd.f32 %v6204_v9, %v1619_v53  ;;  %v1717_v1 = vadd.f32 %v6205_v15, %v1637_v4  ;;  %v1795_v5 = vsel %vm3424_vm8, %v1790_v56, 0.0  ;;  %v1930_v35 = vpop.permute.xlu1 %1929  ;;  %v6225_v9 = vld [vmem:[#allocation116_spill] sm:$0xff]  ;;  %v6226_v15 = vld [vmem:[#allocation117_spill] sm:$0xff] }
 0x3e8   : > { %v1833_v10 = vadd.f32 %v1831_v6, %v1681_v19  ;;  %v1839_v51 = vadd.f32 %v1837_v16, %v1687_v58  ;;  %v6206_v38 = vmov %v6194_v44  ;;  %v1620_v30 = vadd.f32 %v6207_v60, %v1572_v7  ;;  %v6218_v6 = vld [vmem:[#allocation104_spill] sm:$0xff] }
 0x3e9   : > { %v1832_v43 = vmul.f32 %v6206_v38, %v1770_v54  ;;  %v6208_v23 = vmov %v6195_v46  ;;  %v6209_v28 = vstv %s6198_s3  ;;  %v1638_v45 = vadd.f32 %v6210_v14, %v1590_v42 }
 0x3ea   : > { %v1838_v12 = vmul.f32 %v6208_v23, %v1770_v54  ;;  %v1849_v32 = vmul.f32 %v6209_v28, %v1795_v5  ;;  %v1796_v13 = vsel %vm3805_vm11, %v1792_v37, 0.0  ;;  %v1688_v27 = vadd.f32 %v6211_v8, %v1608_v50 }
 0x3eb   : > { %v6212_v29 = vstv %s6202_s9  ;;  %v1700_v57 = vadd.f32 %v6213_v31, %v1620_v30  ;;  %v1625_v7 = vadd.f32 %v6214_v39, %v1577_v48  ;;  %v1718_v52 = vadd.f32 %v6215_v55, %v1638_v45 }
 0x3ec   : > { %v1867_v34 = vmul.f32 %v6212_v29, %v1795_v5  ;;  %v6216_v20 = vmov %v6209_v28  ;;  %v6217_v42 = vmov %v6212_v29  ;;  %v1631_v46 = vadd.f32 %v6218_v6, %v1583_v17  ;;  %v6224_v17 = vld [vmem:[#allocation118_spill] sm:$0xff] }
 0x3ed   : > { %v1850_v63 = vmul.f32 %v6216_v20, %v1796_v13  ;;  %v1868_v44 = vmul.f32 %v6217_v42, %v1796_v13  ;;  %v1834_v16 = vadd.f32 %v1832_v43, %v1682_v2  ;;  %v1821_v54 = vsel %vm3424_vm8, %v1816_v33, 0.0  ;;  %v6227_v43 = vld [vmem:[#allocation106_spill] sm:$0xff]  ;;  %v1938_v13 = vpop.permute.xlu1 %1937  ;;  %v6239_v20 = vld [vmem:[#allocation109_spill] sm:$0xff]  ;;  %v6240_v42 = vld [vmem:[#allocation79_spill] sm:$0xff] }
 0x3ee   : > { %v1626_v53 = vadd.f32 %v6219_v36, %v1578_v3  ;;  %v1632_v4 = vadd.f32 %v6220_v62, %v1584_v24  ;;  %v1840_v37 = vadd.f32 %v1838_v12, %v1688_v27  ;;  %v1851_v47 = vadd.f32 %v1849_v32, %v1699_v21  ;;  %v1928_v24 = vpop.permute.xlu0 %1927  ;;  %v6233_v27 = vld [vmem:[#allocation78_spill] sm:$0xff]  ;;  %v6242_v62 = vld [vmem:[#allocation81_spill] sm:$0xff] }
 0x3ef   : > { %v6221_v48 = vstv %s4740_s28  ;;  %v6222_v11 = vstv %s4742_s17  ;;  %v1869_v50 = vadd.f32 %v1867_v34, %v1717_v1  ;;  %v1705_v56 = vadd.f32 %v6224_v17, %v1625_v7  ;;  %v6234_v34 = vld [vmem:[#allocation108_spill] sm:$0xff]  ;;  %s6249_s28 = sld [smem:[#allocation25_spill]]  ;;  %s6250_s17 = sld [smem:[#allocation68_spill]] }
 0x3f0   : > { %v1855_v19 = vmul.f32 %v6221_v48, %v1821_v54  ;;  %v1861_v58 = vmul.f32 %v6222_v11, %v1821_v54  ;;  %v1711_v18 = vadd.f32 %v5020_v59, %v1631_v46  ;;  %v1822_v3 = vsel %vm3805_vm11, %v1818_v61, 0.0  ;;  %v6232_v61 = vld [vmem:[#allocation107_spill] sm:$0xff] }
 0x3f1   : > { %v5210_v40 = vadd.f32 %v1850_v63, %v1700_v57  ;;  %v5212_v2 = vadd.f32 %v1868_v44, %v1718_v52  ;;  %v1706_v21 = vadd.f32 %v6225_v9, %v1626_v53  ;;  %v1712_v5 = vadd.f32 %v6226_v15, %v1632_v4 }
 0x3f2   : > { %v5216_v1 = vadd.f32 %v1855_v19, %v1705_v56  ;;  %v5218_v38 = vadd.f32 %v1861_v58, %v1711_v18  ;;  %v1883_v59 = vadd.f32 %v6227_v43, %v1827_v49  ;;  %v1933_v0 = vsel %vm228_vm7, %v1928_v24, 0.0  ;;  %v1936_v39 = vpop.permute.xlu0 %1935 }
 0x3f3   : > { %v6228_v60 = vmov %v6221_v48  ;;  %v6229_v23 = vmov %v6222_v11  ;;  %v6230_v28 = vstv %s6223_s11  ;;  %v6231_v14 = vstv %s4752_s10  ;;  %s6247_s10 = sld [smem:[#allocation12_spill]] }
 0x3f4   : > { %v1856_v30 = vmul.f32 %v6228_v60, %v1822_v3  ;;  %v1862_v12 = vmul.f32 %v6229_v23, %v1822_v3  ;;  %v1961_v32 = vmul.f32 %v6230_v28, %v1933_v0  ;;  %v1979_v45 = vmul.f32 %v6231_v14, %v1933_v0  ;;  %v6248_v3 = vld [vmem:[#allocation110_spill] sm:$0xff]  ;;  %v1946_v0 = vpop.permute.xlu1 %1945 }
 0x3f5   : > { %v1901_v8 = vadd.f32 %v6232_v61, %v1845_v41  ;;  %v1884_v29 = vadd.f32 %v6233_v27, %v1828_v26  ;;  %v1902_v31 = vadd.f32 %v6234_v34, %v1846_v25  ;;  %v1934_v57 = vsel %vm3898_vm12, %v1930_v35, 0.0  ;;  %v6241_v25 = vld [vmem:[#allocation80_spill] sm:$0xff] }
 0x3f6   : > { %v6237_v7 = vmov %v6230_v28  ;;  %v6238_v55 = vmov %v6231_v14  ;;  %v1889_v63 = vadd.f32 %v6239_v20, %v1833_v10  ;;  %v1895_v41 = vadd.f32 %v6240_v42, %v1839_v51  ;;  %v1944_v56 = vpop.permute.xlu0 %1943 }
 0x3f7   : > { %v1962_v33 = vmul.f32 %v6237_v7, %v1934_v57  ;;  %v1980_v52 = vmul.f32 %v6238_v55, %v1934_v57  ;;  %v1963_v44 = vadd.f32 %v1961_v32, %v1883_v59  ;;  %v1941_v26 = vsel %vm228_vm7, %v1936_v39, 0.0  ;;  %v6255_v7 = vld [vmem:[#allocation111_spill] sm:$0xff] }
 0x3f8   : > { %v1890_v6 = vadd.f32 %v6241_v25, %v1834_v16  ;;  %v1942_v46 = vsel %vm3898_vm12, %v1938_v13, 0.0  ;;  %v1981_v54 = vadd.f32 %v1979_v45, %v1901_v8  ;;  %v1896_v4 = vadd.f32 %v6242_v62, %v1840_v37 }
 0x3f9   : > { %v1964_v36 = vadd.f32 %v1962_v33, %v1884_v29  ;;  %v1982_v53 = vadd.f32 %v1980_v52, %v1902_v31  ;;  %v6243_v48 = vstv %s4760_s15  ;;  %v6244_v11 = vstv %s6236_s2  ;;  %s188_s19 = sand.u32 1, %s6247_s10   ;;  %v6256_v33 = vld [vmem:[#allocation112_spill] sm:$0xff]  ;;  %s6278_s15 = sld [smem:[#allocation122_spill]] }
 0x3fa   : > { %v1967_v19 = vmul.f32 %v6243_v48, %v1941_v26  ;;  %v1973_v10 = vmul.f32 %v6244_v11, %v1941_v26  ;;  %v6245_v58 = vmov %v6243_v48  ;;  %v6246_v35 = vmov %v6244_v11  ;;  %s5269_s8 = sshll.u32 %s188_s19, 6  ;;  %v1952_v39 = vpop.permute.xlu0 %1951  ;;  %v6260_v26 = vld [vmem:[#allocation100_spill] sm:$0xff]  ;;  %v1954_v48 = vpop.permute.xlu1 %1953  ;;  %s5343_s27 = scalar_lea.sflag [#allocation3], %s188_s19 }
 0x3fb   : > { %v1968_v51 = vmul.f32 %v6245_v58, %v1942_v46  ;;  %v1974_v17 = vmul.f32 %v6246_v35, %v1942_v46  ;;  %v1858_v18 = vadd.f32 %v1856_v30, %v1706_v21  ;;  %v1864_v16 = vadd.f32 %v1862_v12, %v1712_v5  ;;  %v6251_v12 = vld [vmem:[#allocation62_spill] sm:$0xff]  ;;  %s5298_s13 = scalar_lea.vmem [#allocation7], %s5269_s8 }
 0x3fc   : > { %v1907_v24 = vadd.f32 %v6248_v3, %v1851_v47  ;;  %v1949_v9 = vsel %vm228_vm7, %v1944_v56, 0.0  ;;  %v1969_v37 = vadd.f32 %v1967_v19, %v1889_v63  ;;  %v1975_v15 = vadd.f32 %v1973_v10, %v1895_v41  ;;  %v6259_v41 = vld [vmem:[#allocation95_spill] sm:$0xff]  ;;  %v2418_v19 = vld [vmem:[%s6254_s23] sm:$0xff]  ;;  %v2419_v10 = vld [vmem:[%s6254_s23 + $0x10] sm:$0xff]  ;;  %s2073_s24 = sshll.u32 %s5298_s13, 4  ;;  %s5329_s24 = int_to_ptr.vmem [resolvable:$true] %s2073_s24 }
 0x3fd   : > { %v1970_v43 = vadd.f32 %v1968_v51, %v1890_v6  ;;  %v1976_v59 = vadd.f32 %v1974_v17, %v1896_v4  ;;  %v2007_v60 = vmax.f32 %v1963_v44, 0.0  ;;  %v2017_v23 = vmax.f32 %v1981_v54, 0.0  ;;  %v6261_v6 = vld [vmem:[#allocation94_spill] sm:$0xff]  ;;  %v6262_v54 = vld [vmem:[#allocation96_spill] sm:$0xff]  ;;  %v2420_v51 = vld [vmem:[%s6254_s23 + $0x8] sm:$0xff]  ;;  %s2456_s29 = scalar_lea.vmem %s5329_s24, 1024  ;;  %p2463_p8 = scmp.lt.s32.totalorder %s5329_s24, %s2461_s5 }
 0x3fe   : > { %v2008_v28 = vmax.f32 %v1964_v36, 0.0  ;;  %v2018_v32 = vmax.f32 %v1982_v53, 0.0  ;;  %v2009_v21 = vmax.f32 %v1969_v37, 0.0  ;;  %v2015_v5 = vmax.f32 %v1975_v15, 0.0  ;;  %v2421_v17 = vld [vmem:[%s6254_s23 + $0x18] sm:$0xff]  ;;  %p2457_p10 = scmp.ne.s32.totalorder %s5329_s24, %s2456_s29  ;;  %p2464_p11 = scmp.lt.s32.totalorder %s2462_s20, %s2456_s29 }
 0x3ff   : > { %v2010_v47 = vmax.f32 %v1970_v43, 0.0  ;;  %v2016_v30 = vmax.f32 %v1976_v59, 0.0  ;;  %v1925_v14 = vadd.f32 %v6251_v12, %v1869_v50  ;;  %v6252_v45 = vstv %s6249_s28  ;;  %s6279_s26 = smov %s6278_s15 }
 0x400   : > { %v1985_v13 = vmul.f32 %v6252_v45, %v1949_v9  ;;  %v6253_v61 = vstv %s6250_s17  ;;  %v1950_v27 = vsel %vm3898_vm12, %v1946_v0, 0.0  ;;  %v2011_v29 = vadd.f32 %v2009_v21, %v2007_v60  ;;  %v6269_v0 = vld [vmem:[#allocation83_spill] sm:$0xff]  ;;  %p2458_p0 = pnand %p2457_p10, %p6280_p12  ;;  %p2465_p13 = por %p2464_p11, %p2463_p8 }
 0x401   : > { %v2003_v8 = vmul.f32 %v6253_v61, %v1949_v9  ;;  %v2019_v34 = vadd.f32 %v2017_v23, %v2015_v5  ;;  %v2012_v31 = vadd.f32 %v2010_v47, %v2008_v28  ;;  %v2020_v57 = vadd.f32 %v2018_v32, %v2016_v30 }
 0x402   : > { %v1908_v50 = vadd.f32 %v6255_v7, %v5210_v40  ;;  %v1926_v55 = vadd.f32 %v6256_v33, %v5212_v2  ;;  %v6257_v52 = vmov %v6252_v45  ;;  %v6258_v63 = vmov %v6253_v61  ;;  %v6264_v2 = vld [vmem:[#allocation113_spill] sm:$0xff]  ;;  %p2459_p7 = pneg %p2458_p0 }
 0x403   : > { %v1986_v20 = vmul.f32 %v6257_v52, %v1950_v27  ;;  %v2004_v42 = vmul.f32 %v6258_v63, %v1950_v27  ;;  %v2013_v44 = vadd.f32 %v2011_v29, %v6259_v41  ;;  %v2021_v25 = vadd.f32 %v2019_v34, %v6260_v26 }
 0x404   : > { %v2014_v46 = vadd.f32 %v2012_v31, %v6261_v6  ;;  %v2022_v36 = vadd.f32 %v2020_v57, %v6262_v54  ;;  %v1987_v53 = vadd.f32 %v1985_v13, %v1907_v24  ;;  %v2005_v40 = vadd.f32 %v2003_v8, %v1925_v14  ;;  %v6265_v24 = vld [vmem:[#allocation82_spill] sm:$0xff]  ;;  %v6273_v31 = vld [vmem:[#allocation101_spill] sm:$0xff]  ;;  %p2466_p1 = pnand %p2465_p13, %p2459_p7 }
 0x405   : > { %v1913_v62 = vadd.f32 %v6264_v2, %v5216_v1  ;;  %v1957_v4 = vsel %vm228_vm7, %v1952_v39, 0.0  ;;  %v2039_v11 = vadd.f32 %v2418_v19, %v2013_v44  ;;  %v2044_v58 = vadd.f32 %v2419_v10, %v2021_v25  ;;  %v6274_v39 = vld [vmem:[#allocation71_spill] sm:$0xff]  ;;  %v6277_v44 = vld [vmem:[#allocation70_spill] sm:$0xff] }
 0x406   : > { %v2040_v35 = vadd.f32 %v2420_v51, %v2014_v46  ;;  %v2045_v56 = vadd.f32 %v2421_v17, %v2022_v36  ;;  %v1988_v3 = vadd.f32 %v1986_v20, %v1908_v50  ;;  %v1919_v9 = vadd.f32 %v6265_v24, %v5218_v38  ;;  %v6268_v38 = vld [vmem:[#allocation63_spill] sm:$0xff]  ;;  %v2423_v20 = vld [vmem:[%s6254_s23 + $0x30] sm:$0xff]  ;;  %v2424_v25 = vld [vmem:[%s6254_s23 + $0x28] sm:$0xff] }
 0x407   : > { %v6266_v37 = vstv %s4776_s16  ;;  %v6267_v15 = vstv %s6263_s7  ;;  %2042 = vst.msk [vmem:[%s5298_s13] sm:$0xff] %vm2041_vm13, %v2039_v11  ;;  %2332 = vst.msk [vmem:[%s5298_s13 + $0x10] sm:$0xff] %vm2041_vm13, %v2044_v58  ;;  %v2006_v43 = vadd.f32 %v2004_v42, %v1926_v55  ;;  %v1914_v59 = vadd.f32 %v6268_v38, %v1858_v18  ;;  %s2344_s16 = sshll.u32 %s6272_s1, 10  ;;  %v6275_v42 = vld [vmem:[#allocation97_spill] sm:$0xff] }
 0x408   : > { %v1991_v1 = vmul.f32 %v6266_v37, %v1957_v4  ;;  %v1997_v22 = vmul.f32 %v6267_v15, %v1957_v4  ;;  %2043 = vst.msk [vmem:[%s5298_s13 + $0x8] sm:$0xff] %vm2041_vm13, %v2040_v35  ;;  %2333 = vst.msk [vmem:[%s5298_s13 + $0x18] sm:$0xff] %vm2041_vm13, %v2045_v56  ;;  %v1920_v60 = vadd.f32 %v6269_v0, %v1864_v16  ;;  %v1958_v23 = vsel %vm3898_vm12, %v1954_v48, 0.0  ;;  %v2422_v55 = vld [vmem:[%s6254_s23 + $0x20] sm:$0xff]  ;;  %s5327_s6 = scalar_lea.hbm %s6278_s15, %s2344_s16  ;;  %v2425_v46 = vld [vmem:[%s6254_s23 + $0x38] sm:$0xff] }
 0x409   : > { %v6270_v21 = vmov %v6266_v37  ;;  %v6271_v47 = vmov %v6267_v15  ;;  %v2023_v12 = vmax.f32 %v1987_v53, 0.0  ;;  %v2033_v14 = vmax.f32 %v2005_v40, 0.0 }
 0x40a   : > { %v1993_v28 = vadd.f32 %v1991_v1, %v1913_v62  ;;  %v1999_v32 = vadd.f32 %v1997_v22, %v1919_v9  ;;  %v1992_v5 = vmul.f32 %v6270_v21, %v1958_v23  ;;  %v1998_v30 = vmul.f32 %v6271_v47, %v1958_v23 }
 0x40b   : > { %v2024_v16 = vmax.f32 %v1988_v3, 0.0  ;;  %v2034_v8 = vmax.f32 %v2006_v43, 0.0 }
 0x40c   : > { %v2025_v45 = vmax.f32 %v1993_v28, 0.0  ;;  %v2031_v13 = vmax.f32 %v1999_v32, 0.0  ;;  %v1994_v61 = vadd.f32 %v1992_v5, %v1914_v59  ;;  %v2000_v18 = vadd.f32 %v1998_v30, %v1920_v60 }
 0x40e   : > { %v2027_v49 = vadd.f32 %v2025_v45, %v2023_v12  ;;  %v2035_v27 = vadd.f32 %v2033_v14, %v2031_v13  ;;  %v2026_v29 = vmax.f32 %v1994_v61, 0.0  ;;  %v2032_v34 = vmax.f32 %v2000_v18, 0.0 }
 0x410   : > { %v2029_v57 = vadd.f32 %v2027_v49, %v6273_v31  ;;  %v2037_v7 = vadd.f32 %v2035_v27, %v6274_v39  ;;  %v2028_v50 = vadd.f32 %v2026_v29, %v2024_v16  ;;  %v2036_v33 = vadd.f32 %v2034_v8, %v2032_v34 }
 0x412   : > { %v2049_v52 = vadd.f32 %v2422_v55, %v2029_v57  ;;  %v2054_v63 = vadd.f32 %v2423_v20, %v2037_v7  ;;  %v2030_v41 = vadd.f32 %v2028_v50, %v6275_v42  ;;  %v2038_v26 = vadd.f32 %v2036_v33, %v6277_v44 }
 0x414   : > { %2334 = vst.msk [vmem:[%s5298_s13 + $0x20] sm:$0xff] %vm2041_vm13, %v2049_v52  ;;  %2336 = vst.msk [vmem:[%s5298_s13 + $0x30] sm:$0xff] %vm2041_vm13, %v2054_v63  ;;  %v2050_v6 = vadd.f32 %v2424_v25, %v2030_v41  ;;  %v2055_v54 = vadd.f32 %v2425_v46, %v2038_v26 }
 0x416   : > { %2335 = vst.msk [vmem:[%s5298_s13 + $0x28] sm:$0xff] %vm2041_vm13, %v2050_v6  ;;  %2337 = vst.msk [vmem:[%s5298_s13 + $0x38] sm:$0xff] %vm2041_vm13, %v2055_v54 }
 0x417   : > { %2469 = shalt.err (!%p2466_p1)
}
 0x418   : > { %s2470_s22 = scalar_lea.hbm %s5327_s6, 1024  ;;  %s2474_s14 = scalar_lea.hbm %s6279_s26, 2048 }
 0x419   : > { %p2471_p2 = scmp.ne.s32.totalorder %s5327_s6, %s2470_s22  ;;  %p2475_p9 = scmp.lt.u32.totalorder %s5327_s6, %s6279_s26 }
 0x41a   : > { %p2476_p5 = scmp.lt.u32.totalorder %s2474_s14, %s2470_s22  ;;  %p2478_p10 = scmp.lt.u32.totalorder %s2470_s22, %s5327_s6 }
 0x41b   : > { %p2472_p3 = pnand %p2471_p2, %p6280_p12 }
 0x41c   : > { %p2477_p6 = por %p2476_p5, %p2475_p9 }
 0x41d   : > { %p2473_p4 = pneg %p2472_p3 }
 0x41e   : > { %p2479_p0 = por %p2478_p10, %p2477_p6 }
 0x420   : > { %p2480_p7 = pnand %p2479_p0, %p2473_p4 }
 0x422   : > { %2483 = shalt.err (!%p2480_p7)
}
 0x423   : > { %s2534_s9 = smov 128   ;;  %s2535_s11 = smov 8  }
 0x424   : > { %2353 = dma.vmem_to_hbm [thread:$0]  (%p6280_p12), %s5329_s24, 1024, %s5327_s6, %s5343_s27, %s2534_s9, %s2534_s9, %s2535_s11  }
 0x425 PF: > { %s6281_s2 = sld [smem:[#allocation14_spill]]  ;;  %s6282_s10 = sld [smem:[#allocation11_spill]] }
 0x426   : > { %s6283_s28 = sld [smem:[#allocation19_spill]] }
 0x42b   : > { %p2370_p8 = scmp.ge.s32.totalorder %s6281_s2, 2  ;;  %s2088_s17 = sand.u32 1, %s6282_s10  }
 0x42c   : > { %p6284_p11 = scmp.ne.s32.totalorder %s6283_s28, 0  ;;  %s2089_s19 = scalar_lea.sflag [#allocation3], %s2088_s17 }
 0x42e   : > { %p2363_p13 = pnand %p2370_p8, %p6284_p11 }
 0x430   : > { %2509 = dma.done.wait (!%p2363_p13), %s2089_s19, 1024  }
 0x431   : > { %2511 = vsyncadd (!%p2363_p13), %s2089_s19, 4294966272  ;;  %s6285_s15 = sld [smem:[#allocation16_spill]]  ;;  %s6286_s12 = sld [smem:[#allocation12_spill]] }
 0x432   : > { %s6287_s13 = sld [smem:[#allocation13_spill]]  ;;  %s6288_s14 = sld [smem:[#allocation17_spill]] }
 0x437   : > { %p15_p1 = scmp.ge.s32.totalorder %s6285_s15, 4  }
 0x439   :  { %17 = sbr.rel (!%p15_p1) target bundleno = 10 (0xa), region = 82 }
 0x440   :  { %2094 = vsyncpa [#allocation3], 1 }
 0x441   :  { %2096 = vsyncpa [#allocation3 + $0x1], 1 }
 0x442   :  { %2097 = vsyncpa [#allocation4], 1 }
 0x443   :  { %2099 = vsyncpa [#allocation4 + $0x1], 1 }
 0x444   :  { %2100 = vsyncpa [#allocation6], 1 }

</bundles_post_ra>
